<compile_context>
chip_gen: v5e
topology: v5e:2x2
jax: 0.10.0
libtpu: 0.0.40
codegen_flags: <defaults>
</compile_context>

<pallas_src>
import functools

import jax
import jax.numpy as jnp
import numpy as np
from jax.experimental import pallas as pl
from jax.experimental.pallas import tpu as pltpu


# -----------------------------------------------------------------------------
# Pallas kernel
# -----------------------------------------------------------------------------
def _residual_block_kernel(mask_ref, w0_ref, b0_ref, w1_ref, b1_ref,
                           x_ref, o_ref, *, width):
    """Whole batch in one invocation.

    mask_ref: (9, 1, HW) f32   per-tap 0/1 boundary masks (zero padding)
    w*_ref  : (9, C, C)  f32   conv weights, tap-major, (C_out, C_in) per tap
    b*_ref  : (C, 1)     f32   conv biases
    x_ref   : (B, C, HW) f32   input  (lane axis = flattened H*W)
    o_ref   : (B, C, HW) f32   output
    """
    B, C, HW = x_ref.shape

    def conv3x3(h, w_ref, b_ref):
        # h: (C, HW) -- channels on sublanes, flattened spatial on lanes.
        acc = jnp.zeros((C, HW), jnp.float32)
        for k in range(9):                        # unrolled: 9 taps
            dy, dx = k // 3 - 1, k % 3 - 1
            d = dy * width + dx                   # flat spatial offset of tap
            if d == 0:
                s = h                             # center tap: no shift/mask
            else:
                # s[ci, p] = h[ci, p + d] if the source pixel is in-bounds,
                # else 0 (zero padding): lane roll + 0/1 boundary mask.
                s = pltpu.roll(h, shift=(-d) % HW, axis=1) * mask_ref[k]
            w_k = w_ref[k]                        # (C_out, C_in)
            if C >= 16:
                # Real procgen channel counts: use the MXU, default precision,
                # f32 accumulation (no Precision.HIGHEST multi-pass emulation).
                # TODO(synk): fold the 9 taps into a single im2col matmul
                # (K = 9*C) when C is large.
                acc = acc + jnp.dot(w_k, s, preferred_element_type=jnp.float32)
            else:
                # Tiny C (here 4): channel contraction as C outer-product FMAs
                # on the VPU (exact f32, lane-dense, MXU stays idle).
                for ci in range(C):
                    acc = acc + w_k[:, ci:ci + 1] * s[ci:ci + 1, :]
        return acc + b_ref[...]                   # (C, 1) broadcasts over lanes

    for b in range(B):                            # unrolled: whole batch, 1 step
        x_b = x_ref[b]                            # (C, HW)
        h = jnp.maximum(x_b, 0.0)                 # relu
        h = conv3x3(h, w0_ref, b0_ref)            # conv0
        h = jnp.maximum(h, 0.0)                   # relu
        h = conv3x3(h, w1_ref, b1_ref)            # conv1
        o_ref[b] = (h + x_b).astype(o_ref.dtype)  # residual add


# -----------------------------------------------------------------------------
# Glue: boundary masks, layout conversion, pallas_call wrapper
# -----------------------------------------------------------------------------
def _build_tap_masks(H, W):
    """mask[k, 0, p] = 1 iff flattened position p has an in-bounds source pixel
    for 3x3 tap k (padding=1, zero padding)."""
    HW = H * W
    p = np.arange(HW)
    i, j = p // W, p % W
    masks = np.zeros((9, 1, HW), np.float32)
    for k in range(9):
        dy, dx = k // 3 - 1, k % 3 - 1
        valid = (i + dy >= 0) & (i + dy < H) & (j + dx >= 0) & (j + dx < W)
        masks[k, 0, valid] = 1.0
    return jnp.asarray(masks)


@jax.jit
def residual_block(x_nchw, w0, b0, w1, b1):
    """x_nchw: (B, C, H, W) f32; w*: (C, C, 3, 3) OIHW; b*: (C,)."""
    B, C, H, W = x_nchw.shape
    HW = H * W

    x_flat = x_nchw.reshape(B, C, HW)        # pure reshape: no HBM transpose
    masks = _build_tap_masks(H, W)           # (9, 1, HW): 9 KiB at 16x16
    # OIHW -> tap-major (ky*3+kx, C_out, C_in)
    w0m = jnp.transpose(w0, (2, 3, 0, 1)).reshape(9, C, C)
    w1m = jnp.transpose(w1, (2, 3, 0, 1)).reshape(9, C, C)
    b0m = b0.reshape(C, 1)
    b1m = b1.reshape(C, 1)

    vmem = pl.BlockSpec(memory_space=pltpu.MemorySpace.VMEM)
    out_flat = pl.pallas_call(
        functools.partial(_residual_block_kernel, width=W),
        out_shape=jax.ShapeDtypeStruct((B, C, HW), x_flat.dtype),
        in_specs=[vmem] * 6,
        out_specs=vmem,
        input_output_aliases={5: 0},         # reuse x's HBM buffer for output
    )(masks, w0m, b0m, w1m, b1m, x_flat)

    return out_flat.reshape(B, C, H, W)


# -----------------------------------------------------------------------------
# Pure-JAX reference (for correctness check)
# -----------------------------------------------------------------------------
def _reference(x, w0, b0, w1, b1):
    def conv(h, w, b):
        y = jax.lax.conv_general_dilated(
            h, w, window_strides=(1, 1), padding="SAME",
            dimension_numbers=("NCHW", "OIHW", "NCHW"),
            precision=jax.lax.Precision.HIGHEST)
        return y + b[None, :, None, None]

    h = jax.nn.relu(x)
    h = conv(h, w0, b0)
    h = jax.nn.relu(h)
    h = conv(h, w1, b1)
    return h + x


# -----------------------------------------------------------------------------
# Main
# -----------------------------------------------------------------------------
if __name__ == "__main__":
    B, C, H, W = 2, 4, 16, 16

    key = jax.random.PRNGKey(0)
    kx, kw0, kb0, kw1, kb1 = jax.random.split(key, 5)

    # Deterministic, PyTorch-Conv2d-style uniform init (fan_in = C * 3 * 3).
    fan_in = C * 3 * 3
    bound = 1.0 / np.sqrt(fan_in)
    x = jax.random.normal(kx, (B, C, H, W), dtype=jnp.float32)
    w0 = jax.random.uniform(kw0, (C, C, 3, 3), minval=-bound, maxval=bound,
                            dtype=jnp.float32)
    b0 = jax.random.uniform(kb0, (C,), minval=-bound, maxval=bound,
                            dtype=jnp.float32)
    w1 = jax.random.uniform(kw1, (C, C, 3, 3), minval=-bound, maxval=bound,
                            dtype=jnp.float32)
    b1 = jax.random.uniform(kb1, (C,), minval=-bound, maxval=bound,
                            dtype=jnp.float32)

    ref = jax.block_until_ready(_reference(x, w0, b0, w1, b1))
    out = jax.block_until_ready(residual_block(x, w0, b0, w1, b1))

    assert out.shape == x.shape and out.dtype == x.dtype
    max_err = float(jnp.max(jnp.abs(out - ref)))
    # Exact-f32 VPU path -> tight tolerance (was 5e-2 with the old MXU path).
    assert max_err < 1e-3, f"max abs error vs reference: {max_err}"

    print("KERNEL_OK")
</pallas_src>

<mosaic_0001>
module attributes {stable_mosaic.version = 11 : i64} {
  func.func @_residual_block_kernel(%arg0: memref<9x1x256xf32, #tpu.memory_space<vmem>>, %arg1: memref<9x4x4xf32, #tpu.memory_space<vmem>>, %arg2: memref<4x1xf32, #tpu.memory_space<vmem>>, %arg3: memref<9x4x4xf32, #tpu.memory_space<vmem>>, %arg4: memref<4x1xf32, #tpu.memory_space<vmem>>, %arg5: memref<2x4x256xf32, #tpu.memory_space<vmem>>, %arg6: memref<2x4x256xf32, #tpu.memory_space<vmem>>) attributes {dimension_semantics = [], scalar_prefetch = 0 : i64, scratch_operands = 0 : i64, tpu.core_type = #tpu.core_type<tc>} {
    %c0 = arith.constant 0 : index
    %c0_0 = arith.constant 0 : index
    %c0_1 = arith.constant 0 : index
    %0 = vector.load %arg5[%c0, %c0_0, %c0_1] : memref<2x4x256xf32, #tpu.memory_space<vmem>>, vector<1x4x256xf32>
    %1 = vector.shape_cast %0 : vector<1x4x256xf32> to vector<4x256xf32>
    %cst = arith.constant 0.000000e+00 : f32
    %2 = vector.broadcast %cst : f32 to vector<4x256xf32>
    %3 = arith.maximumf %1, %2 : vector<4x256xf32>
    %cst_2 = arith.constant 0.000000e+00 : f32
    %4 = vector.broadcast %cst_2 : f32 to vector<4x256xf32>
    %c17_i32 = arith.constant 17 : i32
    %5 = tpu.dynamic_rotate %3 by %c17_i32 dim 1 : vector<4x256xf32>, i32 -> vector<4x256xf32>
    %c0_3 = arith.constant 0 : index
    %c0_4 = arith.constant 0 : index
    %c0_5 = arith.constant 0 : index
    %6 = vector.load %arg0[%c0_3, %c0_4, %c0_5] : memref<9x1x256xf32, #tpu.memory_space<vmem>>, vector<1x1x256xf32>
    %7 = vector.shape_cast %6 : vector<1x1x256xf32> to vector<1x256xf32>
    %8 = vector.broadcast %7 : vector<1x256xf32> to vector<4x256xf32>
    %9 = arith.mulf %5, %8 : vector<4x256xf32>
    %c0_6 = arith.constant 0 : index
    %c0_7 = arith.constant 0 : index
    %c0_8 = arith.constant 0 : index
    %10 = vector.load %arg1[%c0_6, %c0_7, %c0_8] : memref<9x4x4xf32, #tpu.memory_space<vmem>>, vector<1x4x4xf32>
    %11 = vector.shape_cast %10 : vector<1x4x4xf32> to vector<4x4xf32>
    %12 = vector.extract_strided_slice %11 {offsets = [0, 0], sizes = [4, 1], strides = [1, 1]} : vector<4x4xf32> to vector<4x1xf32>
    %13 = vector.extract_strided_slice %9 {offsets = [0, 0], sizes = [1, 256], strides = [1, 1]} : vector<4x256xf32> to vector<1x256xf32>
    %14 = vector.broadcast %12 : vector<4x1xf32> to vector<4x256xf32>
    %15 = vector.broadcast %13 : vector<1x256xf32> to vector<4x256xf32>
    %16 = arith.mulf %14, %15 : vector<4x256xf32>
    %17 = arith.addf %4, %16 : vector<4x256xf32>
    %18 = vector.extract_strided_slice %11 {offsets = [0, 1], sizes = [4, 1], strides = [1, 1]} : vector<4x4xf32> to vector<4x1xf32>
    %19 = vector.extract_strided_slice %9 {offsets = [1, 0], sizes = [1, 256], strides = [1, 1]} : vector<4x256xf32> to vector<1x256xf32>
    %20 = vector.broadcast %18 : vector<4x1xf32> to vector<4x256xf32>
    %21 = vector.broadcast %19 : vector<1x256xf32> to vector<4x256xf32>
    %22 = arith.mulf %20, %21 : vector<4x256xf32>
    %23 = arith.addf %17, %22 : vector<4x256xf32>
    %24 = vector.extract_strided_slice %11 {offsets = [0, 2], sizes = [4, 1], strides = [1, 1]} : vector<4x4xf32> to vector<4x1xf32>
    %25 = vector.extract_strided_slice %9 {offsets = [2, 0], sizes = [1, 256], strides = [1, 1]} : vector<4x256xf32> to vector<1x256xf32>
    %26 = vector.broadcast %24 : vector<4x1xf32> to vector<4x256xf32>
    %27 = vector.broadcast %25 : vector<1x256xf32> to vector<4x256xf32>
    %28 = arith.mulf %26, %27 : vector<4x256xf32>
    %29 = arith.addf %23, %28 : vector<4x256xf32>
    %30 = vector.extract_strided_slice %11 {offsets = [0, 3], sizes = [4, 1], strides = [1, 1]} : vector<4x4xf32> to vector<4x1xf32>
    %31 = vector.extract_strided_slice %9 {offsets = [3, 0], sizes = [1, 256], strides = [1, 1]} : vector<4x256xf32> to vector<1x256xf32>
    %32 = vector.broadcast %30 : vector<4x1xf32> to vector<4x256xf32>
    %33 = vector.broadcast %31 : vector<1x256xf32> to vector<4x256xf32>
    %34 = arith.mulf %32, %33 : vector<4x256xf32>
    %35 = arith.addf %29, %34 : vector<4x256xf32>
    %c16_i32 = arith.constant 16 : i32
    %36 = tpu.dynamic_rotate %3 by %c16_i32 dim 1 : vector<4x256xf32>, i32 -> vector<4x256xf32>
    %c1 = arith.constant 1 : index
    %c0_9 = arith.constant 0 : index
    %c0_10 = arith.constant 0 : index
    %37 = vector.load %arg0[%c1, %c0_9, %c0_10] : memref<9x1x256xf32, #tpu.memory_space<vmem>>, vector<1x1x256xf32>
    %38 = vector.shape_cast %37 : vector<1x1x256xf32> to vector<1x256xf32>
    %39 = vector.broadcast %38 : vector<1x256xf32> to vector<4x256xf32>
    %40 = arith.mulf %36, %39 : vector<4x256xf32>
    %c1_11 = arith.constant 1 : index
    %c0_12 = arith.constant 0 : index
    %c0_13 = arith.constant 0 : index
    %41 = vector.load %arg1[%c1_11, %c0_12, %c0_13] : memref<9x4x4xf32, #tpu.memory_space<vmem>>, vector<1x4x4xf32>
    %42 = vector.shape_cast %41 : vector<1x4x4xf32> to vector<4x4xf32>
    %43 = vector.extract_strided_slice %42 {offsets = [0, 0], sizes = [4, 1], strides = [1, 1]} : vector<4x4xf32> to vector<4x1xf32>
    %44 = vector.extract_strided_slice %40 {offsets = [0, 0], sizes = [1, 256], strides = [1, 1]} : vector<4x256xf32> to vector<1x256xf32>
    %45 = vector.broadcast %43 : vector<4x1xf32> to vector<4x256xf32>
    %46 = vector.broadcast %44 : vector<1x256xf32> to vector<4x256xf32>
    %47 = arith.mulf %45, %46 : vector<4x256xf32>
    %48 = arith.addf %35, %47 : vector<4x256xf32>
    %49 = vector.extract_strided_slice %42 {offsets = [0, 1], sizes = [4, 1], strides = [1, 1]} : vector<4x4xf32> to vector<4x1xf32>
    %50 = vector.extract_strided_slice %40 {offsets = [1, 0], sizes = [1, 256], strides = [1, 1]} : vector<4x256xf32> to vector<1x256xf32>
    %51 = vector.broadcast %49 : vector<4x1xf32> to vector<4x256xf32>
    %52 = vector.broadcast %50 : vector<1x256xf32> to vector<4x256xf32>
    %53 = arith.mulf %51, %52 : vector<4x256xf32>
    %54 = arith.addf %48, %53 : vector<4x256xf32>
    %55 = vector.extract_strided_slice %42 {offsets = [0, 2], sizes = [4, 1], strides = [1, 1]} : vector<4x4xf32> to vector<4x1xf32>
    %56 = vector.extract_strided_slice %40 {offsets = [2, 0], sizes = [1, 256], strides = [1, 1]} : vector<4x256xf32> to vector<1x256xf32>
    %57 = vector.broadcast %55 : vector<4x1xf32> to vector<4x256xf32>
    %58 = vector.broadcast %56 : vector<1x256xf32> to vector<4x256xf32>
    %59 = arith.mulf %57, %58 : vector<4x256xf32>
    %60 = arith.addf %54, %59 : vector<4x256xf32>
    %61 = vector.extract_strided_slice %42 {offsets = [0, 3], sizes = [4, 1], strides = [1, 1]} : vector<4x4xf32> to vector<4x1xf32>
    %62 = vector.extract_strided_slice %40 {offsets = [3, 0], sizes = [1, 256], strides = [1, 1]} : vector<4x256xf32> to vector<1x256xf32>
    %63 = vector.broadcast %61 : vector<4x1xf32> to vector<4x256xf32>
    %64 = vector.broadcast %62 : vector<1x256xf32> to vector<4x256xf32>
    %65 = arith.mulf %63, %64 : vector<4x256xf32>
    %66 = arith.addf %60, %65 : vector<4x256xf32>
    %c15_i32 = arith.constant 15 : i32
    %67 = tpu.dynamic_rotate %3 by %c15_i32 dim 1 : vector<4x256xf32>, i32 -> vector<4x256xf32>
    %c2 = arith.constant 2 : index
    %c0_14 = arith.constant 0 : index
    %c0_15 = arith.constant 0 : index
    %68 = vector.load %arg0[%c2, %c0_14, %c0_15] : memref<9x1x256xf32, #tpu.memory_space<vmem>>, vector<1x1x256xf32>
    %69 = vector.shape_cast %68 : vector<1x1x256xf32> to vector<1x256xf32>
    %70 = vector.broadcast %69 : vector<1x256xf32> to vector<4x256xf32>
    %71 = arith.mulf %67, %70 : vector<4x256xf32>
    %c2_16 = arith.constant 2 : index
    %c0_17 = arith.constant 0 : index
    %c0_18 = arith.constant 0 : index
    %72 = vector.load %arg1[%c2_16, %c0_17, %c0_18] : memref<9x4x4xf32, #tpu.memory_space<vmem>>, vector<1x4x4xf32>
    %73 = vector.shape_cast %72 : vector<1x4x4xf32> to vector<4x4xf32>
    %74 = vector.extract_strided_slice %73 {offsets = [0, 0], sizes = [4, 1], strides = [1, 1]} : vector<4x4xf32> to vector<4x1xf32>
    %75 = vector.extract_strided_slice %71 {offsets = [0, 0], sizes = [1, 256], strides = [1, 1]} : vector<4x256xf32> to vector<1x256xf32>
    %76 = vector.broadcast %74 : vector<4x1xf32> to vector<4x256xf32>
    %77 = vector.broadcast %75 : vector<1x256xf32> to vector<4x256xf32>
    %78 = arith.mulf %76, %77 : vector<4x256xf32>
    %79 = arith.addf %66, %78 : vector<4x256xf32>
    %80 = vector.extract_strided_slice %73 {offsets = [0, 1], sizes = [4, 1], strides = [1, 1]} : vector<4x4xf32> to vector<4x1xf32>
    %81 = vector.extract_strided_slice %71 {offsets = [1, 0], sizes = [1, 256], strides = [1, 1]} : vector<4x256xf32> to vector<1x256xf32>
    %82 = vector.broadcast %80 : vector<4x1xf32> to vector<4x256xf32>
    %83 = vector.broadcast %81 : vector<1x256xf32> to vector<4x256xf32>
    %84 = arith.mulf %82, %83 : vector<4x256xf32>
    %85 = arith.addf %79, %84 : vector<4x256xf32>
    %86 = vector.extract_strided_slice %73 {offsets = [0, 2], sizes = [4, 1], strides = [1, 1]} : vector<4x4xf32> to vector<4x1xf32>
    %87 = vector.extract_strided_slice %71 {offsets = [2, 0], sizes = [1, 256], strides = [1, 1]} : vector<4x256xf32> to vector<1x256xf32>
    %88 = vector.broadcast %86 : vector<4x1xf32> to vector<4x256xf32>
    %89 = vector.broadcast %87 : vector<1x256xf32> to vector<4x256xf32>
    %90 = arith.mulf %88, %89 : vector<4x256xf32>
    %91 = arith.addf %85, %90 : vector<4x256xf32>
    %92 = vector.extract_strided_slice %73 {offsets = [0, 3], sizes = [4, 1], strides = [1, 1]} : vector<4x4xf32> to vector<4x1xf32>
    %93 = vector.extract_strided_slice %71 {offsets = [3, 0], sizes = [1, 256], strides = [1, 1]} : vector<4x256xf32> to vector<1x256xf32>
    %94 = vector.broadcast %92 : vector<4x1xf32> to vector<4x256xf32>
    %95 = vector.broadcast %93 : vector<1x256xf32> to vector<4x256xf32>
    %96 = arith.mulf %94, %95 : vector<4x256xf32>
    %97 = arith.addf %91, %96 : vector<4x256xf32>
    %c1_i32 = arith.constant 1 : i32
    %98 = tpu.dynamic_rotate %3 by %c1_i32 dim 1 : vector<4x256xf32>, i32 -> vector<4x256xf32>
    %c3 = arith.constant 3 : index
    %c0_19 = arith.constant 0 : index
    %c0_20 = arith.constant 0 : index
    %99 = vector.load %arg0[%c3, %c0_19, %c0_20] : memref<9x1x256xf32, #tpu.memory_space<vmem>>, vector<1x1x256xf32>
    %100 = vector.shape_cast %99 : vector<1x1x256xf32> to vector<1x256xf32>
    %101 = vector.broadcast %100 : vector<1x256xf32> to vector<4x256xf32>
    %102 = arith.mulf %98, %101 : vector<4x256xf32>
    %c3_21 = arith.constant 3 : index
    %c0_22 = arith.constant 0 : index
    %c0_23 = arith.constant 0 : index
    %103 = vector.load %arg1[%c3_21, %c0_22, %c0_23] : memref<9x4x4xf32, #tpu.memory_space<vmem>>, vector<1x4x4xf32>
    %104 = vector.shape_cast %103 : vector<1x4x4xf32> to vector<4x4xf32>
    %105 = vector.extract_strided_slice %104 {offsets = [0, 0], sizes = [4, 1], strides = [1, 1]} : vector<4x4xf32> to vector<4x1xf32>
    %106 = vector.extract_strided_slice %102 {offsets = [0, 0], sizes = [1, 256], strides = [1, 1]} : vector<4x256xf32> to vector<1x256xf32>
    %107 = vector.broadcast %105 : vector<4x1xf32> to vector<4x256xf32>
    %108 = vector.broadcast %106 : vector<1x256xf32> to vector<4x256xf32>
    %109 = arith.mulf %107, %108 : vector<4x256xf32>
    %110 = arith.addf %97, %109 : vector<4x256xf32>
    %111 = vector.extract_strided_slice %104 {offsets = [0, 1], sizes = [4, 1], strides = [1, 1]} : vector<4x4xf32> to vector<4x1xf32>
    %112 = vector.extract_strided_slice %102 {offsets = [1, 0], sizes = [1, 256], strides = [1, 1]} : vector<4x256xf32> to vector<1x256xf32>
    %113 = vector.broadcast %111 : vector<4x1xf32> to vector<4x256xf32>
    %114 = vector.broadcast %112 : vector<1x256xf32> to vector<4x256xf32>
    %115 = arith.mulf %113, %114 : vector<4x256xf32>
    %116 = arith.addf %110, %115 : vector<4x256xf32>
    %117 = vector.extract_strided_slice %104 {offsets = [0, 2], sizes = [4, 1], strides = [1, 1]} : vector<4x4xf32> to vector<4x1xf32>
    %118 = vector.extract_strided_slice %102 {offsets = [2, 0], sizes = [1, 256], strides = [1, 1]} : vector<4x256xf32> to vector<1x256xf32>
    %119 = vector.broadcast %117 : vector<4x1xf32> to vector<4x256xf32>
    %120 = vector.broadcast %118 : vector<1x256xf32> to vector<4x256xf32>
    %121 = arith.mulf %119, %120 : vector<4x256xf32>
    %122 = arith.addf %116, %121 : vector<4x256xf32>
    %123 = vector.extract_strided_slice %104 {offsets = [0, 3], sizes = [4, 1], strides = [1, 1]} : vector<4x4xf32> to vector<4x1xf32>
    %124 = vector.extract_strided_slice %102 {offsets = [3, 0], sizes = [1, 256], strides = [1, 1]} : vector<4x256xf32> to vector<1x256xf32>
    %125 = vector.broadcast %123 : vector<4x1xf32> to vector<4x256xf32>
    %126 = vector.broadcast %124 : vector<1x256xf32> to vector<4x256xf32>
    %127 = arith.mulf %125, %126 : vector<4x256xf32>
    %128 = arith.addf %122, %127 : vector<4x256xf32>
    %c4 = arith.constant 4 : index
    %c0_24 = arith.constant 0 : index
    %c0_25 = arith.constant 0 : index
    %129 = vector.load %arg1[%c4, %c0_24, %c0_25] : memref<9x4x4xf32, #tpu.memory_space<vmem>>, vector<1x4x4xf32>
    %130 = vector.shape_cast %129 : vector<1x4x4xf32> to vector<4x4xf32>
    %131 = vector.extract_strided_slice %130 {offsets = [0, 0], sizes = [4, 1], strides = [1, 1]} : vector<4x4xf32> to vector<4x1xf32>
    %132 = vector.extract_strided_slice %3 {offsets = [0, 0], sizes = [1, 256], strides = [1, 1]} : vector<4x256xf32> to vector<1x256xf32>
    %133 = vector.broadcast %131 : vector<4x1xf32> to vector<4x256xf32>
    %134 = vector.broadcast %132 : vector<1x256xf32> to vector<4x256xf32>
    %135 = arith.mulf %133, %134 : vector<4x256xf32>
    %136 = arith.addf %128, %135 : vector<4x256xf32>
    %137 = vector.extract_strided_slice %130 {offsets = [0, 1], sizes = [4, 1], strides = [1, 1]} : vector<4x4xf32> to vector<4x1xf32>
    %138 = vector.extract_strided_slice %3 {offsets = [1, 0], sizes = [1, 256], strides = [1, 1]} : vector<4x256xf32> to vector<1x256xf32>
    %139 = vector.broadcast %137 : vector<4x1xf32> to vector<4x256xf32>
    %140 = vector.broadcast %138 : vector<1x256xf32> to vector<4x256xf32>
    %141 = arith.mulf %139, %140 : vector<4x256xf32>
    %142 = arith.addf %136, %141 : vector<4x256xf32>
    %143 = vector.extract_strided_slice %130 {offsets = [0, 2], sizes = [4, 1], strides = [1, 1]} : vector<4x4xf32> to vector<4x1xf32>
    %144 = vector.extract_strided_slice %3 {offsets = [2, 0], sizes = [1, 256], strides = [1, 1]} : vector<4x256xf32> to vector<1x256xf32>
    %145 = vector.broadcast %143 : vector<4x1xf32> to vector<4x256xf32>
    %146 = vector.broadcast %144 : vector<1x256xf32> to vector<4x256xf32>
    %147 = arith.mulf %145, %146 : vector<4x256xf32>
    %148 = arith.addf %142, %147 : vector<4x256xf32>
    %149 = vector.extract_strided_slice %130 {offsets = [0, 3], sizes = [4, 1], strides = [1, 1]} : vector<4x4xf32> to vector<4x1xf32>
    %150 = vector.extract_strided_slice %3 {offsets = [3, 0], sizes = [1, 256], strides = [1, 1]} : vector<4x256xf32> to vector<1x256xf32>
    %151 = vector.broadcast %149 : vector<4x1xf32> to vector<4x256xf32>
    %152 = vector.broadcast %150 : vector<1x256xf32> to vector<4x256xf32>
    %153 = arith.mulf %151, %152 : vector<4x256xf32>
    %154 = arith.addf %148, %153 : vector<4x256xf32>
    %c255_i32 = arith.constant 255 : i32
    %155 = tpu.dynamic_rotate %3 by %c255_i32 dim 1 : vector<4x256xf32>, i32 -> vector<4x256xf32>
    %c5 = arith.constant 5 : index
    %c0_26 = arith.constant 0 : index
    %c0_27 = arith.constant 0 : index
    %156 = vector.load %arg0[%c5, %c0_26, %c0_27] : memref<9x1x256xf32, #tpu.memory_space<vmem>>, vector<1x1x256xf32>
    %157 = vector.shape_cast %156 : vector<1x1x256xf32> to vector<1x256xf32>
    %158 = vector.broadcast %157 : vector<1x256xf32> to vector<4x256xf32>
    %159 = arith.mulf %155, %158 : vector<4x256xf32>
    %c5_28 = arith.constant 5 : index
    %c0_29 = arith.constant 0 : index
    %c0_30 = arith.constant 0 : index
    %160 = vector.load %arg1[%c5_28, %c0_29, %c0_30] : memref<9x4x4xf32, #tpu.memory_space<vmem>>, vector<1x4x4xf32>
    %161 = vector.shape_cast %160 : vector<1x4x4xf32> to vector<4x4xf32>
    %162 = vector.extract_strided_slice %161 {offsets = [0, 0], sizes = [4, 1], strides = [1, 1]} : vector<4x4xf32> to vector<4x1xf32>
    %163 = vector.extract_strided_slice %159 {offsets = [0, 0], sizes = [1, 256], strides = [1, 1]} : vector<4x256xf32> to vector<1x256xf32>
    %164 = vector.broadcast %162 : vector<4x1xf32> to vector<4x256xf32>
    %165 = vector.broadcast %163 : vector<1x256xf32> to vector<4x256xf32>
    %166 = arith.mulf %164, %165 : vector<4x256xf32>
    %167 = arith.addf %154, %166 : vector<4x256xf32>
    %168 = vector.extract_strided_slice %161 {offsets = [0, 1], sizes = [4, 1], strides = [1, 1]} : vector<4x4xf32> to vector<4x1xf32>
    %169 = vector.extract_strided_slice %159 {offsets = [1, 0], sizes = [1, 256], strides = [1, 1]} : vector<4x256xf32> to vector<1x256xf32>
    %170 = vector.broadcast %168 : vector<4x1xf32> to vector<4x256xf32>
    %171 = vector.broadcast %169 : vector<1x256xf32> to vector<4x256xf32>
    %172 = arith.mulf %170, %171 : vector<4x256xf32>
    %173 = arith.addf %167, %172 : vector<4x256xf32>
    %174 = vector.extract_strided_slice %161 {offsets = [0, 2], sizes = [4, 1], strides = [1, 1]} : vector<4x4xf32> to vector<4x1xf32>
    %175 = vector.extract_strided_slice %159 {offsets = [2, 0], sizes = [1, 256], strides = [1, 1]} : vector<4x256xf32> to vector<1x256xf32>
    %176 = vector.broadcast %174 : vector<4x1xf32> to vector<4x256xf32>
    %177 = vector.broadcast %175 : vector<1x256xf32> to vector<4x256xf32>
    %178 = arith.mulf %176, %177 : vector<4x256xf32>
    %179 = arith.addf %173, %178 : vector<4x256xf32>
    %180 = vector.extract_strided_slice %161 {offsets = [0, 3], sizes = [4, 1], strides = [1, 1]} : vector<4x4xf32> to vector<4x1xf32>
    %181 = vector.extract_strided_slice %159 {offsets = [3, 0], sizes = [1, 256], strides = [1, 1]} : vector<4x256xf32> to vector<1x256xf32>
    %182 = vector.broadcast %180 : vector<4x1xf32> to vector<4x256xf32>
    %183 = vector.broadcast %181 : vector<1x256xf32> to vector<4x256xf32>
    %184 = arith.mulf %182, %183 : vector<4x256xf32>
    %185 = arith.addf %179, %184 : vector<4x256xf32>
    %c241_i32 = arith.constant 241 : i32
    %186 = tpu.dynamic_rotate %3 by %c241_i32 dim 1 : vector<4x256xf32>, i32 -> vector<4x256xf32>
    %c6 = arith.constant 6 : index
    %c0_31 = arith.constant 0 : index
    %c0_32 = arith.constant 0 : index
    %187 = vector.load %arg0[%c6, %c0_31, %c0_32] : memref<9x1x256xf32, #tpu.memory_space<vmem>>, vector<1x1x256xf32>
    %188 = vector.shape_cast %187 : vector<1x1x256xf32> to vector<1x256xf32>
    %189 = vector.broadcast %188 : vector<1x256xf32> to vector<4x256xf32>
    %190 = arith.mulf %186, %189 : vector<4x256xf32>
    %c6_33 = arith.constant 6 : index
    %c0_34 = arith.constant 0 : index
    %c0_35 = arith.constant 0 : index
    %191 = vector.load %arg1[%c6_33, %c0_34, %c0_35] : memref<9x4x4xf32, #tpu.memory_space<vmem>>, vector<1x4x4xf32>
    %192 = vector.shape_cast %191 : vector<1x4x4xf32> to vector<4x4xf32>
    %193 = vector.extract_strided_slice %192 {offsets = [0, 0], sizes = [4, 1], strides = [1, 1]} : vector<4x4xf32> to vector<4x1xf32>
    %194 = vector.extract_strided_slice %190 {offsets = [0, 0], sizes = [1, 256], strides = [1, 1]} : vector<4x256xf32> to vector<1x256xf32>
    %195 = vector.broadcast %193 : vector<4x1xf32> to vector<4x256xf32>
    %196 = vector.broadcast %194 : vector<1x256xf32> to vector<4x256xf32>
    %197 = arith.mulf %195, %196 : vector<4x256xf32>
    %198 = arith.addf %185, %197 : vector<4x256xf32>
    %199 = vector.extract_strided_slice %192 {offsets = [0, 1], sizes = [4, 1], strides = [1, 1]} : vector<4x4xf32> to vector<4x1xf32>
    %200 = vector.extract_strided_slice %190 {offsets = [1, 0], sizes = [1, 256], strides = [1, 1]} : vector<4x256xf32> to vector<1x256xf32>
    %201 = vector.broadcast %199 : vector<4x1xf32> to vector<4x256xf32>
    %202 = vector.broadcast %200 : vector<1x256xf32> to vector<4x256xf32>
    %203 = arith.mulf %201, %202 : vector<4x256xf32>
    %204 = arith.addf %198, %203 : vector<4x256xf32>
    %205 = vector.extract_strided_slice %192 {offsets = [0, 2], sizes = [4, 1], strides = [1, 1]} : vector<4x4xf32> to vector<4x1xf32>
    %206 = vector.extract_strided_slice %190 {offsets = [2, 0], sizes = [1, 256], strides = [1, 1]} : vector<4x256xf32> to vector<1x256xf32>
    %207 = vector.broadcast %205 : vector<4x1xf32> to vector<4x256xf32>
    %208 = vector.broadcast %206 : vector<1x256xf32> to vector<4x256xf32>
    %209 = arith.mulf %207, %208 : vector<4x256xf32>
    %210 = arith.addf %204, %209 : vector<4x256xf32>
    %211 = vector.extract_strided_slice %192 {offsets = [0, 3], sizes = [4, 1], strides = [1, 1]} : vector<4x4xf32> to vector<4x1xf32>
    %212 = vector.extract_strided_slice %190 {offsets = [3, 0], sizes = [1, 256], strides = [1, 1]} : vector<4x256xf32> to vector<1x256xf32>
    %213 = vector.broadcast %211 : vector<4x1xf32> to vector<4x256xf32>
    %214 = vector.broadcast %212 : vector<1x256xf32> to vector<4x256xf32>
    %215 = arith.mulf %213, %214 : vector<4x256xf32>
    %216 = arith.addf %210, %215 : vector<4x256xf32>
    %c240_i32 = arith.constant 240 : i32
    %217 = tpu.dynamic_rotate %3 by %c240_i32 dim 1 : vector<4x256xf32>, i32 -> vector<4x256xf32>
    %c7 = arith.constant 7 : index
    %c0_36 = arith.constant 0 : index
    %c0_37 = arith.constant 0 : index
    %218 = vector.load %arg0[%c7, %c0_36, %c0_37] : memref<9x1x256xf32, #tpu.memory_space<vmem>>, vector<1x1x256xf32>
    %219 = vector.shape_cast %218 : vector<1x1x256xf32> to vector<1x256xf32>
    %220 = vector.broadcast %219 : vector<1x256xf32> to vector<4x256xf32>
    %221 = arith.mulf %217, %220 : vector<4x256xf32>
    %c7_38 = arith.constant 7 : index
    %c0_39 = arith.constant 0 : index
    %c0_40 = arith.constant 0 : index
    %222 = vector.load %arg1[%c7_38, %c0_39, %c0_40] : memref<9x4x4xf32, #tpu.memory_space<vmem>>, vector<1x4x4xf32>
    %223 = vector.shape_cast %222 : vector<1x4x4xf32> to vector<4x4xf32>
    %224 = vector.extract_strided_slice %223 {offsets = [0, 0], sizes = [4, 1], strides = [1, 1]} : vector<4x4xf32> to vector<4x1xf32>
    %225 = vector.extract_strided_slice %221 {offsets = [0, 0], sizes = [1, 256], strides = [1, 1]} : vector<4x256xf32> to vector<1x256xf32>
    %226 = vector.broadcast %224 : vector<4x1xf32> to vector<4x256xf32>
    %227 = vector.broadcast %225 : vector<1x256xf32> to vector<4x256xf32>
    %228 = arith.mulf %226, %227 : vector<4x256xf32>
    %229 = arith.addf %216, %228 : vector<4x256xf32>
    %230 = vector.extract_strided_slice %223 {offsets = [0, 1], sizes = [4, 1], strides = [1, 1]} : vector<4x4xf32> to vector<4x1xf32>
    %231 = vector.extract_strided_slice %221 {offsets = [1, 0], sizes = [1, 256], strides = [1, 1]} : vector<4x256xf32> to vector<1x256xf32>
    %232 = vector.broadcast %230 : vector<4x1xf32> to vector<4x256xf32>
    %233 = vector.broadcast %231 : vector<1x256xf32> to vector<4x256xf32>
    %234 = arith.mulf %232, %233 : vector<4x256xf32>
    %235 = arith.addf %229, %234 : vector<4x256xf32>
    %236 = vector.extract_strided_slice %223 {offsets = [0, 2], sizes = [4, 1], strides = [1, 1]} : vector<4x4xf32> to vector<4x1xf32>
    %237 = vector.extract_strided_slice %221 {offsets = [2, 0], sizes = [1, 256], strides = [1, 1]} : vector<4x256xf32> to vector<1x256xf32>
    %238 = vector.broadcast %236 : vector<4x1xf32> to vector<4x256xf32>
    %239 = vector.broadcast %237 : vector<1x256xf32> to vector<4x256xf32>
    %240 = arith.mulf %238, %239 : vector<4x256xf32>
    %241 = arith.addf %235, %240 : vector<4x256xf32>
    %242 = vector.extract_strided_slice %223 {offsets = [0, 3], sizes = [4, 1], strides = [1, 1]} : vector<4x4xf32> to vector<4x1xf32>
    %243 = vector.extract_strided_slice %221 {offsets = [3, 0], sizes = [1, 256], strides = [1, 1]} : vector<4x256xf32> to vector<1x256xf32>
    %244 = vector.broadcast %242 : vector<4x1xf32> to vector<4x256xf32>
    %245 = vector.broadcast %243 : vector<1x256xf32> to vector<4x256xf32>
    %246 = arith.mulf %244, %245 : vector<4x256xf32>
    %247 = arith.addf %241, %246 : vector<4x256xf32>
    %c239_i32 = arith.constant 239 : i32
    %248 = tpu.dynamic_rotate %3 by %c239_i32 dim 1 : vector<4x256xf32>, i32 -> vector<4x256xf32>
    %c8 = arith.constant 8 : index
    %c0_41 = arith.constant 0 : index
    %c0_42 = arith.constant 0 : index
    %249 = vector.load %arg0[%c8, %c0_41, %c0_42] : memref<9x1x256xf32, #tpu.memory_space<vmem>>, vector<1x1x256xf32>
    %250 = vector.shape_cast %249 : vector<1x1x256xf32> to vector<1x256xf32>
    %251 = vector.broadcast %250 : vector<1x256xf32> to vector<4x256xf32>
    %252 = arith.mulf %248, %251 : vector<4x256xf32>
    %c8_43 = arith.constant 8 : index
    %c0_44 = arith.constant 0 : index
    %c0_45 = arith.constant 0 : index
    %253 = vector.load %arg1[%c8_43, %c0_44, %c0_45] : memref<9x4x4xf32, #tpu.memory_space<vmem>>, vector<1x4x4xf32>
    %254 = vector.shape_cast %253 : vector<1x4x4xf32> to vector<4x4xf32>
    %255 = vector.extract_strided_slice %254 {offsets = [0, 0], sizes = [4, 1], strides = [1, 1]} : vector<4x4xf32> to vector<4x1xf32>
    %256 = vector.extract_strided_slice %252 {offsets = [0, 0], sizes = [1, 256], strides = [1, 1]} : vector<4x256xf32> to vector<1x256xf32>
    %257 = vector.broadcast %255 : vector<4x1xf32> to vector<4x256xf32>
    %258 = vector.broadcast %256 : vector<1x256xf32> to vector<4x256xf32>
    %259 = arith.mulf %257, %258 : vector<4x256xf32>
    %260 = arith.addf %247, %259 : vector<4x256xf32>
    %261 = vector.extract_strided_slice %254 {offsets = [0, 1], sizes = [4, 1], strides = [1, 1]} : vector<4x4xf32> to vector<4x1xf32>
    %262 = vector.extract_strided_slice %252 {offsets = [1, 0], sizes = [1, 256], strides = [1, 1]} : vector<4x256xf32> to vector<1x256xf32>
    %263 = vector.broadcast %261 : vector<4x1xf32> to vector<4x256xf32>
    %264 = vector.broadcast %262 : vector<1x256xf32> to vector<4x256xf32>
    %265 = arith.mulf %263, %264 : vector<4x256xf32>
    %266 = arith.addf %260, %265 : vector<4x256xf32>
    %267 = vector.extract_strided_slice %254 {offsets = [0, 2], sizes = [4, 1], strides = [1, 1]} : vector<4x4xf32> to vector<4x1xf32>
    %268 = vector.extract_strided_slice %252 {offsets = [2, 0], sizes = [1, 256], strides = [1, 1]} : vector<4x256xf32> to vector<1x256xf32>
    %269 = vector.broadcast %267 : vector<4x1xf32> to vector<4x256xf32>
    %270 = vector.broadcast %268 : vector<1x256xf32> to vector<4x256xf32>
    %271 = arith.mulf %269, %270 : vector<4x256xf32>
    %272 = arith.addf %266, %271 : vector<4x256xf32>
    %273 = vector.extract_strided_slice %254 {offsets = [0, 3], sizes = [4, 1], strides = [1, 1]} : vector<4x4xf32> to vector<4x1xf32>
    %274 = vector.extract_strided_slice %252 {offsets = [3, 0], sizes = [1, 256], strides = [1, 1]} : vector<4x256xf32> to vector<1x256xf32>
    %275 = vector.broadcast %273 : vector<4x1xf32> to vector<4x256xf32>
    %276 = vector.broadcast %274 : vector<1x256xf32> to vector<4x256xf32>
    %277 = arith.mulf %275, %276 : vector<4x256xf32>
    %278 = arith.addf %272, %277 : vector<4x256xf32>
    %c0_46 = arith.constant 0 : index
    %c0_47 = arith.constant 0 : index
    %279 = vector.load %arg2[%c0_46, %c0_47] : memref<4x1xf32, #tpu.memory_space<vmem>>, vector<4x1xf32>
    %280 = vector.broadcast %279 : vector<4x1xf32> to vector<4x256xf32>
    %281 = arith.addf %278, %280 : vector<4x256xf32>
    %cst_48 = arith.constant 0.000000e+00 : f32
    %282 = vector.broadcast %cst_48 : f32 to vector<4x256xf32>
    %283 = arith.maximumf %281, %282 : vector<4x256xf32>
    %cst_49 = arith.constant 0.000000e+00 : f32
    %284 = vector.broadcast %cst_49 : f32 to vector<4x256xf32>
    %c17_i32_50 = arith.constant 17 : i32
    %285 = tpu.dynamic_rotate %283 by %c17_i32_50 dim 1 : vector<4x256xf32>, i32 -> vector<4x256xf32>
    %c0_51 = arith.constant 0 : index
    %c0_52 = arith.constant 0 : index
    %c0_53 = arith.constant 0 : index
    %286 = vector.load %arg0[%c0_51, %c0_52, %c0_53] : memref<9x1x256xf32, #tpu.memory_space<vmem>>, vector<1x1x256xf32>
    %287 = vector.shape_cast %286 : vector<1x1x256xf32> to vector<1x256xf32>
    %288 = vector.broadcast %287 : vector<1x256xf32> to vector<4x256xf32>
    %289 = arith.mulf %285, %288 : vector<4x256xf32>
    %c0_54 = arith.constant 0 : index
    %c0_55 = arith.constant 0 : index
    %c0_56 = arith.constant 0 : index
    %290 = vector.load %arg3[%c0_54, %c0_55, %c0_56] : memref<9x4x4xf32, #tpu.memory_space<vmem>>, vector<1x4x4xf32>
    %291 = vector.shape_cast %290 : vector<1x4x4xf32> to vector<4x4xf32>
    %292 = vector.extract_strided_slice %291 {offsets = [0, 0], sizes = [4, 1], strides = [1, 1]} : vector<4x4xf32> to vector<4x1xf32>
    %293 = vector.extract_strided_slice %289 {offsets = [0, 0], sizes = [1, 256], strides = [1, 1]} : vector<4x256xf32> to vector<1x256xf32>
    %294 = vector.broadcast %292 : vector<4x1xf32> to vector<4x256xf32>
    %295 = vector.broadcast %293 : vector<1x256xf32> to vector<4x256xf32>
    %296 = arith.mulf %294, %295 : vector<4x256xf32>
    %297 = arith.addf %284, %296 : vector<4x256xf32>
    %298 = vector.extract_strided_slice %291 {offsets = [0, 1], sizes = [4, 1], strides = [1, 1]} : vector<4x4xf32> to vector<4x1xf32>
    %299 = vector.extract_strided_slice %289 {offsets = [1, 0], sizes = [1, 256], strides = [1, 1]} : vector<4x256xf32> to vector<1x256xf32>
    %300 = vector.broadcast %298 : vector<4x1xf32> to vector<4x256xf32>
    %301 = vector.broadcast %299 : vector<1x256xf32> to vector<4x256xf32>
    %302 = arith.mulf %300, %301 : vector<4x256xf32>
    %303 = arith.addf %297, %302 : vector<4x256xf32>
    %304 = vector.extract_strided_slice %291 {offsets = [0, 2], sizes = [4, 1], strides = [1, 1]} : vector<4x4xf32> to vector<4x1xf32>
    %305 = vector.extract_strided_slice %289 {offsets = [2, 0], sizes = [1, 256], strides = [1, 1]} : vector<4x256xf32> to vector<1x256xf32>
    %306 = vector.broadcast %304 : vector<4x1xf32> to vector<4x256xf32>
    %307 = vector.broadcast %305 : vector<1x256xf32> to vector<4x256xf32>
    %308 = arith.mulf %306, %307 : vector<4x256xf32>
    %309 = arith.addf %303, %308 : vector<4x256xf32>
    %310 = vector.extract_strided_slice %291 {offsets = [0, 3], sizes = [4, 1], strides = [1, 1]} : vector<4x4xf32> to vector<4x1xf32>
    %311 = vector.extract_strided_slice %289 {offsets = [3, 0], sizes = [1, 256], strides = [1, 1]} : vector<4x256xf32> to vector<1x256xf32>
    %312 = vector.broadcast %310 : vector<4x1xf32> to vector<4x256xf32>
    %313 = vector.broadcast %311 : vector<1x256xf32> to vector<4x256xf32>
    %314 = arith.mulf %312, %313 : vector<4x256xf32>
    %315 = arith.addf %309, %314 : vector<4x256xf32>
    %c16_i32_57 = arith.constant 16 : i32
    %316 = tpu.dynamic_rotate %283 by %c16_i32_57 dim 1 : vector<4x256xf32>, i32 -> vector<4x256xf32>
    %c1_58 = arith.constant 1 : index
    %c0_59 = arith.constant 0 : index
    %c0_60 = arith.constant 0 : index
    %317 = vector.load %arg0[%c1_58, %c0_59, %c0_60] : memref<9x1x256xf32, #tpu.memory_space<vmem>>, vector<1x1x256xf32>
    %318 = vector.shape_cast %317 : vector<1x1x256xf32> to vector<1x256xf32>
    %319 = vector.broadcast %318 : vector<1x256xf32> to vector<4x256xf32>
    %320 = arith.mulf %316, %319 : vector<4x256xf32>
    %c1_61 = arith.constant 1 : index
    %c0_62 = arith.constant 0 : index
    %c0_63 = arith.constant 0 : index
    %321 = vector.load %arg3[%c1_61, %c0_62, %c0_63] : memref<9x4x4xf32, #tpu.memory_space<vmem>>, vector<1x4x4xf32>
    %322 = vector.shape_cast %321 : vector<1x4x4xf32> to vector<4x4xf32>
    %323 = vector.extract_strided_slice %322 {offsets = [0, 0], sizes = [4, 1], strides = [1, 1]} : vector<4x4xf32> to vector<4x1xf32>
    %324 = vector.extract_strided_slice %320 {offsets = [0, 0], sizes = [1, 256], strides = [1, 1]} : vector<4x256xf32> to vector<1x256xf32>
    %325 = vector.broadcast %323 : vector<4x1xf32> to vector<4x256xf32>
    %326 = vector.broadcast %324 : vector<1x256xf32> to vector<4x256xf32>
    %327 = arith.mulf %325, %326 : vector<4x256xf32>
    %328 = arith.addf %315, %327 : vector<4x256xf32>
    %329 = vector.extract_strided_slice %322 {offsets = [0, 1], sizes = [4, 1], strides = [1, 1]} : vector<4x4xf32> to vector<4x1xf32>
    %330 = vector.extract_strided_slice %320 {offsets = [1, 0], sizes = [1, 256], strides = [1, 1]} : vector<4x256xf32> to vector<1x256xf32>
    %331 = vector.broadcast %329 : vector<4x1xf32> to vector<4x256xf32>
    %332 = vector.broadcast %330 : vector<1x256xf32> to vector<4x256xf32>
    %333 = arith.mulf %331, %332 : vector<4x256xf32>
    %334 = arith.addf %328, %333 : vector<4x256xf32>
    %335 = vector.extract_strided_slice %322 {offsets = [0, 2], sizes = [4, 1], strides = [1, 1]} : vector<4x4xf32> to vector<4x1xf32>
    %336 = vector.extract_strided_slice %320 {offsets = [2, 0], sizes = [1, 256], strides = [1, 1]} : vector<4x256xf32> to vector<1x256xf32>
    %337 = vector.broadcast %335 : vector<4x1xf32> to vector<4x256xf32>
    %338 = vector.broadcast %336 : vector<1x256xf32> to vector<4x256xf32>
    %339 = arith.mulf %337, %338 : vector<4x256xf32>
    %340 = arith.addf %334, %339 : vector<4x256xf32>
    %341 = vector.extract_strided_slice %322 {offsets = [0, 3], sizes = [4, 1], strides = [1, 1]} : vector<4x4xf32> to vector<4x1xf32>
    %342 = vector.extract_strided_slice %320 {offsets = [3, 0], sizes = [1, 256], strides = [1, 1]} : vector<4x256xf32> to vector<1x256xf32>
    %343 = vector.broadcast %341 : vector<4x1xf32> to vector<4x256xf32>
    %344 = vector.broadcast %342 : vector<1x256xf32> to vector<4x256xf32>
    %345 = arith.mulf %343, %344 : vector<4x256xf32>
    %346 = arith.addf %340, %345 : vector<4x256xf32>
    %c15_i32_64 = arith.constant 15 : i32
    %347 = tpu.dynamic_rotate %283 by %c15_i32_64 dim 1 : vector<4x256xf32>, i32 -> vector<4x256xf32>
    %c2_65 = arith.constant 2 : index
    %c0_66 = arith.constant 0 : index
    %c0_67 = arith.constant 0 : index
    %348 = vector.load %arg0[%c2_65, %c0_66, %c0_67] : memref<9x1x256xf32, #tpu.memory_space<vmem>>, vector<1x1x256xf32>
    %349 = vector.shape_cast %348 : vector<1x1x256xf32> to vector<1x256xf32>
    %350 = vector.broadcast %349 : vector<1x256xf32> to vector<4x256xf32>
    %351 = arith.mulf %347, %350 : vector<4x256xf32>
    %c2_68 = arith.constant 2 : index
    %c0_69 = arith.constant 0 : index
    %c0_70 = arith.constant 0 : index
    %352 = vector.load %arg3[%c2_68, %c0_69, %c0_70] : memref<9x4x4xf32, #tpu.memory_space<vmem>>, vector<1x4x4xf32>
    %353 = vector.shape_cast %352 : vector<1x4x4xf32> to vector<4x4xf32>
    %354 = vector.extract_strided_slice %353 {offsets = [0, 0], sizes = [4, 1], strides = [1, 1]} : vector<4x4xf32> to vector<4x1xf32>
    %355 = vector.extract_strided_slice %351 {offsets = [0, 0], sizes = [1, 256], strides = [1, 1]} : vector<4x256xf32> to vector<1x256xf32>
    %356 = vector.broadcast %354 : vector<4x1xf32> to vector<4x256xf32>
    %357 = vector.broadcast %355 : vector<1x256xf32> to vector<4x256xf32>
    %358 = arith.mulf %356, %357 : vector<4x256xf32>
    %359 = arith.addf %346, %358 : vector<4x256xf32>
    %360 = vector.extract_strided_slice %353 {offsets = [0, 1], sizes = [4, 1], strides = [1, 1]} : vector<4x4xf32> to vector<4x1xf32>
    %361 = vector.extract_strided_slice %351 {offsets = [1, 0], sizes = [1, 256], strides = [1, 1]} : vector<4x256xf32> to vector<1x256xf32>
    %362 = vector.broadcast %360 : vector<4x1xf32> to vector<4x256xf32>
    %363 = vector.broadcast %361 : vector<1x256xf32> to vector<4x256xf32>
    %364 = arith.mulf %362, %363 : vector<4x256xf32>
    %365 = arith.addf %359, %364 : vector<4x256xf32>
    %366 = vector.extract_strided_slice %353 {offsets = [0, 2], sizes = [4, 1], strides = [1, 1]} : vector<4x4xf32> to vector<4x1xf32>
    %367 = vector.extract_strided_slice %351 {offsets = [2, 0], sizes = [1, 256], strides = [1, 1]} : vector<4x256xf32> to vector<1x256xf32>
    %368 = vector.broadcast %366 : vector<4x1xf32> to vector<4x256xf32>
    %369 = vector.broadcast %367 : vector<1x256xf32> to vector<4x256xf32>
    %370 = arith.mulf %368, %369 : vector<4x256xf32>
    %371 = arith.addf %365, %370 : vector<4x256xf32>
    %372 = vector.extract_strided_slice %353 {offsets = [0, 3], sizes = [4, 1], strides = [1, 1]} : vector<4x4xf32> to vector<4x1xf32>
    %373 = vector.extract_strided_slice %351 {offsets = [3, 0], sizes = [1, 256], strides = [1, 1]} : vector<4x256xf32> to vector<1x256xf32>
    %374 = vector.broadcast %372 : vector<4x1xf32> to vector<4x256xf32>
    %375 = vector.broadcast %373 : vector<1x256xf32> to vector<4x256xf32>
    %376 = arith.mulf %374, %375 : vector<4x256xf32>
    %377 = arith.addf %371, %376 : vector<4x256xf32>
    %c1_i32_71 = arith.constant 1 : i32
    %378 = tpu.dynamic_rotate %283 by %c1_i32_71 dim 1 : vector<4x256xf32>, i32 -> vector<4x256xf32>
    %c3_72 = arith.constant 3 : index
    %c0_73 = arith.constant 0 : index
    %c0_74 = arith.constant 0 : index
    %379 = vector.load %arg0[%c3_72, %c0_73, %c0_74] : memref<9x1x256xf32, #tpu.memory_space<vmem>>, vector<1x1x256xf32>
    %380 = vector.shape_cast %379 : vector<1x1x256xf32> to vector<1x256xf32>
    %381 = vector.broadcast %380 : vector<1x256xf32> to vector<4x256xf32>
    %382 = arith.mulf %378, %381 : vector<4x256xf32>
    %c3_75 = arith.constant 3 : index
    %c0_76 = arith.constant 0 : index
    %c0_77 = arith.constant 0 : index
    %383 = vector.load %arg3[%c3_75, %c0_76, %c0_77] : memref<9x4x4xf32, #tpu.memory_space<vmem>>, vector<1x4x4xf32>
    %384 = vector.shape_cast %383 : vector<1x4x4xf32> to vector<4x4xf32>
    %385 = vector.extract_strided_slice %384 {offsets = [0, 0], sizes = [4, 1], strides = [1, 1]} : vector<4x4xf32> to vector<4x1xf32>
    %386 = vector.extract_strided_slice %382 {offsets = [0, 0], sizes = [1, 256], strides = [1, 1]} : vector<4x256xf32> to vector<1x256xf32>
    %387 = vector.broadcast %385 : vector<4x1xf32> to vector<4x256xf32>
    %388 = vector.broadcast %386 : vector<1x256xf32> to vector<4x256xf32>
    %389 = arith.mulf %387, %388 : vector<4x256xf32>
    %390 = arith.addf %377, %389 : vector<4x256xf32>
    %391 = vector.extract_strided_slice %384 {offsets = [0, 1], sizes = [4, 1], strides = [1, 1]} : vector<4x4xf32> to vector<4x1xf32>
    %392 = vector.extract_strided_slice %382 {offsets = [1, 0], sizes = [1, 256], strides = [1, 1]} : vector<4x256xf32> to vector<1x256xf32>
    %393 = vector.broadcast %391 : vector<4x1xf32> to vector<4x256xf32>
    %394 = vector.broadcast %392 : vector<1x256xf32> to vector<4x256xf32>
    %395 = arith.mulf %393, %394 : vector<4x256xf32>
    %396 = arith.addf %390, %395 : vector<4x256xf32>
    %397 = vector.extract_strided_slice %384 {offsets = [0, 2], sizes = [4, 1], strides = [1, 1]} : vector<4x4xf32> to vector<4x1xf32>
    %398 = vector.extract_strided_slice %382 {offsets = [2, 0], sizes = [1, 256], strides = [1, 1]} : vector<4x256xf32> to vector<1x256xf32>
    %399 = vector.broadcast %397 : vector<4x1xf32> to vector<4x256xf32>
    %400 = vector.broadcast %398 : vector<1x256xf32> to vector<4x256xf32>
    %401 = arith.mulf %399, %400 : vector<4x256xf32>
    %402 = arith.addf %396, %401 : vector<4x256xf32>
    %403 = vector.extract_strided_slice %384 {offsets = [0, 3], sizes = [4, 1], strides = [1, 1]} : vector<4x4xf32> to vector<4x1xf32>
    %404 = vector.extract_strided_slice %382 {offsets = [3, 0], sizes = [1, 256], strides = [1, 1]} : vector<4x256xf32> to vector<1x256xf32>
    %405 = vector.broadcast %403 : vector<4x1xf32> to vector<4x256xf32>
    %406 = vector.broadcast %404 : vector<1x256xf32> to vector<4x256xf32>
    %407 = arith.mulf %405, %406 : vector<4x256xf32>
    %408 = arith.addf %402, %407 : vector<4x256xf32>
    %c4_78 = arith.constant 4 : index
    %c0_79 = arith.constant 0 : index
    %c0_80 = arith.constant 0 : index
    %409 = vector.load %arg3[%c4_78, %c0_79, %c0_80] : memref<9x4x4xf32, #tpu.memory_space<vmem>>, vector<1x4x4xf32>
    %410 = vector.shape_cast %409 : vector<1x4x4xf32> to vector<4x4xf32>
    %411 = vector.extract_strided_slice %410 {offsets = [0, 0], sizes = [4, 1], strides = [1, 1]} : vector<4x4xf32> to vector<4x1xf32>
    %412 = vector.extract_strided_slice %283 {offsets = [0, 0], sizes = [1, 256], strides = [1, 1]} : vector<4x256xf32> to vector<1x256xf32>
    %413 = vector.broadcast %411 : vector<4x1xf32> to vector<4x256xf32>
    %414 = vector.broadcast %412 : vector<1x256xf32> to vector<4x256xf32>
    %415 = arith.mulf %413, %414 : vector<4x256xf32>
    %416 = arith.addf %408, %415 : vector<4x256xf32>
    %417 = vector.extract_strided_slice %410 {offsets = [0, 1], sizes = [4, 1], strides = [1, 1]} : vector<4x4xf32> to vector<4x1xf32>
    %418 = vector.extract_strided_slice %283 {offsets = [1, 0], sizes = [1, 256], strides = [1, 1]} : vector<4x256xf32> to vector<1x256xf32>
    %419 = vector.broadcast %417 : vector<4x1xf32> to vector<4x256xf32>
    %420 = vector.broadcast %418 : vector<1x256xf32> to vector<4x256xf32>
    %421 = arith.mulf %419, %420 : vector<4x256xf32>
    %422 = arith.addf %416, %421 : vector<4x256xf32>
    %423 = vector.extract_strided_slice %410 {offsets = [0, 2], sizes = [4, 1], strides = [1, 1]} : vector<4x4xf32> to vector<4x1xf32>
    %424 = vector.extract_strided_slice %283 {offsets = [2, 0], sizes = [1, 256], strides = [1, 1]} : vector<4x256xf32> to vector<1x256xf32>
    %425 = vector.broadcast %423 : vector<4x1xf32> to vector<4x256xf32>
    %426 = vector.broadcast %424 : vector<1x256xf32> to vector<4x256xf32>
    %427 = arith.mulf %425, %426 : vector<4x256xf32>
    %428 = arith.addf %422, %427 : vector<4x256xf32>
    %429 = vector.extract_strided_slice %410 {offsets = [0, 3], sizes = [4, 1], strides = [1, 1]} : vector<4x4xf32> to vector<4x1xf32>
    %430 = vector.extract_strided_slice %283 {offsets = [3, 0], sizes = [1, 256], strides = [1, 1]} : vector<4x256xf32> to vector<1x256xf32>
    %431 = vector.broadcast %429 : vector<4x1xf32> to vector<4x256xf32>
    %432 = vector.broadcast %430 : vector<1x256xf32> to vector<4x256xf32>
    %433 = arith.mulf %431, %432 : vector<4x256xf32>
    %434 = arith.addf %428, %433 : vector<4x256xf32>
    %c255_i32_81 = arith.constant 255 : i32
    %435 = tpu.dynamic_rotate %283 by %c255_i32_81 dim 1 : vector<4x256xf32>, i32 -> vector<4x256xf32>
    %c5_82 = arith.constant 5 : index
    %c0_83 = arith.constant 0 : index
    %c0_84 = arith.constant 0 : index
    %436 = vector.load %arg0[%c5_82, %c0_83, %c0_84] : memref<9x1x256xf32, #tpu.memory_space<vmem>>, vector<1x1x256xf32>
    %437 = vector.shape_cast %436 : vector<1x1x256xf32> to vector<1x256xf32>
    %438 = vector.broadcast %437 : vector<1x256xf32> to vector<4x256xf32>
    %439 = arith.mulf %435, %438 : vector<4x256xf32>
    %c5_85 = arith.constant 5 : index
    %c0_86 = arith.constant 0 : index
    %c0_87 = arith.constant 0 : index
    %440 = vector.load %arg3[%c5_85, %c0_86, %c0_87] : memref<9x4x4xf32, #tpu.memory_space<vmem>>, vector<1x4x4xf32>
    %441 = vector.shape_cast %440 : vector<1x4x4xf32> to vector<4x4xf32>
    %442 = vector.extract_strided_slice %441 {offsets = [0, 0], sizes = [4, 1], strides = [1, 1]} : vector<4x4xf32> to vector<4x1xf32>
    %443 = vector.extract_strided_slice %439 {offsets = [0, 0], sizes = [1, 256], strides = [1, 1]} : vector<4x256xf32> to vector<1x256xf32>
    %444 = vector.broadcast %442 : vector<4x1xf32> to vector<4x256xf32>
    %445 = vector.broadcast %443 : vector<1x256xf32> to vector<4x256xf32>
    %446 = arith.mulf %444, %445 : vector<4x256xf32>
    %447 = arith.addf %434, %446 : vector<4x256xf32>
    %448 = vector.extract_strided_slice %441 {offsets = [0, 1], sizes = [4, 1], strides = [1, 1]} : vector<4x4xf32> to vector<4x1xf32>
    %449 = vector.extract_strided_slice %439 {offsets = [1, 0], sizes = [1, 256], strides = [1, 1]} : vector<4x256xf32> to vector<1x256xf32>
    %450 = vector.broadcast %448 : vector<4x1xf32> to vector<4x256xf32>
    %451 = vector.broadcast %449 : vector<1x256xf32> to vector<4x256xf32>
    %452 = arith.mulf %450, %451 : vector<4x256xf32>
    %453 = arith.addf %447, %452 : vector<4x256xf32>
    %454 = vector.extract_strided_slice %441 {offsets = [0, 2], sizes = [4, 1], strides = [1, 1]} : vector<4x4xf32> to vector<4x1xf32>
    %455 = vector.extract_strided_slice %439 {offsets = [2, 0], sizes = [1, 256], strides = [1, 1]} : vector<4x256xf32> to vector<1x256xf32>
    %456 = vector.broadcast %454 : vector<4x1xf32> to vector<4x256xf32>
    %457 = vector.broadcast %455 : vector<1x256xf32> to vector<4x256xf32>
    %458 = arith.mulf %456, %457 : vector<4x256xf32>
    %459 = arith.addf %453, %458 : vector<4x256xf32>
    %460 = vector.extract_strided_slice %441 {offsets = [0, 3], sizes = [4, 1], strides = [1, 1]} : vector<4x4xf32> to vector<4x1xf32>
    %461 = vector.extract_strided_slice %439 {offsets = [3, 0], sizes = [1, 256], strides = [1, 1]} : vector<4x256xf32> to vector<1x256xf32>
    %462 = vector.broadcast %460 : vector<4x1xf32> to vector<4x256xf32>
    %463 = vector.broadcast %461 : vector<1x256xf32> to vector<4x256xf32>
    %464 = arith.mulf %462, %463 : vector<4x256xf32>
    %465 = arith.addf %459, %464 : vector<4x256xf32>
    %c241_i32_88 = arith.constant 241 : i32
    %466 = tpu.dynamic_rotate %283 by %c241_i32_88 dim 1 : vector<4x256xf32>, i32 -> vector<4x256xf32>
    %c6_89 = arith.constant 6 : index
    %c0_90 = arith.constant 0 : index
    %c0_91 = arith.constant 0 : index
    %467 = vector.load %arg0[%c6_89, %c0_90, %c0_91] : memref<9x1x256xf32, #tpu.memory_space<vmem>>, vector<1x1x256xf32>
    %468 = vector.shape_cast %467 : vector<1x1x256xf32> to vector<1x256xf32>
    %469 = vector.broadcast %468 : vector<1x256xf32> to vector<4x256xf32>
    %470 = arith.mulf %466, %469 : vector<4x256xf32>
    %c6_92 = arith.constant 6 : index
    %c0_93 = arith.constant 0 : index
    %c0_94 = arith.constant 0 : index
    %471 = vector.load %arg3[%c6_92, %c0_93, %c0_94] : memref<9x4x4xf32, #tpu.memory_space<vmem>>, vector<1x4x4xf32>
    %472 = vector.shape_cast %471 : vector<1x4x4xf32> to vector<4x4xf32>
    %473 = vector.extract_strided_slice %472 {offsets = [0, 0], sizes = [4, 1], strides = [1, 1]} : vector<4x4xf32> to vector<4x1xf32>
    %474 = vector.extract_strided_slice %470 {offsets = [0, 0], sizes = [1, 256], strides = [1, 1]} : vector<4x256xf32> to vector<1x256xf32>
    %475 = vector.broadcast %473 : vector<4x1xf32> to vector<4x256xf32>
    %476 = vector.broadcast %474 : vector<1x256xf32> to vector<4x256xf32>
    %477 = arith.mulf %475, %476 : vector<4x256xf32>
    %478 = arith.addf %465, %477 : vector<4x256xf32>
    %479 = vector.extract_strided_slice %472 {offsets = [0, 1], sizes = [4, 1], strides = [1, 1]} : vector<4x4xf32> to vector<4x1xf32>
    %480 = vector.extract_strided_slice %470 {offsets = [1, 0], sizes = [1, 256], strides = [1, 1]} : vector<4x256xf32> to vector<1x256xf32>
    %481 = vector.broadcast %479 : vector<4x1xf32> to vector<4x256xf32>
    %482 = vector.broadcast %480 : vector<1x256xf32> to vector<4x256xf32>
    %483 = arith.mulf %481, %482 : vector<4x256xf32>
    %484 = arith.addf %478, %483 : vector<4x256xf32>
    %485 = vector.extract_strided_slice %472 {offsets = [0, 2], sizes = [4, 1], strides = [1, 1]} : vector<4x4xf32> to vector<4x1xf32>
    %486 = vector.extract_strided_slice %470 {offsets = [2, 0], sizes = [1, 256], strides = [1, 1]} : vector<4x256xf32> to vector<1x256xf32>
    %487 = vector.broadcast %485 : vector<4x1xf32> to vector<4x256xf32>
    %488 = vector.broadcast %486 : vector<1x256xf32> to vector<4x256xf32>
    %489 = arith.mulf %487, %488 : vector<4x256xf32>
    %490 = arith.addf %484, %489 : vector<4x256xf32>
    %491 = vector.extract_strided_slice %472 {offsets = [0, 3], sizes = [4, 1], strides = [1, 1]} : vector<4x4xf32> to vector<4x1xf32>
    %492 = vector.extract_strided_slice %470 {offsets = [3, 0], sizes = [1, 256], strides = [1, 1]} : vector<4x256xf32> to vector<1x256xf32>
    %493 = vector.broadcast %491 : vector<4x1xf32> to vector<4x256xf32>
    %494 = vector.broadcast %492 : vector<1x256xf32> to vector<4x256xf32>
    %495 = arith.mulf %493, %494 : vector<4x256xf32>
    %496 = arith.addf %490, %495 : vector<4x256xf32>
    %c240_i32_95 = arith.constant 240 : i32
    %497 = tpu.dynamic_rotate %283 by %c240_i32_95 dim 1 : vector<4x256xf32>, i32 -> vector<4x256xf32>
    %c7_96 = arith.constant 7 : index
    %c0_97 = arith.constant 0 : index
    %c0_98 = arith.constant 0 : index
    %498 = vector.load %arg0[%c7_96, %c0_97, %c0_98] : memref<9x1x256xf32, #tpu.memory_space<vmem>>, vector<1x1x256xf32>
    %499 = vector.shape_cast %498 : vector<1x1x256xf32> to vector<1x256xf32>
    %500 = vector.broadcast %499 : vector<1x256xf32> to vector<4x256xf32>
    %501 = arith.mulf %497, %500 : vector<4x256xf32>
    %c7_99 = arith.constant 7 : index
    %c0_100 = arith.constant 0 : index
    %c0_101 = arith.constant 0 : index
    %502 = vector.load %arg3[%c7_99, %c0_100, %c0_101] : memref<9x4x4xf32, #tpu.memory_space<vmem>>, vector<1x4x4xf32>
    %503 = vector.shape_cast %502 : vector<1x4x4xf32> to vector<4x4xf32>
    %504 = vector.extract_strided_slice %503 {offsets = [0, 0], sizes = [4, 1], strides = [1, 1]} : vector<4x4xf32> to vector<4x1xf32>
    %505 = vector.extract_strided_slice %501 {offsets = [0, 0], sizes = [1, 256], strides = [1, 1]} : vector<4x256xf32> to vector<1x256xf32>
    %506 = vector.broadcast %504 : vector<4x1xf32> to vector<4x256xf32>
    %507 = vector.broadcast %505 : vector<1x256xf32> to vector<4x256xf32>
    %508 = arith.mulf %506, %507 : vector<4x256xf32>
    %509 = arith.addf %496, %508 : vector<4x256xf32>
    %510 = vector.extract_strided_slice %503 {offsets = [0, 1], sizes = [4, 1], strides = [1, 1]} : vector<4x4xf32> to vector<4x1xf32>
    %511 = vector.extract_strided_slice %501 {offsets = [1, 0], sizes = [1, 256], strides = [1, 1]} : vector<4x256xf32> to vector<1x256xf32>
    %512 = vector.broadcast %510 : vector<4x1xf32> to vector<4x256xf32>
    %513 = vector.broadcast %511 : vector<1x256xf32> to vector<4x256xf32>
    %514 = arith.mulf %512, %513 : vector<4x256xf32>
    %515 = arith.addf %509, %514 : vector<4x256xf32>
    %516 = vector.extract_strided_slice %503 {offsets = [0, 2], sizes = [4, 1], strides = [1, 1]} : vector<4x4xf32> to vector<4x1xf32>
    %517 = vector.extract_strided_slice %501 {offsets = [2, 0], sizes = [1, 256], strides = [1, 1]} : vector<4x256xf32> to vector<1x256xf32>
    %518 = vector.broadcast %516 : vector<4x1xf32> to vector<4x256xf32>
    %519 = vector.broadcast %517 : vector<1x256xf32> to vector<4x256xf32>
    %520 = arith.mulf %518, %519 : vector<4x256xf32>
    %521 = arith.addf %515, %520 : vector<4x256xf32>
    %522 = vector.extract_strided_slice %503 {offsets = [0, 3], sizes = [4, 1], strides = [1, 1]} : vector<4x4xf32> to vector<4x1xf32>
    %523 = vector.extract_strided_slice %501 {offsets = [3, 0], sizes = [1, 256], strides = [1, 1]} : vector<4x256xf32> to vector<1x256xf32>
    %524 = vector.broadcast %522 : vector<4x1xf32> to vector<4x256xf32>
    %525 = vector.broadcast %523 : vector<1x256xf32> to vector<4x256xf32>
    %526 = arith.mulf %524, %525 : vector<4x256xf32>
    %527 = arith.addf %521, %526 : vector<4x256xf32>
    %c239_i32_102 = arith.constant 239 : i32
    %528 = tpu.dynamic_rotate %283 by %c239_i32_102 dim 1 : vector<4x256xf32>, i32 -> vector<4x256xf32>
    %c8_103 = arith.constant 8 : index
    %c0_104 = arith.constant 0 : index
    %c0_105 = arith.constant 0 : index
    %529 = vector.load %arg0[%c8_103, %c0_104, %c0_105] : memref<9x1x256xf32, #tpu.memory_space<vmem>>, vector<1x1x256xf32>
    %530 = vector.shape_cast %529 : vector<1x1x256xf32> to vector<1x256xf32>
    %531 = vector.broadcast %530 : vector<1x256xf32> to vector<4x256xf32>
    %532 = arith.mulf %528, %531 : vector<4x256xf32>
    %c8_106 = arith.constant 8 : index
    %c0_107 = arith.constant 0 : index
    %c0_108 = arith.constant 0 : index
    %533 = vector.load %arg3[%c8_106, %c0_107, %c0_108] : memref<9x4x4xf32, #tpu.memory_space<vmem>>, vector<1x4x4xf32>
    %534 = vector.shape_cast %533 : vector<1x4x4xf32> to vector<4x4xf32>
    %535 = vector.extract_strided_slice %534 {offsets = [0, 0], sizes = [4, 1], strides = [1, 1]} : vector<4x4xf32> to vector<4x1xf32>
    %536 = vector.extract_strided_slice %532 {offsets = [0, 0], sizes = [1, 256], strides = [1, 1]} : vector<4x256xf32> to vector<1x256xf32>
    %537 = vector.broadcast %535 : vector<4x1xf32> to vector<4x256xf32>
    %538 = vector.broadcast %536 : vector<1x256xf32> to vector<4x256xf32>
    %539 = arith.mulf %537, %538 : vector<4x256xf32>
    %540 = arith.addf %527, %539 : vector<4x256xf32>
    %541 = vector.extract_strided_slice %534 {offsets = [0, 1], sizes = [4, 1], strides = [1, 1]} : vector<4x4xf32> to vector<4x1xf32>
    %542 = vector.extract_strided_slice %532 {offsets = [1, 0], sizes = [1, 256], strides = [1, 1]} : vector<4x256xf32> to vector<1x256xf32>
    %543 = vector.broadcast %541 : vector<4x1xf32> to vector<4x256xf32>
    %544 = vector.broadcast %542 : vector<1x256xf32> to vector<4x256xf32>
    %545 = arith.mulf %543, %544 : vector<4x256xf32>
    %546 = arith.addf %540, %545 : vector<4x256xf32>
    %547 = vector.extract_strided_slice %534 {offsets = [0, 2], sizes = [4, 1], strides = [1, 1]} : vector<4x4xf32> to vector<4x1xf32>
    %548 = vector.extract_strided_slice %532 {offsets = [2, 0], sizes = [1, 256], strides = [1, 1]} : vector<4x256xf32> to vector<1x256xf32>
    %549 = vector.broadcast %547 : vector<4x1xf32> to vector<4x256xf32>
    %550 = vector.broadcast %548 : vector<1x256xf32> to vector<4x256xf32>
    %551 = arith.mulf %549, %550 : vector<4x256xf32>
    %552 = arith.addf %546, %551 : vector<4x256xf32>
    %553 = vector.extract_strided_slice %534 {offsets = [0, 3], sizes = [4, 1], strides = [1, 1]} : vector<4x4xf32> to vector<4x1xf32>
    %554 = vector.extract_strided_slice %532 {offsets = [3, 0], sizes = [1, 256], strides = [1, 1]} : vector<4x256xf32> to vector<1x256xf32>
    %555 = vector.broadcast %553 : vector<4x1xf32> to vector<4x256xf32>
    %556 = vector.broadcast %554 : vector<1x256xf32> to vector<4x256xf32>
    %557 = arith.mulf %555, %556 : vector<4x256xf32>
    %558 = arith.addf %552, %557 : vector<4x256xf32>
    %c0_109 = arith.constant 0 : index
    %c0_110 = arith.constant 0 : index
    %559 = vector.load %arg4[%c0_109, %c0_110] : memref<4x1xf32, #tpu.memory_space<vmem>>, vector<4x1xf32>
    %560 = vector.broadcast %559 : vector<4x1xf32> to vector<4x256xf32>
    %561 = arith.addf %558, %560 : vector<4x256xf32>
    %562 = arith.addf %561, %1 : vector<4x256xf32>
    %c0_111 = arith.constant 0 : index
    %c0_112 = arith.constant 0 : index
    %c0_113 = arith.constant 0 : index
    %563 = vector.load %arg6[%c0_111, %c0_112, %c0_113] : memref<2x4x256xf32, #tpu.memory_space<vmem>>, vector<1x4x256xf32>
    %564 = vector.shape_cast %563 : vector<1x4x256xf32> to vector<4x256xf32>
    %565 = vector.shape_cast %562 : vector<4x256xf32> to vector<1x4x256xf32>
    tpu.vector_store %arg6[%c0_111, %c0_112, %c0_113], %565 {strides = array<i32>} : memref<2x4x256xf32, #tpu.memory_space<vmem>>, vector<1x4x256xf32>,
    %c1_114 = arith.constant 1 : index
    %c0_115 = arith.constant 0 : index
    %c0_116 = arith.constant 0 : index
    %566 = vector.load %arg5[%c1_114, %c0_115, %c0_116] : memref<2x4x256xf32, #tpu.memory_space<vmem>>, vector<1x4x256xf32>
    %567 = vector.shape_cast %566 : vector<1x4x256xf32> to vector<4x256xf32>
    %cst_117 = arith.constant 0.000000e+00 : f32
    %568 = vector.broadcast %cst_117 : f32 to vector<4x256xf32>
    %569 = arith.maximumf %567, %568 : vector<4x256xf32>
    %cst_118 = arith.constant 0.000000e+00 : f32
    %570 = vector.broadcast %cst_118 : f32 to vector<4x256xf32>
    %c17_i32_119 = arith.constant 17 : i32
    %571 = tpu.dynamic_rotate %569 by %c17_i32_119 dim 1 : vector<4x256xf32>, i32 -> vector<4x256xf32>
    %c0_120 = arith.constant 0 : index
    %c0_121 = arith.constant 0 : index
    %c0_122 = arith.constant 0 : index
    %572 = vector.load %arg0[%c0_120, %c0_121, %c0_122] : memref<9x1x256xf32, #tpu.memory_space<vmem>>, vector<1x1x256xf32>
    %573 = vector.shape_cast %572 : vector<1x1x256xf32> to vector<1x256xf32>
    %574 = vector.broadcast %573 : vector<1x256xf32> to vector<4x256xf32>
    %575 = arith.mulf %571, %574 : vector<4x256xf32>
    %c0_123 = arith.constant 0 : index
    %c0_124 = arith.constant 0 : index
    %c0_125 = arith.constant 0 : index
    %576 = vector.load %arg1[%c0_123, %c0_124, %c0_125] : memref<9x4x4xf32, #tpu.memory_space<vmem>>, vector<1x4x4xf32>
    %577 = vector.shape_cast %576 : vector<1x4x4xf32> to vector<4x4xf32>
    %578 = vector.extract_strided_slice %577 {offsets = [0, 0], sizes = [4, 1], strides = [1, 1]} : vector<4x4xf32> to vector<4x1xf32>
    %579 = vector.extract_strided_slice %575 {offsets = [0, 0], sizes = [1, 256], strides = [1, 1]} : vector<4x256xf32> to vector<1x256xf32>
    %580 = vector.broadcast %578 : vector<4x1xf32> to vector<4x256xf32>
    %581 = vector.broadcast %579 : vector<1x256xf32> to vector<4x256xf32>
    %582 = arith.mulf %580, %581 : vector<4x256xf32>
    %583 = arith.addf %570, %582 : vector<4x256xf32>
    %584 = vector.extract_strided_slice %577 {offsets = [0, 1], sizes = [4, 1], strides = [1, 1]} : vector<4x4xf32> to vector<4x1xf32>
    %585 = vector.extract_strided_slice %575 {offsets = [1, 0], sizes = [1, 256], strides = [1, 1]} : vector<4x256xf32> to vector<1x256xf32>
    %586 = vector.broadcast %584 : vector<4x1xf32> to vector<4x256xf32>
    %587 = vector.broadcast %585 : vector<1x256xf32> to vector<4x256xf32>
    %588 = arith.mulf %586, %587 : vector<4x256xf32>
    %589 = arith.addf %583, %588 : vector<4x256xf32>
    %590 = vector.extract_strided_slice %577 {offsets = [0, 2], sizes = [4, 1], strides = [1, 1]} : vector<4x4xf32> to vector<4x1xf32>
    %591 = vector.extract_strided_slice %575 {offsets = [2, 0], sizes = [1, 256], strides = [1, 1]} : vector<4x256xf32> to vector<1x256xf32>
    %592 = vector.broadcast %590 : vector<4x1xf32> to vector<4x256xf32>
    %593 = vector.broadcast %591 : vector<1x256xf32> to vector<4x256xf32>
    %594 = arith.mulf %592, %593 : vector<4x256xf32>
    %595 = arith.addf %589, %594 : vector<4x256xf32>
    %596 = vector.extract_strided_slice %577 {offsets = [0, 3], sizes = [4, 1], strides = [1, 1]} : vector<4x4xf32> to vector<4x1xf32>
    %597 = vector.extract_strided_slice %575 {offsets = [3, 0], sizes = [1, 256], strides = [1, 1]} : vector<4x256xf32> to vector<1x256xf32>
    %598 = vector.broadcast %596 : vector<4x1xf32> to vector<4x256xf32>
    %599 = vector.broadcast %597 : vector<1x256xf32> to vector<4x256xf32>
    %600 = arith.mulf %598, %599 : vector<4x256xf32>
    %601 = arith.addf %595, %600 : vector<4x256xf32>
    %c16_i32_126 = arith.constant 16 : i32
    %602 = tpu.dynamic_rotate %569 by %c16_i32_126 dim 1 : vector<4x256xf32>, i32 -> vector<4x256xf32>
    %c1_127 = arith.constant 1 : index
    %c0_128 = arith.constant 0 : index
    %c0_129 = arith.constant 0 : index
    %603 = vector.load %arg0[%c1_127, %c0_128, %c0_129] : memref<9x1x256xf32, #tpu.memory_space<vmem>>, vector<1x1x256xf32>
    %604 = vector.shape_cast %603 : vector<1x1x256xf32> to vector<1x256xf32>
    %605 = vector.broadcast %604 : vector<1x256xf32> to vector<4x256xf32>
    %606 = arith.mulf %602, %605 : vector<4x256xf32>
    %c1_130 = arith.constant 1 : index
    %c0_131 = arith.constant 0 : index
    %c0_132 = arith.constant 0 : index
    %607 = vector.load %arg1[%c1_130, %c0_131, %c0_132] : memref<9x4x4xf32, #tpu.memory_space<vmem>>, vector<1x4x4xf32>
    %608 = vector.shape_cast %607 : vector<1x4x4xf32> to vector<4x4xf32>
    %609 = vector.extract_strided_slice %608 {offsets = [0, 0], sizes = [4, 1], strides = [1, 1]} : vector<4x4xf32> to vector<4x1xf32>
    %610 = vector.extract_strided_slice %606 {offsets = [0, 0], sizes = [1, 256], strides = [1, 1]} : vector<4x256xf32> to vector<1x256xf32>
    %611 = vector.broadcast %609 : vector<4x1xf32> to vector<4x256xf32>
    %612 = vector.broadcast %610 : vector<1x256xf32> to vector<4x256xf32>
    %613 = arith.mulf %611, %612 : vector<4x256xf32>
    %614 = arith.addf %601, %613 : vector<4x256xf32>
    %615 = vector.extract_strided_slice %608 {offsets = [0, 1], sizes = [4, 1], strides = [1, 1]} : vector<4x4xf32> to vector<4x1xf32>
    %616 = vector.extract_strided_slice %606 {offsets = [1, 0], sizes = [1, 256], strides = [1, 1]} : vector<4x256xf32> to vector<1x256xf32>
    %617 = vector.broadcast %615 : vector<4x1xf32> to vector<4x256xf32>
    %618 = vector.broadcast %616 : vector<1x256xf32> to vector<4x256xf32>
    %619 = arith.mulf %617, %618 : vector<4x256xf32>
    %620 = arith.addf %614, %619 : vector<4x256xf32>
    %621 = vector.extract_strided_slice %608 {offsets = [0, 2], sizes = [4, 1], strides = [1, 1]} : vector<4x4xf32> to vector<4x1xf32>
    %622 = vector.extract_strided_slice %606 {offsets = [2, 0], sizes = [1, 256], strides = [1, 1]} : vector<4x256xf32> to vector<1x256xf32>
    %623 = vector.broadcast %621 : vector<4x1xf32> to vector<4x256xf32>
    %624 = vector.broadcast %622 : vector<1x256xf32> to vector<4x256xf32>
    %625 = arith.mulf %623, %624 : vector<4x256xf32>
    %626 = arith.addf %620, %625 : vector<4x256xf32>
    %627 = vector.extract_strided_slice %608 {offsets = [0, 3], sizes = [4, 1], strides = [1, 1]} : vector<4x4xf32> to vector<4x1xf32>
    %628 = vector.extract_strided_slice %606 {offsets = [3, 0], sizes = [1, 256], strides = [1, 1]} : vector<4x256xf32> to vector<1x256xf32>
    %629 = vector.broadcast %627 : vector<4x1xf32> to vector<4x256xf32>
    %630 = vector.broadcast %628 : vector<1x256xf32> to vector<4x256xf32>
    %631 = arith.mulf %629, %630 : vector<4x256xf32>
    %632 = arith.addf %626, %631 : vector<4x256xf32>
    %c15_i32_133 = arith.constant 15 : i32
    %633 = tpu.dynamic_rotate %569 by %c15_i32_133 dim 1 : vector<4x256xf32>, i32 -> vector<4x256xf32>
    %c2_134 = arith.constant 2 : index
    %c0_135 = arith.constant 0 : index
    %c0_136 = arith.constant 0 : index
    %634 = vector.load %arg0[%c2_134, %c0_135, %c0_136] : memref<9x1x256xf32, #tpu.memory_space<vmem>>, vector<1x1x256xf32>
    %635 = vector.shape_cast %634 : vector<1x1x256xf32> to vector<1x256xf32>
    %636 = vector.broadcast %635 : vector<1x256xf32> to vector<4x256xf32>
    %637 = arith.mulf %633, %636 : vector<4x256xf32>
    %c2_137 = arith.constant 2 : index
    %c0_138 = arith.constant 0 : index
    %c0_139 = arith.constant 0 : index
    %638 = vector.load %arg1[%c2_137, %c0_138, %c0_139] : memref<9x4x4xf32, #tpu.memory_space<vmem>>, vector<1x4x4xf32>
    %639 = vector.shape_cast %638 : vector<1x4x4xf32> to vector<4x4xf32>
    %640 = vector.extract_strided_slice %639 {offsets = [0, 0], sizes = [4, 1], strides = [1, 1]} : vector<4x4xf32> to vector<4x1xf32>
    %641 = vector.extract_strided_slice %637 {offsets = [0, 0], sizes = [1, 256], strides = [1, 1]} : vector<4x256xf32> to vector<1x256xf32>
    %642 = vector.broadcast %640 : vector<4x1xf32> to vector<4x256xf32>
    %643 = vector.broadcast %641 : vector<1x256xf32> to vector<4x256xf32>
    %644 = arith.mulf %642, %643 : vector<4x256xf32>
    %645 = arith.addf %632, %644 : vector<4x256xf32>
    %646 = vector.extract_strided_slice %639 {offsets = [0, 1], sizes = [4, 1], strides = [1, 1]} : vector<4x4xf32> to vector<4x1xf32>
    %647 = vector.extract_strided_slice %637 {offsets = [1, 0], sizes = [1, 256], strides = [1, 1]} : vector<4x256xf32> to vector<1x256xf32>
    %648 = vector.broadcast %646 : vector<4x1xf32> to vector<4x256xf32>
    %649 = vector.broadcast %647 : vector<1x256xf32> to vector<4x256xf32>
    %650 = arith.mulf %648, %649 : vector<4x256xf32>
    %651 = arith.addf %645, %650 : vector<4x256xf32>
    %652 = vector.extract_strided_slice %639 {offsets = [0, 2], sizes = [4, 1], strides = [1, 1]} : vector<4x4xf32> to vector<4x1xf32>
    %653 = vector.extract_strided_slice %637 {offsets = [2, 0], sizes = [1, 256], strides = [1, 1]} : vector<4x256xf32> to vector<1x256xf32>
    %654 = vector.broadcast %652 : vector<4x1xf32> to vector<4x256xf32>
    %655 = vector.broadcast %653 : vector<1x256xf32> to vector<4x256xf32>
    %656 = arith.mulf %654, %655 : vector<4x256xf32>
    %657 = arith.addf %651, %656 : vector<4x256xf32>
    %658 = vector.extract_strided_slice %639 {offsets = [0, 3], sizes = [4, 1], strides = [1, 1]} : vector<4x4xf32> to vector<4x1xf32>
    %659 = vector.extract_strided_slice %637 {offsets = [3, 0], sizes = [1, 256], strides = [1, 1]} : vector<4x256xf32> to vector<1x256xf32>
    %660 = vector.broadcast %658 : vector<4x1xf32> to vector<4x256xf32>
    %661 = vector.broadcast %659 : vector<1x256xf32> to vector<4x256xf32>
    %662 = arith.mulf %660, %661 : vector<4x256xf32>
    %663 = arith.addf %657, %662 : vector<4x256xf32>
    %c1_i32_140 = arith.constant 1 : i32
    %664 = tpu.dynamic_rotate %569 by %c1_i32_140 dim 1 : vector<4x256xf32>, i32 -> vector<4x256xf32>
    %c3_141 = arith.constant 3 : index
    %c0_142 = arith.constant 0 : index
    %c0_143 = arith.constant 0 : index
    %665 = vector.load %arg0[%c3_141, %c0_142, %c0_143] : memref<9x1x256xf32, #tpu.memory_space<vmem>>, vector<1x1x256xf32>
    %666 = vector.shape_cast %665 : vector<1x1x256xf32> to vector<1x256xf32>
    %667 = vector.broadcast %666 : vector<1x256xf32> to vector<4x256xf32>
    %668 = arith.mulf %664, %667 : vector<4x256xf32>
    %c3_144 = arith.constant 3 : index
    %c0_145 = arith.constant 0 : index
    %c0_146 = arith.constant 0 : index
    %669 = vector.load %arg1[%c3_144, %c0_145, %c0_146] : memref<9x4x4xf32, #tpu.memory_space<vmem>>, vector<1x4x4xf32>
    %670 = vector.shape_cast %669 : vector<1x4x4xf32> to vector<4x4xf32>
    %671 = vector.extract_strided_slice %670 {offsets = [0, 0], sizes = [4, 1], strides = [1, 1]} : vector<4x4xf32> to vector<4x1xf32>
    %672 = vector.extract_strided_slice %668 {offsets = [0, 0], sizes = [1, 256], strides = [1, 1]} : vector<4x256xf32> to vector<1x256xf32>
    %673 = vector.broadcast %671 : vector<4x1xf32> to vector<4x256xf32>
    %674 = vector.broadcast %672 : vector<1x256xf32> to vector<4x256xf32>
    %675 = arith.mulf %673, %674 : vector<4x256xf32>
    %676 = arith.addf %663, %675 : vector<4x256xf32>
    %677 = vector.extract_strided_slice %670 {offsets = [0, 1], sizes = [4, 1], strides = [1, 1]} : vector<4x4xf32> to vector<4x1xf32>
    %678 = vector.extract_strided_slice %668 {offsets = [1, 0], sizes = [1, 256], strides = [1, 1]} : vector<4x256xf32> to vector<1x256xf32>
    %679 = vector.broadcast %677 : vector<4x1xf32> to vector<4x256xf32>
    %680 = vector.broadcast %678 : vector<1x256xf32> to vector<4x256xf32>
    %681 = arith.mulf %679, %680 : vector<4x256xf32>
    %682 = arith.addf %676, %681 : vector<4x256xf32>
    %683 = vector.extract_strided_slice %670 {offsets = [0, 2], sizes = [4, 1], strides = [1, 1]} : vector<4x4xf32> to vector<4x1xf32>
    %684 = vector.extract_strided_slice %668 {offsets = [2, 0], sizes = [1, 256], strides = [1, 1]} : vector<4x256xf32> to vector<1x256xf32>
    %685 = vector.broadcast %683 : vector<4x1xf32> to vector<4x256xf32>
    %686 = vector.broadcast %684 : vector<1x256xf32> to vector<4x256xf32>
    %687 = arith.mulf %685, %686 : vector<4x256xf32>
    %688 = arith.addf %682, %687 : vector<4x256xf32>
    %689 = vector.extract_strided_slice %670 {offsets = [0, 3], sizes = [4, 1], strides = [1, 1]} : vector<4x4xf32> to vector<4x1xf32>
    %690 = vector.extract_strided_slice %668 {offsets = [3, 0], sizes = [1, 256], strides = [1, 1]} : vector<4x256xf32> to vector<1x256xf32>
    %691 = vector.broadcast %689 : vector<4x1xf32> to vector<4x256xf32>
    %692 = vector.broadcast %690 : vector<1x256xf32> to vector<4x256xf32>
    %693 = arith.mulf %691, %692 : vector<4x256xf32>
    %694 = arith.addf %688, %693 : vector<4x256xf32>
    %c4_147 = arith.constant 4 : index
    %c0_148 = arith.constant 0 : index
    %c0_149 = arith.constant 0 : index
    %695 = vector.load %arg1[%c4_147, %c0_148, %c0_149] : memref<9x4x4xf32, #tpu.memory_space<vmem>>, vector<1x4x4xf32>
    %696 = vector.shape_cast %695 : vector<1x4x4xf32> to vector<4x4xf32>
    %697 = vector.extract_strided_slice %696 {offsets = [0, 0], sizes = [4, 1], strides = [1, 1]} : vector<4x4xf32> to vector<4x1xf32>
    %698 = vector.extract_strided_slice %569 {offsets = [0, 0], sizes = [1, 256], strides = [1, 1]} : vector<4x256xf32> to vector<1x256xf32>
    %699 = vector.broadcast %697 : vector<4x1xf32> to vector<4x256xf32>
    %700 = vector.broadcast %698 : vector<1x256xf32> to vector<4x256xf32>
    %701 = arith.mulf %699, %700 : vector<4x256xf32>
    %702 = arith.addf %694, %701 : vector<4x256xf32>
    %703 = vector.extract_strided_slice %696 {offsets = [0, 1], sizes = [4, 1], strides = [1, 1]} : vector<4x4xf32> to vector<4x1xf32>
    %704 = vector.extract_strided_slice %569 {offsets = [1, 0], sizes = [1, 256], strides = [1, 1]} : vector<4x256xf32> to vector<1x256xf32>
    %705 = vector.broadcast %703 : vector<4x1xf32> to vector<4x256xf32>
    %706 = vector.broadcast %704 : vector<1x256xf32> to vector<4x256xf32>
    %707 = arith.mulf %705, %706 : vector<4x256xf32>
    %708 = arith.addf %702, %707 : vector<4x256xf32>
    %709 = vector.extract_strided_slice %696 {offsets = [0, 2], sizes = [4, 1], strides = [1, 1]} : vector<4x4xf32> to vector<4x1xf32>
    %710 = vector.extract_strided_slice %569 {offsets = [2, 0], sizes = [1, 256], strides = [1, 1]} : vector<4x256xf32> to vector<1x256xf32>
    %711 = vector.broadcast %709 : vector<4x1xf32> to vector<4x256xf32>
    %712 = vector.broadcast %710 : vector<1x256xf32> to vector<4x256xf32>
    %713 = arith.mulf %711, %712 : vector<4x256xf32>
    %714 = arith.addf %708, %713 : vector<4x256xf32>
    %715 = vector.extract_strided_slice %696 {offsets = [0, 3], sizes = [4, 1], strides = [1, 1]} : vector<4x4xf32> to vector<4x1xf32>
    %716 = vector.extract_strided_slice %569 {offsets = [3, 0], sizes = [1, 256], strides = [1, 1]} : vector<4x256xf32> to vector<1x256xf32>
    %717 = vector.broadcast %715 : vector<4x1xf32> to vector<4x256xf32>
    %718 = vector.broadcast %716 : vector<1x256xf32> to vector<4x256xf32>
    %719 = arith.mulf %717, %718 : vector<4x256xf32>
    %720 = arith.addf %714, %719 : vector<4x256xf32>
    %c255_i32_150 = arith.constant 255 : i32
    %721 = tpu.dynamic_rotate %569 by %c255_i32_150 dim 1 : vector<4x256xf32>, i32 -> vector<4x256xf32>
    %c5_151 = arith.constant 5 : index
    %c0_152 = arith.constant 0 : index
    %c0_153 = arith.constant 0 : index
    %722 = vector.load %arg0[%c5_151, %c0_152, %c0_153] : memref<9x1x256xf32, #tpu.memory_space<vmem>>, vector<1x1x256xf32>
    %723 = vector.shape_cast %722 : vector<1x1x256xf32> to vector<1x256xf32>
    %724 = vector.broadcast %723 : vector<1x256xf32> to vector<4x256xf32>
    %725 = arith.mulf %721, %724 : vector<4x256xf32>
    %c5_154 = arith.constant 5 : index
    %c0_155 = arith.constant 0 : index
    %c0_156 = arith.constant 0 : index
    %726 = vector.load %arg1[%c5_154, %c0_155, %c0_156] : memref<9x4x4xf32, #tpu.memory_space<vmem>>, vector<1x4x4xf32>
    %727 = vector.shape_cast %726 : vector<1x4x4xf32> to vector<4x4xf32>
    %728 = vector.extract_strided_slice %727 {offsets = [0, 0], sizes = [4, 1], strides = [1, 1]} : vector<4x4xf32> to vector<4x1xf32>
    %729 = vector.extract_strided_slice %725 {offsets = [0, 0], sizes = [1, 256], strides = [1, 1]} : vector<4x256xf32> to vector<1x256xf32>
    %730 = vector.broadcast %728 : vector<4x1xf32> to vector<4x256xf32>
    %731 = vector.broadcast %729 : vector<1x256xf32> to vector<4x256xf32>
    %732 = arith.mulf %730, %731 : vector<4x256xf32>
    %733 = arith.addf %720, %732 : vector<4x256xf32>
    %734 = vector.extract_strided_slice %727 {offsets = [0, 1], sizes = [4, 1], strides = [1, 1]} : vector<4x4xf32> to vector<4x1xf32>
    %735 = vector.extract_strided_slice %725 {offsets = [1, 0], sizes = [1, 256], strides = [1, 1]} : vector<4x256xf32> to vector<1x256xf32>
    %736 = vector.broadcast %734 : vector<4x1xf32> to vector<4x256xf32>
    %737 = vector.broadcast %735 : vector<1x256xf32> to vector<4x256xf32>
    %738 = arith.mulf %736, %737 : vector<4x256xf32>
    %739 = arith.addf %733, %738 : vector<4x256xf32>
    %740 = vector.extract_strided_slice %727 {offsets = [0, 2], sizes = [4, 1], strides = [1, 1]} : vector<4x4xf32> to vector<4x1xf32>
    %741 = vector.extract_strided_slice %725 {offsets = [2, 0], sizes = [1, 256], strides = [1, 1]} : vector<4x256xf32> to vector<1x256xf32>
    %742 = vector.broadcast %740 : vector<4x1xf32> to vector<4x256xf32>
    %743 = vector.broadcast %741 : vector<1x256xf32> to vector<4x256xf32>
    %744 = arith.mulf %742, %743 : vector<4x256xf32>
    %745 = arith.addf %739, %744 : vector<4x256xf32>
    %746 = vector.extract_strided_slice %727 {offsets = [0, 3], sizes = [4, 1], strides = [1, 1]} : vector<4x4xf32> to vector<4x1xf32>
    %747 = vector.extract_strided_slice %725 {offsets = [3, 0], sizes = [1, 256], strides = [1, 1]} : vector<4x256xf32> to vector<1x256xf32>
    %748 = vector.broadcast %746 : vector<4x1xf32> to vector<4x256xf32>
    %749 = vector.broadcast %747 : vector<1x256xf32> to vector<4x256xf32>
    %750 = arith.mulf %748, %749 : vector<4x256xf32>
    %751 = arith.addf %745, %750 : vector<4x256xf32>
    %c241_i32_157 = arith.constant 241 : i32
    %752 = tpu.dynamic_rotate %569 by %c241_i32_157 dim 1 : vector<4x256xf32>, i32 -> vector<4x256xf32>
    %c6_158 = arith.constant 6 : index
    %c0_159 = arith.constant 0 : index
    %c0_160 = arith.constant 0 : index
    %753 = vector.load %arg0[%c6_158, %c0_159, %c0_160] : memref<9x1x256xf32, #tpu.memory_space<vmem>>, vector<1x1x256xf32>
    %754 = vector.shape_cast %753 : vector<1x1x256xf32> to vector<1x256xf32>
    %755 = vector.broadcast %754 : vector<1x256xf32> to vector<4x256xf32>
    %756 = arith.mulf %752, %755 : vector<4x256xf32>
    %c6_161 = arith.constant 6 : index
    %c0_162 = arith.constant 0 : index
    %c0_163 = arith.constant 0 : index
    %757 = vector.load %arg1[%c6_161, %c0_162, %c0_163] : memref<9x4x4xf32, #tpu.memory_space<vmem>>, vector<1x4x4xf32>
    %758 = vector.shape_cast %757 : vector<1x4x4xf32> to vector<4x4xf32>
    %759 = vector.extract_strided_slice %758 {offsets = [0, 0], sizes = [4, 1], strides = [1, 1]} : vector<4x4xf32> to vector<4x1xf32>
    %760 = vector.extract_strided_slice %756 {offsets = [0, 0], sizes = [1, 256], strides = [1, 1]} : vector<4x256xf32> to vector<1x256xf32>
    %761 = vector.broadcast %759 : vector<4x1xf32> to vector<4x256xf32>
    %762 = vector.broadcast %760 : vector<1x256xf32> to vector<4x256xf32>
    %763 = arith.mulf %761, %762 : vector<4x256xf32>
    %764 = arith.addf %751, %763 : vector<4x256xf32>
    %765 = vector.extract_strided_slice %758 {offsets = [0, 1], sizes = [4, 1], strides = [1, 1]} : vector<4x4xf32> to vector<4x1xf32>
    %766 = vector.extract_strided_slice %756 {offsets = [1, 0], sizes = [1, 256], strides = [1, 1]} : vector<4x256xf32> to vector<1x256xf32>
    %767 = vector.broadcast %765 : vector<4x1xf32> to vector<4x256xf32>
    %768 = vector.broadcast %766 : vector<1x256xf32> to vector<4x256xf32>
    %769 = arith.mulf %767, %768 : vector<4x256xf32>
    %770 = arith.addf %764, %769 : vector<4x256xf32>
    %771 = vector.extract_strided_slice %758 {offsets = [0, 2], sizes = [4, 1], strides = [1, 1]} : vector<4x4xf32> to vector<4x1xf32>
    %772 = vector.extract_strided_slice %756 {offsets = [2, 0], sizes = [1, 256], strides = [1, 1]} : vector<4x256xf32> to vector<1x256xf32>
    %773 = vector.broadcast %771 : vector<4x1xf32> to vector<4x256xf32>
    %774 = vector.broadcast %772 : vector<1x256xf32> to vector<4x256xf32>
    %775 = arith.mulf %773, %774 : vector<4x256xf32>
    %776 = arith.addf %770, %775 : vector<4x256xf32>
    %777 = vector.extract_strided_slice %758 {offsets = [0, 3], sizes = [4, 1], strides = [1, 1]} : vector<4x4xf32> to vector<4x1xf32>
    %778 = vector.extract_strided_slice %756 {offsets = [3, 0], sizes = [1, 256], strides = [1, 1]} : vector<4x256xf32> to vector<1x256xf32>
    %779 = vector.broadcast %777 : vector<4x1xf32> to vector<4x256xf32>
    %780 = vector.broadcast %778 : vector<1x256xf32> to vector<4x256xf32>
    %781 = arith.mulf %779, %780 : vector<4x256xf32>
    %782 = arith.addf %776, %781 : vector<4x256xf32>
    %c240_i32_164 = arith.constant 240 : i32
    %783 = tpu.dynamic_rotate %569 by %c240_i32_164 dim 1 : vector<4x256xf32>, i32 -> vector<4x256xf32>
    %c7_165 = arith.constant 7 : index
    %c0_166 = arith.constant 0 : index
    %c0_167 = arith.constant 0 : index
    %784 = vector.load %arg0[%c7_165, %c0_166, %c0_167] : memref<9x1x256xf32, #tpu.memory_space<vmem>>, vector<1x1x256xf32>
    %785 = vector.shape_cast %784 : vector<1x1x256xf32> to vector<1x256xf32>
    %786 = vector.broadcast %785 : vector<1x256xf32> to vector<4x256xf32>
    %787 = arith.mulf %783, %786 : vector<4x256xf32>
    %c7_168 = arith.constant 7 : index
    %c0_169 = arith.constant 0 : index
    %c0_170 = arith.constant 0 : index
    %788 = vector.load %arg1[%c7_168, %c0_169, %c0_170] : memref<9x4x4xf32, #tpu.memory_space<vmem>>, vector<1x4x4xf32>
    %789 = vector.shape_cast %788 : vector<1x4x4xf32> to vector<4x4xf32>
    %790 = vector.extract_strided_slice %789 {offsets = [0, 0], sizes = [4, 1], strides = [1, 1]} : vector<4x4xf32> to vector<4x1xf32>
    %791 = vector.extract_strided_slice %787 {offsets = [0, 0], sizes = [1, 256], strides = [1, 1]} : vector<4x256xf32> to vector<1x256xf32>
    %792 = vector.broadcast %790 : vector<4x1xf32> to vector<4x256xf32>
    %793 = vector.broadcast %791 : vector<1x256xf32> to vector<4x256xf32>
    %794 = arith.mulf %792, %793 : vector<4x256xf32>
    %795 = arith.addf %782, %794 : vector<4x256xf32>
    %796 = vector.extract_strided_slice %789 {offsets = [0, 1], sizes = [4, 1], strides = [1, 1]} : vector<4x4xf32> to vector<4x1xf32>
    %797 = vector.extract_strided_slice %787 {offsets = [1, 0], sizes = [1, 256], strides = [1, 1]} : vector<4x256xf32> to vector<1x256xf32>
    %798 = vector.broadcast %796 : vector<4x1xf32> to vector<4x256xf32>
    %799 = vector.broadcast %797 : vector<1x256xf32> to vector<4x256xf32>
    %800 = arith.mulf %798, %799 : vector<4x256xf32>
    %801 = arith.addf %795, %800 : vector<4x256xf32>
    %802 = vector.extract_strided_slice %789 {offsets = [0, 2], sizes = [4, 1], strides = [1, 1]} : vector<4x4xf32> to vector<4x1xf32>
    %803 = vector.extract_strided_slice %787 {offsets = [2, 0], sizes = [1, 256], strides = [1, 1]} : vector<4x256xf32> to vector<1x256xf32>
    %804 = vector.broadcast %802 : vector<4x1xf32> to vector<4x256xf32>
    %805 = vector.broadcast %803 : vector<1x256xf32> to vector<4x256xf32>
    %806 = arith.mulf %804, %805 : vector<4x256xf32>
    %807 = arith.addf %801, %806 : vector<4x256xf32>
    %808 = vector.extract_strided_slice %789 {offsets = [0, 3], sizes = [4, 1], strides = [1, 1]} : vector<4x4xf32> to vector<4x1xf32>
    %809 = vector.extract_strided_slice %787 {offsets = [3, 0], sizes = [1, 256], strides = [1, 1]} : vector<4x256xf32> to vector<1x256xf32>
    %810 = vector.broadcast %808 : vector<4x1xf32> to vector<4x256xf32>
    %811 = vector.broadcast %809 : vector<1x256xf32> to vector<4x256xf32>
    %812 = arith.mulf %810, %811 : vector<4x256xf32>
    %813 = arith.addf %807, %812 : vector<4x256xf32>
    %c239_i32_171 = arith.constant 239 : i32
    %814 = tpu.dynamic_rotate %569 by %c239_i32_171 dim 1 : vector<4x256xf32>, i32 -> vector<4x256xf32>
    %c8_172 = arith.constant 8 : index
    %c0_173 = arith.constant 0 : index
    %c0_174 = arith.constant 0 : index
    %815 = vector.load %arg0[%c8_172, %c0_173, %c0_174] : memref<9x1x256xf32, #tpu.memory_space<vmem>>, vector<1x1x256xf32>
    %816 = vector.shape_cast %815 : vector<1x1x256xf32> to vector<1x256xf32>
    %817 = vector.broadcast %816 : vector<1x256xf32> to vector<4x256xf32>
    %818 = arith.mulf %814, %817 : vector<4x256xf32>
    %c8_175 = arith.constant 8 : index
    %c0_176 = arith.constant 0 : index
    %c0_177 = arith.constant 0 : index
    %819 = vector.load %arg1[%c8_175, %c0_176, %c0_177] : memref<9x4x4xf32, #tpu.memory_space<vmem>>, vector<1x4x4xf32>
    %820 = vector.shape_cast %819 : vector<1x4x4xf32> to vector<4x4xf32>
    %821 = vector.extract_strided_slice %820 {offsets = [0, 0], sizes = [4, 1], strides = [1, 1]} : vector<4x4xf32> to vector<4x1xf32>
    %822 = vector.extract_strided_slice %818 {offsets = [0, 0], sizes = [1, 256], strides = [1, 1]} : vector<4x256xf32> to vector<1x256xf32>
    %823 = vector.broadcast %821 : vector<4x1xf32> to vector<4x256xf32>
    %824 = vector.broadcast %822 : vector<1x256xf32> to vector<4x256xf32>
    %825 = arith.mulf %823, %824 : vector<4x256xf32>
    %826 = arith.addf %813, %825 : vector<4x256xf32>
    %827 = vector.extract_strided_slice %820 {offsets = [0, 1], sizes = [4, 1], strides = [1, 1]} : vector<4x4xf32> to vector<4x1xf32>
    %828 = vector.extract_strided_slice %818 {offsets = [1, 0], sizes = [1, 256], strides = [1, 1]} : vector<4x256xf32> to vector<1x256xf32>
    %829 = vector.broadcast %827 : vector<4x1xf32> to vector<4x256xf32>
    %830 = vector.broadcast %828 : vector<1x256xf32> to vector<4x256xf32>
    %831 = arith.mulf %829, %830 : vector<4x256xf32>
    %832 = arith.addf %826, %831 : vector<4x256xf32>
    %833 = vector.extract_strided_slice %820 {offsets = [0, 2], sizes = [4, 1], strides = [1, 1]} : vector<4x4xf32> to vector<4x1xf32>
    %834 = vector.extract_strided_slice %818 {offsets = [2, 0], sizes = [1, 256], strides = [1, 1]} : vector<4x256xf32> to vector<1x256xf32>
    %835 = vector.broadcast %833 : vector<4x1xf32> to vector<4x256xf32>
    %836 = vector.broadcast %834 : vector<1x256xf32> to vector<4x256xf32>
    %837 = arith.mulf %835, %836 : vector<4x256xf32>
    %838 = arith.addf %832, %837 : vector<4x256xf32>
    %839 = vector.extract_strided_slice %820 {offsets = [0, 3], sizes = [4, 1], strides = [1, 1]} : vector<4x4xf32> to vector<4x1xf32>
    %840 = vector.extract_strided_slice %818 {offsets = [3, 0], sizes = [1, 256], strides = [1, 1]} : vector<4x256xf32> to vector<1x256xf32>
    %841 = vector.broadcast %839 : vector<4x1xf32> to vector<4x256xf32>
    %842 = vector.broadcast %840 : vector<1x256xf32> to vector<4x256xf32>
    %843 = arith.mulf %841, %842 : vector<4x256xf32>
    %844 = arith.addf %838, %843 : vector<4x256xf32>
    %c0_178 = arith.constant 0 : index
    %c0_179 = arith.constant 0 : index
    %845 = vector.load %arg2[%c0_178, %c0_179] : memref<4x1xf32, #tpu.memory_space<vmem>>, vector<4x1xf32>
    %846 = vector.broadcast %845 : vector<4x1xf32> to vector<4x256xf32>
    %847 = arith.addf %844, %846 : vector<4x256xf32>
    %cst_180 = arith.constant 0.000000e+00 : f32
    %848 = vector.broadcast %cst_180 : f32 to vector<4x256xf32>
    %849 = arith.maximumf %847, %848 : vector<4x256xf32>
    %cst_181 = arith.constant 0.000000e+00 : f32
    %850 = vector.broadcast %cst_181 : f32 to vector<4x256xf32>
    %c17_i32_182 = arith.constant 17 : i32
    %851 = tpu.dynamic_rotate %849 by %c17_i32_182 dim 1 : vector<4x256xf32>, i32 -> vector<4x256xf32>
    %c0_183 = arith.constant 0 : index
    %c0_184 = arith.constant 0 : index
    %c0_185 = arith.constant 0 : index
    %852 = vector.load %arg0[%c0_183, %c0_184, %c0_185] : memref<9x1x256xf32, #tpu.memory_space<vmem>>, vector<1x1x256xf32>
    %853 = vector.shape_cast %852 : vector<1x1x256xf32> to vector<1x256xf32>
    %854 = vector.broadcast %853 : vector<1x256xf32> to vector<4x256xf32>
    %855 = arith.mulf %851, %854 : vector<4x256xf32>
    %c0_186 = arith.constant 0 : index
    %c0_187 = arith.constant 0 : index
    %c0_188 = arith.constant 0 : index
    %856 = vector.load %arg3[%c0_186, %c0_187, %c0_188] : memref<9x4x4xf32, #tpu.memory_space<vmem>>, vector<1x4x4xf32>
    %857 = vector.shape_cast %856 : vector<1x4x4xf32> to vector<4x4xf32>
    %858 = vector.extract_strided_slice %857 {offsets = [0, 0], sizes = [4, 1], strides = [1, 1]} : vector<4x4xf32> to vector<4x1xf32>
    %859 = vector.extract_strided_slice %855 {offsets = [0, 0], sizes = [1, 256], strides = [1, 1]} : vector<4x256xf32> to vector<1x256xf32>
    %860 = vector.broadcast %858 : vector<4x1xf32> to vector<4x256xf32>
    %861 = vector.broadcast %859 : vector<1x256xf32> to vector<4x256xf32>
    %862 = arith.mulf %860, %861 : vector<4x256xf32>
    %863 = arith.addf %850, %862 : vector<4x256xf32>
    %864 = vector.extract_strided_slice %857 {offsets = [0, 1], sizes = [4, 1], strides = [1, 1]} : vector<4x4xf32> to vector<4x1xf32>
    %865 = vector.extract_strided_slice %855 {offsets = [1, 0], sizes = [1, 256], strides = [1, 1]} : vector<4x256xf32> to vector<1x256xf32>
    %866 = vector.broadcast %864 : vector<4x1xf32> to vector<4x256xf32>
    %867 = vector.broadcast %865 : vector<1x256xf32> to vector<4x256xf32>
    %868 = arith.mulf %866, %867 : vector<4x256xf32>
    %869 = arith.addf %863, %868 : vector<4x256xf32>
    %870 = vector.extract_strided_slice %857 {offsets = [0, 2], sizes = [4, 1], strides = [1, 1]} : vector<4x4xf32> to vector<4x1xf32>
    %871 = vector.extract_strided_slice %855 {offsets = [2, 0], sizes = [1, 256], strides = [1, 1]} : vector<4x256xf32> to vector<1x256xf32>
    %872 = vector.broadcast %870 : vector<4x1xf32> to vector<4x256xf32>
    %873 = vector.broadcast %871 : vector<1x256xf32> to vector<4x256xf32>
    %874 = arith.mulf %872, %873 : vector<4x256xf32>
    %875 = arith.addf %869, %874 : vector<4x256xf32>
    %876 = vector.extract_strided_slice %857 {offsets = [0, 3], sizes = [4, 1], strides = [1, 1]} : vector<4x4xf32> to vector<4x1xf32>
    %877 = vector.extract_strided_slice %855 {offsets = [3, 0], sizes = [1, 256], strides = [1, 1]} : vector<4x256xf32> to vector<1x256xf32>
    %878 = vector.broadcast %876 : vector<4x1xf32> to vector<4x256xf32>
    %879 = vector.broadcast %877 : vector<1x256xf32> to vector<4x256xf32>
    %880 = arith.mulf %878, %879 : vector<4x256xf32>
    %881 = arith.addf %875, %880 : vector<4x256xf32>
    %c16_i32_189 = arith.constant 16 : i32
    %882 = tpu.dynamic_rotate %849 by %c16_i32_189 dim 1 : vector<4x256xf32>, i32 -> vector<4x256xf32>
    %c1_190 = arith.constant 1 : index
    %c0_191 = arith.constant 0 : index
    %c0_192 = arith.constant 0 : index
    %883 = vector.load %arg0[%c1_190, %c0_191, %c0_192] : memref<9x1x256xf32, #tpu.memory_space<vmem>>, vector<1x1x256xf32>
    %884 = vector.shape_cast %883 : vector<1x1x256xf32> to vector<1x256xf32>
    %885 = vector.broadcast %884 : vector<1x256xf32> to vector<4x256xf32>
    %886 = arith.mulf %882, %885 : vector<4x256xf32>
    %c1_193 = arith.constant 1 : index
    %c0_194 = arith.constant 0 : index
    %c0_195 = arith.constant 0 : index
    %887 = vector.load %arg3[%c1_193, %c0_194, %c0_195] : memref<9x4x4xf32, #tpu.memory_space<vmem>>, vector<1x4x4xf32>
    %888 = vector.shape_cast %887 : vector<1x4x4xf32> to vector<4x4xf32>
    %889 = vector.extract_strided_slice %888 {offsets = [0, 0], sizes = [4, 1], strides = [1, 1]} : vector<4x4xf32> to vector<4x1xf32>
    %890 = vector.extract_strided_slice %886 {offsets = [0, 0], sizes = [1, 256], strides = [1, 1]} : vector<4x256xf32> to vector<1x256xf32>
    %891 = vector.broadcast %889 : vector<4x1xf32> to vector<4x256xf32>
    %892 = vector.broadcast %890 : vector<1x256xf32> to vector<4x256xf32>
    %893 = arith.mulf %891, %892 : vector<4x256xf32>
    %894 = arith.addf %881, %893 : vector<4x256xf32>
    %895 = vector.extract_strided_slice %888 {offsets = [0, 1], sizes = [4, 1], strides = [1, 1]} : vector<4x4xf32> to vector<4x1xf32>
    %896 = vector.extract_strided_slice %886 {offsets = [1, 0], sizes = [1, 256], strides = [1, 1]} : vector<4x256xf32> to vector<1x256xf32>
    %897 = vector.broadcast %895 : vector<4x1xf32> to vector<4x256xf32>
    %898 = vector.broadcast %896 : vector<1x256xf32> to vector<4x256xf32>
    %899 = arith.mulf %897, %898 : vector<4x256xf32>
    %900 = arith.addf %894, %899 : vector<4x256xf32>
    %901 = vector.extract_strided_slice %888 {offsets = [0, 2], sizes = [4, 1], strides = [1, 1]} : vector<4x4xf32> to vector<4x1xf32>
    %902 = vector.extract_strided_slice %886 {offsets = [2, 0], sizes = [1, 256], strides = [1, 1]} : vector<4x256xf32> to vector<1x256xf32>
    %903 = vector.broadcast %901 : vector<4x1xf32> to vector<4x256xf32>
    %904 = vector.broadcast %902 : vector<1x256xf32> to vector<4x256xf32>
    %905 = arith.mulf %903, %904 : vector<4x256xf32>
    %906 = arith.addf %900, %905 : vector<4x256xf32>
    %907 = vector.extract_strided_slice %888 {offsets = [0, 3], sizes = [4, 1], strides = [1, 1]} : vector<4x4xf32> to vector<4x1xf32>
    %908 = vector.extract_strided_slice %886 {offsets = [3, 0], sizes = [1, 256], strides = [1, 1]} : vector<4x256xf32> to vector<1x256xf32>
    %909 = vector.broadcast %907 : vector<4x1xf32> to vector<4x256xf32>
    %910 = vector.broadcast %908 : vector<1x256xf32> to vector<4x256xf32>
    %911 = arith.mulf %909, %910 : vector<4x256xf32>
    %912 = arith.addf %906, %911 : vector<4x256xf32>
    %c15_i32_196 = arith.constant 15 : i32
    %913 = tpu.dynamic_rotate %849 by %c15_i32_196 dim 1 : vector<4x256xf32>, i32 -> vector<4x256xf32>
    %c2_197 = arith.constant 2 : index
    %c0_198 = arith.constant 0 : index
    %c0_199 = arith.constant 0 : index
    %914 = vector.load %arg0[%c2_197, %c0_198, %c0_199] : memref<9x1x256xf32, #tpu.memory_space<vmem>>, vector<1x1x256xf32>
    %915 = vector.shape_cast %914 : vector<1x1x256xf32> to vector<1x256xf32>
    %916 = vector.broadcast %915 : vector<1x256xf32> to vector<4x256xf32>
    %917 = arith.mulf %913, %916 : vector<4x256xf32>
    %c2_200 = arith.constant 2 : index
    %c0_201 = arith.constant 0 : index
    %c0_202 = arith.constant 0 : index
    %918 = vector.load %arg3[%c2_200, %c0_201, %c0_202] : memref<9x4x4xf32, #tpu.memory_space<vmem>>, vector<1x4x4xf32>
    %919 = vector.shape_cast %918 : vector<1x4x4xf32> to vector<4x4xf32>
    %920 = vector.extract_strided_slice %919 {offsets = [0, 0], sizes = [4, 1], strides = [1, 1]} : vector<4x4xf32> to vector<4x1xf32>
    %921 = vector.extract_strided_slice %917 {offsets = [0, 0], sizes = [1, 256], strides = [1, 1]} : vector<4x256xf32> to vector<1x256xf32>
    %922 = vector.broadcast %920 : vector<4x1xf32> to vector<4x256xf32>
    %923 = vector.broadcast %921 : vector<1x256xf32> to vector<4x256xf32>
    %924 = arith.mulf %922, %923 : vector<4x256xf32>
    %925 = arith.addf %912, %924 : vector<4x256xf32>
    %926 = vector.extract_strided_slice %919 {offsets = [0, 1], sizes = [4, 1], strides = [1, 1]} : vector<4x4xf32> to vector<4x1xf32>
    %927 = vector.extract_strided_slice %917 {offsets = [1, 0], sizes = [1, 256], strides = [1, 1]} : vector<4x256xf32> to vector<1x256xf32>
    %928 = vector.broadcast %926 : vector<4x1xf32> to vector<4x256xf32>
    %929 = vector.broadcast %927 : vector<1x256xf32> to vector<4x256xf32>
    %930 = arith.mulf %928, %929 : vector<4x256xf32>
    %931 = arith.addf %925, %930 : vector<4x256xf32>
    %932 = vector.extract_strided_slice %919 {offsets = [0, 2], sizes = [4, 1], strides = [1, 1]} : vector<4x4xf32> to vector<4x1xf32>
    %933 = vector.extract_strided_slice %917 {offsets = [2, 0], sizes = [1, 256], strides = [1, 1]} : vector<4x256xf32> to vector<1x256xf32>
    %934 = vector.broadcast %932 : vector<4x1xf32> to vector<4x256xf32>
    %935 = vector.broadcast %933 : vector<1x256xf32> to vector<4x256xf32>
    %936 = arith.mulf %934, %935 : vector<4x256xf32>
    %937 = arith.addf %931, %936 : vector<4x256xf32>
    %938 = vector.extract_strided_slice %919 {offsets = [0, 3], sizes = [4, 1], strides = [1, 1]} : vector<4x4xf32> to vector<4x1xf32>
    %939 = vector.extract_strided_slice %917 {offsets = [3, 0], sizes = [1, 256], strides = [1, 1]} : vector<4x256xf32> to vector<1x256xf32>
    %940 = vector.broadcast %938 : vector<4x1xf32> to vector<4x256xf32>
    %941 = vector.broadcast %939 : vector<1x256xf32> to vector<4x256xf32>
    %942 = arith.mulf %940, %941 : vector<4x256xf32>
    %943 = arith.addf %937, %942 : vector<4x256xf32>
    %c1_i32_203 = arith.constant 1 : i32
    %944 = tpu.dynamic_rotate %849 by %c1_i32_203 dim 1 : vector<4x256xf32>, i32 -> vector<4x256xf32>
    %c3_204 = arith.constant 3 : index
    %c0_205 = arith.constant 0 : index
    %c0_206 = arith.constant 0 : index
    %945 = vector.load %arg0[%c3_204, %c0_205, %c0_206] : memref<9x1x256xf32, #tpu.memory_space<vmem>>, vector<1x1x256xf32>
    %946 = vector.shape_cast %945 : vector<1x1x256xf32> to vector<1x256xf32>
    %947 = vector.broadcast %946 : vector<1x256xf32> to vector<4x256xf32>
    %948 = arith.mulf %944, %947 : vector<4x256xf32>
    %c3_207 = arith.constant 3 : index
    %c0_208 = arith.constant 0 : index
    %c0_209 = arith.constant 0 : index
    %949 = vector.load %arg3[%c3_207, %c0_208, %c0_209] : memref<9x4x4xf32, #tpu.memory_space<vmem>>, vector<1x4x4xf32>
    %950 = vector.shape_cast %949 : vector<1x4x4xf32> to vector<4x4xf32>
    %951 = vector.extract_strided_slice %950 {offsets = [0, 0], sizes = [4, 1], strides = [1, 1]} : vector<4x4xf32> to vector<4x1xf32>
    %952 = vector.extract_strided_slice %948 {offsets = [0, 0], sizes = [1, 256], strides = [1, 1]} : vector<4x256xf32> to vector<1x256xf32>
    %953 = vector.broadcast %951 : vector<4x1xf32> to vector<4x256xf32>
    %954 = vector.broadcast %952 : vector<1x256xf32> to vector<4x256xf32>
    %955 = arith.mulf %953, %954 : vector<4x256xf32>
    %956 = arith.addf %943, %955 : vector<4x256xf32>
    %957 = vector.extract_strided_slice %950 {offsets = [0, 1], sizes = [4, 1], strides = [1, 1]} : vector<4x4xf32> to vector<4x1xf32>
    %958 = vector.extract_strided_slice %948 {offsets = [1, 0], sizes = [1, 256], strides = [1, 1]} : vector<4x256xf32> to vector<1x256xf32>
    %959 = vector.broadcast %957 : vector<4x1xf32> to vector<4x256xf32>
    %960 = vector.broadcast %958 : vector<1x256xf32> to vector<4x256xf32>
    %961 = arith.mulf %959, %960 : vector<4x256xf32>
    %962 = arith.addf %956, %961 : vector<4x256xf32>
    %963 = vector.extract_strided_slice %950 {offsets = [0, 2], sizes = [4, 1], strides = [1, 1]} : vector<4x4xf32> to vector<4x1xf32>
    %964 = vector.extract_strided_slice %948 {offsets = [2, 0], sizes = [1, 256], strides = [1, 1]} : vector<4x256xf32> to vector<1x256xf32>
    %965 = vector.broadcast %963 : vector<4x1xf32> to vector<4x256xf32>
    %966 = vector.broadcast %964 : vector<1x256xf32> to vector<4x256xf32>
    %967 = arith.mulf %965, %966 : vector<4x256xf32>
    %968 = arith.addf %962, %967 : vector<4x256xf32>
    %969 = vector.extract_strided_slice %950 {offsets = [0, 3], sizes = [4, 1], strides = [1, 1]} : vector<4x4xf32> to vector<4x1xf32>
    %970 = vector.extract_strided_slice %948 {offsets = [3, 0], sizes = [1, 256], strides = [1, 1]} : vector<4x256xf32> to vector<1x256xf32>
    %971 = vector.broadcast %969 : vector<4x1xf32> to vector<4x256xf32>
    %972 = vector.broadcast %970 : vector<1x256xf32> to vector<4x256xf32>
    %973 = arith.mulf %971, %972 : vector<4x256xf32>
    %974 = arith.addf %968, %973 : vector<4x256xf32>
    %c4_210 = arith.constant 4 : index
    %c0_211 = arith.constant 0 : index
    %c0_212 = arith.constant 0 : index
    %975 = vector.load %arg3[%c4_210, %c0_211, %c0_212] : memref<9x4x4xf32, #tpu.memory_space<vmem>>, vector<1x4x4xf32>
    %976 = vector.shape_cast %975 : vector<1x4x4xf32> to vector<4x4xf32>
    %977 = vector.extract_strided_slice %976 {offsets = [0, 0], sizes = [4, 1], strides = [1, 1]} : vector<4x4xf32> to vector<4x1xf32>
    %978 = vector.extract_strided_slice %849 {offsets = [0, 0], sizes = [1, 256], strides = [1, 1]} : vector<4x256xf32> to vector<1x256xf32>
    %979 = vector.broadcast %977 : vector<4x1xf32> to vector<4x256xf32>
    %980 = vector.broadcast %978 : vector<1x256xf32> to vector<4x256xf32>
    %981 = arith.mulf %979, %980 : vector<4x256xf32>
    %982 = arith.addf %974, %981 : vector<4x256xf32>
    %983 = vector.extract_strided_slice %976 {offsets = [0, 1], sizes = [4, 1], strides = [1, 1]} : vector<4x4xf32> to vector<4x1xf32>
    %984 = vector.extract_strided_slice %849 {offsets = [1, 0], sizes = [1, 256], strides = [1, 1]} : vector<4x256xf32> to vector<1x256xf32>
    %985 = vector.broadcast %983 : vector<4x1xf32> to vector<4x256xf32>
    %986 = vector.broadcast %984 : vector<1x256xf32> to vector<4x256xf32>
    %987 = arith.mulf %985, %986 : vector<4x256xf32>
    %988 = arith.addf %982, %987 : vector<4x256xf32>
    %989 = vector.extract_strided_slice %976 {offsets = [0, 2], sizes = [4, 1], strides = [1, 1]} : vector<4x4xf32> to vector<4x1xf32>
    %990 = vector.extract_strided_slice %849 {offsets = [2, 0], sizes = [1, 256], strides = [1, 1]} : vector<4x256xf32> to vector<1x256xf32>
    %991 = vector.broadcast %989 : vector<4x1xf32> to vector<4x256xf32>
    %992 = vector.broadcast %990 : vector<1x256xf32> to vector<4x256xf32>
    %993 = arith.mulf %991, %992 : vector<4x256xf32>
    %994 = arith.addf %988, %993 : vector<4x256xf32>
    %995 = vector.extract_strided_slice %976 {offsets = [0, 3], sizes = [4, 1], strides = [1, 1]} : vector<4x4xf32> to vector<4x1xf32>
    %996 = vector.extract_strided_slice %849 {offsets = [3, 0], sizes = [1, 256], strides = [1, 1]} : vector<4x256xf32> to vector<1x256xf32>
    %997 = vector.broadcast %995 : vector<4x1xf32> to vector<4x256xf32>
    %998 = vector.broadcast %996 : vector<1x256xf32> to vector<4x256xf32>
    %999 = arith.mulf %997, %998 : vector<4x256xf32>
    %1000 = arith.addf %994, %999 : vector<4x256xf32>
    %c255_i32_213 = arith.constant 255 : i32
    %1001 = tpu.dynamic_rotate %849 by %c255_i32_213 dim 1 : vector<4x256xf32>, i32 -> vector<4x256xf32>
    %c5_214 = arith.constant 5 : index
    %c0_215 = arith.constant 0 : index
    %c0_216 = arith.constant 0 : index
    %1002 = vector.load %arg0[%c5_214, %c0_215, %c0_216] : memref<9x1x256xf32, #tpu.memory_space<vmem>>, vector<1x1x256xf32>
    %1003 = vector.shape_cast %1002 : vector<1x1x256xf32> to vector<1x256xf32>
    %1004 = vector.broadcast %1003 : vector<1x256xf32> to vector<4x256xf32>
    %1005 = arith.mulf %1001, %1004 : vector<4x256xf32>
    %c5_217 = arith.constant 5 : index
    %c0_218 = arith.constant 0 : index
    %c0_219 = arith.constant 0 : index
    %1006 = vector.load %arg3[%c5_217, %c0_218, %c0_219] : memref<9x4x4xf32, #tpu.memory_space<vmem>>, vector<1x4x4xf32>
    %1007 = vector.shape_cast %1006 : vector<1x4x4xf32> to vector<4x4xf32>
    %1008 = vector.extract_strided_slice %1007 {offsets = [0, 0], sizes = [4, 1], strides = [1, 1]} : vector<4x4xf32> to vector<4x1xf32>
    %1009 = vector.extract_strided_slice %1005 {offsets = [0, 0], sizes = [1, 256], strides = [1, 1]} : vector<4x256xf32> to vector<1x256xf32>
    %1010 = vector.broadcast %1008 : vector<4x1xf32> to vector<4x256xf32>
    %1011 = vector.broadcast %1009 : vector<1x256xf32> to vector<4x256xf32>
    %1012 = arith.mulf %1010, %1011 : vector<4x256xf32>
    %1013 = arith.addf %1000, %1012 : vector<4x256xf32>
    %1014 = vector.extract_strided_slice %1007 {offsets = [0, 1], sizes = [4, 1], strides = [1, 1]} : vector<4x4xf32> to vector<4x1xf32>
    %1015 = vector.extract_strided_slice %1005 {offsets = [1, 0], sizes = [1, 256], strides = [1, 1]} : vector<4x256xf32> to vector<1x256xf32>
    %1016 = vector.broadcast %1014 : vector<4x1xf32> to vector<4x256xf32>
    %1017 = vector.broadcast %1015 : vector<1x256xf32> to vector<4x256xf32>
    %1018 = arith.mulf %1016, %1017 : vector<4x256xf32>
    %1019 = arith.addf %1013, %1018 : vector<4x256xf32>
    %1020 = vector.extract_strided_slice %1007 {offsets = [0, 2], sizes = [4, 1], strides = [1, 1]} : vector<4x4xf32> to vector<4x1xf32>
    %1021 = vector.extract_strided_slice %1005 {offsets = [2, 0], sizes = [1, 256], strides = [1, 1]} : vector<4x256xf32> to vector<1x256xf32>
    %1022 = vector.broadcast %1020 : vector<4x1xf32> to vector<4x256xf32>
    %1023 = vector.broadcast %1021 : vector<1x256xf32> to vector<4x256xf32>
    %1024 = arith.mulf %1022, %1023 : vector<4x256xf32>
    %1025 = arith.addf %1019, %1024 : vector<4x256xf32>
    %1026 = vector.extract_strided_slice %1007 {offsets = [0, 3], sizes = [4, 1], strides = [1, 1]} : vector<4x4xf32> to vector<4x1xf32>
    %1027 = vector.extract_strided_slice %1005 {offsets = [3, 0], sizes = [1, 256], strides = [1, 1]} : vector<4x256xf32> to vector<1x256xf32>
    %1028 = vector.broadcast %1026 : vector<4x1xf32> to vector<4x256xf32>
    %1029 = vector.broadcast %1027 : vector<1x256xf32> to vector<4x256xf32>
    %1030 = arith.mulf %1028, %1029 : vector<4x256xf32>
    %1031 = arith.addf %1025, %1030 : vector<4x256xf32>
    %c241_i32_220 = arith.constant 241 : i32
    %1032 = tpu.dynamic_rotate %849 by %c241_i32_220 dim 1 : vector<4x256xf32>, i32 -> vector<4x256xf32>
    %c6_221 = arith.constant 6 : index
    %c0_222 = arith.constant 0 : index
    %c0_223 = arith.constant 0 : index
    %1033 = vector.load %arg0[%c6_221, %c0_222, %c0_223] : memref<9x1x256xf32, #tpu.memory_space<vmem>>, vector<1x1x256xf32>
    %1034 = vector.shape_cast %1033 : vector<1x1x256xf32> to vector<1x256xf32>
    %1035 = vector.broadcast %1034 : vector<1x256xf32> to vector<4x256xf32>
    %1036 = arith.mulf %1032, %1035 : vector<4x256xf32>
    %c6_224 = arith.constant 6 : index
    %c0_225 = arith.constant 0 : index
    %c0_226 = arith.constant 0 : index
    %1037 = vector.load %arg3[%c6_224, %c0_225, %c0_226] : memref<9x4x4xf32, #tpu.memory_space<vmem>>, vector<1x4x4xf32>
    %1038 = vector.shape_cast %1037 : vector<1x4x4xf32> to vector<4x4xf32>
    %1039 = vector.extract_strided_slice %1038 {offsets = [0, 0], sizes = [4, 1], strides = [1, 1]} : vector<4x4xf32> to vector<4x1xf32>
    %1040 = vector.extract_strided_slice %1036 {offsets = [0, 0], sizes = [1, 256], strides = [1, 1]} : vector<4x256xf32> to vector<1x256xf32>
    %1041 = vector.broadcast %1039 : vector<4x1xf32> to vector<4x256xf32>
    %1042 = vector.broadcast %1040 : vector<1x256xf32> to vector<4x256xf32>
    %1043 = arith.mulf %1041, %1042 : vector<4x256xf32>
    %1044 = arith.addf %1031, %1043 : vector<4x256xf32>
    %1045 = vector.extract_strided_slice %1038 {offsets = [0, 1], sizes = [4, 1], strides = [1, 1]} : vector<4x4xf32> to vector<4x1xf32>
    %1046 = vector.extract_strided_slice %1036 {offsets = [1, 0], sizes = [1, 256], strides = [1, 1]} : vector<4x256xf32> to vector<1x256xf32>
    %1047 = vector.broadcast %1045 : vector<4x1xf32> to vector<4x256xf32>
    %1048 = vector.broadcast %1046 : vector<1x256xf32> to vector<4x256xf32>
    %1049 = arith.mulf %1047, %1048 : vector<4x256xf32>
    %1050 = arith.addf %1044, %1049 : vector<4x256xf32>
    %1051 = vector.extract_strided_slice %1038 {offsets = [0, 2], sizes = [4, 1], strides = [1, 1]} : vector<4x4xf32> to vector<4x1xf32>
    %1052 = vector.extract_strided_slice %1036 {offsets = [2, 0], sizes = [1, 256], strides = [1, 1]} : vector<4x256xf32> to vector<1x256xf32>
    %1053 = vector.broadcast %1051 : vector<4x1xf32> to vector<4x256xf32>
    %1054 = vector.broadcast %1052 : vector<1x256xf32> to vector<4x256xf32>
    %1055 = arith.mulf %1053, %1054 : vector<4x256xf32>
    %1056 = arith.addf %1050, %1055 : vector<4x256xf32>
    %1057 = vector.extract_strided_slice %1038 {offsets = [0, 3], sizes = [4, 1], strides = [1, 1]} : vector<4x4xf32> to vector<4x1xf32>
    %1058 = vector.extract_strided_slice %1036 {offsets = [3, 0], sizes = [1, 256], strides = [1, 1]} : vector<4x256xf32> to vector<1x256xf32>
    %1059 = vector.broadcast %1057 : vector<4x1xf32> to vector<4x256xf32>
    %1060 = vector.broadcast %1058 : vector<1x256xf32> to vector<4x256xf32>
    %1061 = arith.mulf %1059, %1060 : vector<4x256xf32>
    %1062 = arith.addf %1056, %1061 : vector<4x256xf32>
    %c240_i32_227 = arith.constant 240 : i32
    %1063 = tpu.dynamic_rotate %849 by %c240_i32_227 dim 1 : vector<4x256xf32>, i32 -> vector<4x256xf32>
    %c7_228 = arith.constant 7 : index
    %c0_229 = arith.constant 0 : index
    %c0_230 = arith.constant 0 : index
    %1064 = vector.load %arg0[%c7_228, %c0_229, %c0_230] : memref<9x1x256xf32, #tpu.memory_space<vmem>>, vector<1x1x256xf32>
    %1065 = vector.shape_cast %1064 : vector<1x1x256xf32> to vector<1x256xf32>
    %1066 = vector.broadcast %1065 : vector<1x256xf32> to vector<4x256xf32>
    %1067 = arith.mulf %1063, %1066 : vector<4x256xf32>
    %c7_231 = arith.constant 7 : index
    %c0_232 = arith.constant 0 : index
    %c0_233 = arith.constant 0 : index
    %1068 = vector.load %arg3[%c7_231, %c0_232, %c0_233] : memref<9x4x4xf32, #tpu.memory_space<vmem>>, vector<1x4x4xf32>
    %1069 = vector.shape_cast %1068 : vector<1x4x4xf32> to vector<4x4xf32>
    %1070 = vector.extract_strided_slice %1069 {offsets = [0, 0], sizes = [4, 1], strides = [1, 1]} : vector<4x4xf32> to vector<4x1xf32>
    %1071 = vector.extract_strided_slice %1067 {offsets = [0, 0], sizes = [1, 256], strides = [1, 1]} : vector<4x256xf32> to vector<1x256xf32>
    %1072 = vector.broadcast %1070 : vector<4x1xf32> to vector<4x256xf32>
    %1073 = vector.broadcast %1071 : vector<1x256xf32> to vector<4x256xf32>
    %1074 = arith.mulf %1072, %1073 : vector<4x256xf32>
    %1075 = arith.addf %1062, %1074 : vector<4x256xf32>
    %1076 = vector.extract_strided_slice %1069 {offsets = [0, 1], sizes = [4, 1], strides = [1, 1]} : vector<4x4xf32> to vector<4x1xf32>
    %1077 = vector.extract_strided_slice %1067 {offsets = [1, 0], sizes = [1, 256], strides = [1, 1]} : vector<4x256xf32> to vector<1x256xf32>
    %1078 = vector.broadcast %1076 : vector<4x1xf32> to vector<4x256xf32>
    %1079 = vector.broadcast %1077 : vector<1x256xf32> to vector<4x256xf32>
    %1080 = arith.mulf %1078, %1079 : vector<4x256xf32>
    %1081 = arith.addf %1075, %1080 : vector<4x256xf32>
    %1082 = vector.extract_strided_slice %1069 {offsets = [0, 2], sizes = [4, 1], strides = [1, 1]} : vector<4x4xf32> to vector<4x1xf32>
    %1083 = vector.extract_strided_slice %1067 {offsets = [2, 0], sizes = [1, 256], strides = [1, 1]} : vector<4x256xf32> to vector<1x256xf32>
    %1084 = vector.broadcast %1082 : vector<4x1xf32> to vector<4x256xf32>
    %1085 = vector.broadcast %1083 : vector<1x256xf32> to vector<4x256xf32>
    %1086 = arith.mulf %1084, %1085 : vector<4x256xf32>
    %1087 = arith.addf %1081, %1086 : vector<4x256xf32>
    %1088 = vector.extract_strided_slice %1069 {offsets = [0, 3], sizes = [4, 1], strides = [1, 1]} : vector<4x4xf32> to vector<4x1xf32>
    %1089 = vector.extract_strided_slice %1067 {offsets = [3, 0], sizes = [1, 256], strides = [1, 1]} : vector<4x256xf32> to vector<1x256xf32>
    %1090 = vector.broadcast %1088 : vector<4x1xf32> to vector<4x256xf32>
    %1091 = vector.broadcast %1089 : vector<1x256xf32> to vector<4x256xf32>
    %1092 = arith.mulf %1090, %1091 : vector<4x256xf32>
    %1093 = arith.addf %1087, %1092 : vector<4x256xf32>
    %c239_i32_234 = arith.constant 239 : i32
    %1094 = tpu.dynamic_rotate %849 by %c239_i32_234 dim 1 : vector<4x256xf32>, i32 -> vector<4x256xf32>
    %c8_235 = arith.constant 8 : index
    %c0_236 = arith.constant 0 : index
    %c0_237 = arith.constant 0 : index
    %1095 = vector.load %arg0[%c8_235, %c0_236, %c0_237] : memref<9x1x256xf32, #tpu.memory_space<vmem>>, vector<1x1x256xf32>
    %1096 = vector.shape_cast %1095 : vector<1x1x256xf32> to vector<1x256xf32>
    %1097 = vector.broadcast %1096 : vector<1x256xf32> to vector<4x256xf32>
    %1098 = arith.mulf %1094, %1097 : vector<4x256xf32>
    %c8_238 = arith.constant 8 : index
    %c0_239 = arith.constant 0 : index
    %c0_240 = arith.constant 0 : index
    %1099 = vector.load %arg3[%c8_238, %c0_239, %c0_240] : memref<9x4x4xf32, #tpu.memory_space<vmem>>, vector<1x4x4xf32>
    %1100 = vector.shape_cast %1099 : vector<1x4x4xf32> to vector<4x4xf32>
    %1101 = vector.extract_strided_slice %1100 {offsets = [0, 0], sizes = [4, 1], strides = [1, 1]} : vector<4x4xf32> to vector<4x1xf32>
    %1102 = vector.extract_strided_slice %1098 {offsets = [0, 0], sizes = [1, 256], strides = [1, 1]} : vector<4x256xf32> to vector<1x256xf32>
    %1103 = vector.broadcast %1101 : vector<4x1xf32> to vector<4x256xf32>
    %1104 = vector.broadcast %1102 : vector<1x256xf32> to vector<4x256xf32>
    %1105 = arith.mulf %1103, %1104 : vector<4x256xf32>
    %1106 = arith.addf %1093, %1105 : vector<4x256xf32>
    %1107 = vector.extract_strided_slice %1100 {offsets = [0, 1], sizes = [4, 1], strides = [1, 1]} : vector<4x4xf32> to vector<4x1xf32>
    %1108 = vector.extract_strided_slice %1098 {offsets = [1, 0], sizes = [1, 256], strides = [1, 1]} : vector<4x256xf32> to vector<1x256xf32>
    %1109 = vector.broadcast %1107 : vector<4x1xf32> to vector<4x256xf32>
    %1110 = vector.broadcast %1108 : vector<1x256xf32> to vector<4x256xf32>
    %1111 = arith.mulf %1109, %1110 : vector<4x256xf32>
    %1112 = arith.addf %1106, %1111 : vector<4x256xf32>
    %1113 = vector.extract_strided_slice %1100 {offsets = [0, 2], sizes = [4, 1], strides = [1, 1]} : vector<4x4xf32> to vector<4x1xf32>
    %1114 = vector.extract_strided_slice %1098 {offsets = [2, 0], sizes = [1, 256], strides = [1, 1]} : vector<4x256xf32> to vector<1x256xf32>
    %1115 = vector.broadcast %1113 : vector<4x1xf32> to vector<4x256xf32>
    %1116 = vector.broadcast %1114 : vector<1x256xf32> to vector<4x256xf32>
    %1117 = arith.mulf %1115, %1116 : vector<4x256xf32>
    %1118 = arith.addf %1112, %1117 : vector<4x256xf32>
    %1119 = vector.extract_strided_slice %1100 {offsets = [0, 3], sizes = [4, 1], strides = [1, 1]} : vector<4x4xf32> to vector<4x1xf32>
    %1120 = vector.extract_strided_slice %1098 {offsets = [3, 0], sizes = [1, 256], strides = [1, 1]} : vector<4x256xf32> to vector<1x256xf32>
    %1121 = vector.broadcast %1119 : vector<4x1xf32> to vector<4x256xf32>
    %1122 = vector.broadcast %1120 : vector<1x256xf32> to vector<4x256xf32>
    %1123 = arith.mulf %1121, %1122 : vector<4x256xf32>
    %1124 = arith.addf %1118, %1123 : vector<4x256xf32>
    %c0_241 = arith.constant 0 : index
    %c0_242 = arith.constant 0 : index
    %1125 = vector.load %arg4[%c0_241, %c0_242] : memref<4x1xf32, #tpu.memory_space<vmem>>, vector<4x1xf32>
    %1126 = vector.broadcast %1125 : vector<4x1xf32> to vector<4x256xf32>
    %1127 = arith.addf %1124, %1126 : vector<4x256xf32>
    %1128 = arith.addf %1127, %567 : vector<4x256xf32>
    %c1_243 = arith.constant 1 : index
    %c0_244 = arith.constant 0 : index
    %c0_245 = arith.constant 0 : index
    %1129 = vector.load %arg6[%c1_243, %c0_244, %c0_245] : memref<2x4x256xf32, #tpu.memory_space<vmem>>, vector<1x4x256xf32>
    %1130 = vector.shape_cast %1129 : vector<1x4x256xf32> to vector<4x256xf32>
    %1131 = vector.shape_cast %1128 : vector<4x256xf32> to vector<1x4x256xf32>
    tpu.vector_store %arg6[%c1_243, %c0_244, %c0_245], %1131 {strides = array<i32>} : memref<2x4x256xf32, #tpu.memory_space<vmem>>, vector<1x4x256xf32>,
    return
  }
}

</mosaic_0001>

<bundles_post_ra>
// kernel: residual_block.1
= control target key start
LH: loop header
LB: loop body
LE: loop exit
PB: predicated region body
PF: predicated region fallthrough
CT: control target
= control target key end

     0   :  { %v3990_v0 = vmov 2   ;;  %v3992_v1 = vmov 0   ;;  %v3996_v5 = vmov 3   ;;  %v3994_v6 = vmov 1   ;;  %s2297_s25 = smov 17   ;;  %s2298_s28 = smov 16   ;;  %s3979_s1 = inlined_call_operand.vmem [shape: f32[9,4,4], index: 1, kind: input, shape index: {}]   ;;  %s3980_s5 = inlined_call_operand.vmem [shape: f32[2,4,256], index: 5, kind: input, shape index: {}, may-alias: {5,6}]   ;;  %s3981_s3 = inlined_call_operand.vmem [shape: f32[9,4,4], index: 3, kind: input, shape index: {}]   ;;  %s3982_s0 = inlined_call_operand.vmem [shape: f32[9,1,256], index: 0, kind: input, shape index: {}]   ;;  %s3983_s2 = inlined_call_operand.vmem [shape: f32[4,1], index: 2, kind: input, shape index: {}]   ;;  %s3984_s4 = inlined_call_operand.vmem [shape: f32[4,1], index: 4, kind: input, shape index: {}]   ;;  %s3985_s6 = inlined_call_operand.vmem [shape: f32[2,4,256], index: 6, kind: output, shape index: {}, may-alias: {5,6}]  }
   0x1   :  { %2171 = vset.pattern.permute.xlu2 %v3990_v0  ;;  %2169 = vset.pattern.permute.xlu1 %v3992_v1  ;;  %v48_v2 = vld [vmem:[%s3979_s1] sm:$0xf]  ;;  %v2362_v9 = vld [vmem:[%s3979_s1 + $0x4] sm:$0xf]  ;;  %s2299_s29 = smov 1   ;;  %s2300_s30 = smov 15   ;;  %v35_v41 = vlaneseq }
   0x2   :  { %v2348_v3 = vld [vmem:[%s3980_s5] sm:$0xff]  ;;  %71 = vperm.xlu2 %2171, %v48_v2   ;;  %51 = vperm.xlu1 %2169, %v48_v2   ;;  %v2115_v16 = vld [vmem:[%s3979_s1 + $0x10] sm:$0xf]  ;;  %v2112_v17 = vld [vmem:[%s3979_s1 + $0x8] sm:$0xf]  ;;  %s2301_s17 = smov 111  }
   0x3   :  { %v2351_v4 = vmax.f32 %v2348_v3, 0.0  ;;  %2185 = vset.pattern.permute.xlu0 %v3996_v5  ;;  %v2396_v22 = vld [vmem:[%s3979_s1 + $0x1c] sm:$0xf]  ;;  %v2114_v23 = vld [vmem:[%s3979_s1 + $0xc] sm:$0xf]  ;;  %s2302_s18 = smov 127  }
   0x4   :  { %v2117_v26 = vld [vmem:[%s3979_s1 + $0x14] sm:$0xf]  ;;  %v2424_v28 = vld [vmem:[%s3979_s1 + $0x20] sm:$0xf]  ;;  %s2303_s21 = smov 113   ;;  %v2447_v34 = vld [vmem:[%s3980_s5 + $0x8] sm:$0xff] }
   0x5   :  { %26 = vst [vmem:[#allocation1] ss:$2 sm:$0xff] %v2351_v4  ;;  %v2119_v31 = vld [vmem:[%s3979_s1 + $0x18] sm:$0xf]  ;;  %v2454_v36 = vld [vmem:[%s3981_s3 + $0x8] sm:$0xf] }
   0x6   :  { %4051 = vst [vmem:[#allocation2_spill] sm:$0xff] %v2447_v34  ;;  %v2457_v37 = vmax.f32 %v2447_v34, 0.0  ;;  %v2470_v45 = vand.u32 127, %v35_v41  ;;  %s2304_s5 = smov 112   ;;  %v2477_v46 = vld [vmem:[%s3982_s0] sm:$0x3] }
   0x7   :  { %4055 = vst [vmem:[#allocation6_spill] sm:$0xff] %v2477_v46  ;;  %v3989_v47 = vperm.slane %v2477_v46, 0  ;;  %v3988_v48 = vperm.slane %v2477_v46, 1  ;;  %v2499_v56 = vld [vmem:[%s3982_s0 + $0x2] sm:$0x3]  ;;  %vm1076_vm8 = vcmask 1043456  }
   0x8   :  { %4052 = vst [vmem:[#allocation3_spill] sm:$0xff] %v2457_v37  ;;  %vm37_vm0 = vcmp.lt.s32.totalorder %v2470_v45, 17  ;;  %vm99_vm1 = vcmp.lt.s32.totalorder %v2470_v45, 16  ;;  %v3987_v63 = vperm.slane %v2499_v56, 0  ;;  %vm163_vm2 = vcmp.lt.s32.totalorder %v2470_v45, 15 }
   0x9   :  { %4056 = vst [vmem:[#allocation7_spill] sm:$0xff] %v2499_v56  ;;  %vm227_vm3 = vcmp.lt.s32.totalorder %v2470_v45, 1  ;;  %vm542_vm4 = vcmp.lt.s32.totalorder %v2470_v45, 111  ;;  %vm350_vm5 = vcmp.lt.s32.totalorder %v2470_v45, 127  ;;  %vm414_vm6 = vcmp.lt.s32.totalorder %v2470_v45, 113 }
   0xa   :  { %2172 = vset.pattern.permute.xlu2 %v3996_v5  ;;  %2170 = vset.pattern.permute.xlu1 %v3994_v6  ;;  %vm478_vm7 = vcmp.lt.s32.totalorder %v2470_v45, 112 }
   0xb   :  { %81 = vperm.xlu2 %2172, %v48_v2   ;;  %61 = vperm.xlu1 %2170, %v48_v2   ;;  %v3986_v2 = vperm.slane %v2499_v56, 1 }
   0xc   :  { %v27_v7 = vld.sshfl [vmem:[#allocation1] sm:$0xff pattern:$0x75316420]  ;;  %v28_v8 = vld.sshfl [vmem:[#allocation1 + $0x8] sm:$0xff pattern:$0x75316420] }
   0xd   :  { %31 = vrot.lane.b32.xlu0 %v27_v7, %s2297_s25  ;;  %90 = vst [vmem:[#allocation1] ss:$2 sm:$0xff] %v2351_v4 }
  0x13   :  { %2173 = vset.pattern.permute.xlu2 %v3992_v1  ;;  %2174 = vset.pattern.permute.xlu1 %v3990_v0 }
  0x14   :  { %v92_v10 = vld.sshfl [vmem:[#allocation1 + $0x8] sm:$0xff pattern:$0x75316420]  ;;  %v91_v11 = vld.sshfl [vmem:[#allocation1] sm:$0xff pattern:$0x75316420]  ;;  %115 = vperm.xlu2 %2173, %v2362_v9  }
  0x15   :  { %33 = vrot.lane.b32.xlu0 %v28_v8, %s2297_s25  ;;  %154 = vst [vmem:[#allocation1] ss:$2 sm:$0xff] %v2351_v4  ;;  %97 = vrot.lane.b32.xlu1 %v92_v10, %s2298_s28 }
  0x1c   :  { %v155_v12 = vld.sshfl [vmem:[#allocation1] sm:$0xff pattern:$0x75316420]  ;;  %v156_v13 = vld.sshfl [vmem:[#allocation1 + $0x8] sm:$0xff pattern:$0x75316420]  ;;  %2175 = vset.pattern.permute.xlu2 %v3996_v5 }
  0x1d   :  { %95 = vrot.lane.b32.xlu0 %v91_v11, %s2298_s28  ;;  %218 = vst [vmem:[#allocation1] ss:$2 sm:$0xff] %v2351_v4  ;;  %135 = vperm.xlu1 %2174, %v2362_v9  }
  0x1e   :  { %145 = vperm.xlu2 %2175, %v2362_v9  }
  0x24   :  { %v220_v14 = vld.sshfl [vmem:[#allocation1 + $0x8] sm:$0xff pattern:$0x75316420]  ;;  %v219_v15 = vld.sshfl [vmem:[#allocation1] sm:$0xff pattern:$0x75316420] }
  0x25   :  { %225 = vrot.lane.b32.xlu0 %v220_v14, %s2299_s29  ;;  %341 = vst [vmem:[#allocation1] ss:$2 sm:$0xff] %v2351_v4  ;;  %159 = vrot.lane.b32.xlu1 %v155_v12, %s2300_s30 }
  0x26   :  { %161 = vrot.lane.b32.xlu2 %v156_v13, %s2300_s30  ;;  %2176 = vset.pattern.permute.xlu1 %v3994_v6 }
  0x27   :  { %2177 = vset.pattern.permute.xlu2 %v3990_v0 }
  0x2c   :  { %v342_v18 = vld.sshfl [vmem:[#allocation1] sm:$0xff pattern:$0x75316420]  ;;  %v343_v19 = vld.sshfl [vmem:[#allocation1 + $0x8] sm:$0xff pattern:$0x75316420] }
  0x2d   :  { %328 = vperm.xlu0 %2185, %v2115_v16   ;;  %405 = vst [vmem:[#allocation1] ss:$2 sm:$0xff] %v2351_v4  ;;  %189 = vperm.xlu1 %2176, %v2112_v17  }
  0x2e   :  { %199 = vperm.xlu2 %2177, %v2112_v17  }
  0x34   :  { %v406_v20 = vld.sshfl [vmem:[#allocation1] sm:$0xff pattern:$0x75316420]  ;;  %v407_v21 = vld.sshfl [vmem:[#allocation1 + $0x8] sm:$0xff pattern:$0x75316420] }
  0x35   :  { %2186 = vset.pattern.permute.xlu0 %v3992_v1  ;;  %469 = vst [vmem:[#allocation1] ss:$2 sm:$0xff] %v2351_v4  ;;  %2178 = vset.pattern.permute.xlu1 %v3996_v5 }
  0x36   :  { %179 = vperm.xlu0 %2186, %v2112_v17   ;;  %223 = vrot.lane.b32.xlu2 %v219_v15, %s2299_s29 }
  0x37   :  { %209 = vperm.xlu1 %2178, %v2112_v17   ;;  %2180 = vset.pattern.permute.xlu2 %v3994_v6 }
  0x3c   :  { %v2401_v24 = vld.sshfl [vmem:[#allocation1] sm:$0xff pattern:$0x75316420]  ;;  %v2403_v25 = vld.sshfl [vmem:[#allocation1 + $0x8] sm:$0xff pattern:$0x75316420] }
  0x3d   :  { %533 = vst [vmem:[#allocation1] ss:$2 sm:$0xff] %v2351_v4 }
  0x3e   :  { %494 = vperm.xlu0 %2186, %v2396_v22   ;;  %253 = vperm.xlu2 %2180, %v2114_v23  }
  0x3f   :  { %2179 = vset.pattern.permute.xlu1 %v3992_v1 }
  0x40   :  { %243 = vperm.xlu1 %2179, %v2114_v23  }
  0x44   :  { %v535_v27 = vld.sshfl [vmem:[#allocation1 + $0x8] sm:$0xff pattern:$0x75316420]  ;;  %v2441_v33 = vld.sshfl [vmem:[#allocation1] sm:$0xff pattern:$0x75316420] }
  0x45   :  { %1066 = vst [vmem:[#allocation1] ss:$2 sm:$0xff] %v2348_v3 }
  0x46   :  { %2193 = vset.pattern.permute.xlu0 %v3990_v0  ;;  %2182 = vset.pattern.permute.xlu2 %v3992_v1 }
  0x47   :  { %263 = vperm.xlu0 %2193, %v2114_v23   ;;  %286 = vperm.xlu2 %2182, %v2115_v16  }
  0x48   :  { %2181 = vset.pattern.permute.xlu1 %v3996_v5 }
  0x49   :  { %273 = vperm.xlu1 %2181, %v2114_v23  }
  0x4c   :  { %v2463_v39 = vld.sshfl [vmem:[#allocation1] sm:$0xff pattern:$0x75316420]  ;;  %v2465_v40 = vld.sshfl [vmem:[#allocation1 + $0x8] sm:$0xff pattern:$0x75316420] }
  0x4d   :  { %4053 = vst [vmem:[#allocation4_spill] sm:$0xff] %v2463_v39 }
  0x4e   :  { %4054 = vst [vmem:[#allocation5_spill] sm:$0xff] %v2465_v40 }
  0x4f   :  { %386 = vperm.xlu0 %2193, %v2117_v26   ;;  %2184 = vset.pattern.permute.xlu2 %v3990_v0  ;;  %1084 = vst [vmem:[#allocation1] ss:$2 sm:$0xff] %v2457_v37 }
  0x50   :  { %314 = vperm.xlu2 %2184, %v2115_v16  }
  0x51   :  { %2183 = vset.pattern.permute.xlu1 %v3994_v6 }
  0x52   :  { %300 = vperm.xlu1 %2183, %v2115_v16  }
  0x57   :  { %540 = vrot.lane.b32.xlu0 %v535_v27, %s2301_s17 }
  0x58   :  { %348 = vrot.lane.b32.xlu2 %v343_v19, %s2302_s18 }
  0x59   :  { %2188 = vset.pattern.permute.xlu2 %v3994_v6 }
  0x5a   :  { %346 = vrot.lane.b32.xlu1 %v342_v18, %s2302_s18 }
  0x5b   :  { %2187 = vset.pattern.permute.xlu1 %v3992_v1 }
  0x5c   :  { %v2426_v29 = vpop.permute.xlu2 %71 }
  0x5f   :  { %578 = vperm.xlu0 %2193, %v2424_v28  }
  0x60   :  { %376 = vperm.xlu2 %2188, %v2117_v26  }
  0x62   :  { %366 = vperm.xlu1 %2187, %v2117_v26  }
  0x65   :  { %v2429_v30 = vpop.permute.xlu2 %81 }
  0x67   :  { %2199 = vset.pattern.permute.xlu0 %v3994_v6 }
  0x68   :  { %125 = vperm.xlu0 %2199, %v2362_v9   ;;  %410 = vrot.lane.b32.xlu2 %v406_v20, %s2303_s21 }
  0x69   :  { %2190 = vset.pattern.permute.xlu2 %v3992_v1 }
  0x6a   :  { %2189 = vset.pattern.permute.xlu1 %v3996_v5 }
  0x6b   :  { %396 = vperm.xlu1 %2189, %v2117_v26  }
  0x6e   :  { %v2439_v32 = vpop.permute.xlu2 %115 }
  0x70   :  { %440 = vperm.xlu0 %2199, %v2119_v31   ;;  %430 = vperm.xlu2 %2190, %v2119_v31  }
  0x73   :  { %412 = vrot.lane.b32.xlu1 %v407_v21, %s2303_s21 }
  0x74   :  { %2191 = vset.pattern.permute.xlu1 %v3990_v0  ;;  %v52_v35 = vpop.permute.xlu1 %51 }
  0x78   :  { %730 = vperm.xlu0 %2199, %v2454_v36   ;;  %v2460_v38 = vpop.permute.xlu2 %145  ;;  %2192 = vset.pattern.permute.xlu2 %v3996_v5 }
  0x79   :  { %460 = vperm.xlu2 %2192, %v2119_v31  }
  0x7b   :  { %450 = vperm.xlu1 %2191, %v2119_v31  }
  0x7d   :  { %v62_v42 = vpop.permute.xlu1 %61 }
  0x7f   :  { %v32_v43 = vpop.permute.xlu0 %31 }
  0x80   :  { %v2468_v44 = vpop.permute.xlu2 %161 }
  0x81   :  { %476 = vrot.lane.b32.xlu2 %v2403_v25, %s2304_s5 }
  0x82   :  { %2195 = vset.pattern.permute.xlu2 %v3990_v0 }
  0x83   :  { %474 = vrot.lane.b32.xlu1 %v2401_v24, %s2304_s5 }
  0x84   :  { %2194 = vset.pattern.permute.xlu1 %v3994_v6 }
  0x87   :  { %v34_v49 = vpop.permute.xlu0 %33  ;;  %v98_v52 = vpop.permute.xlu1 %97 }
  0x88   :  { %v38_v50 = vsel %vm37_vm0, %v32_v43, %v34_v49  ;;  %v39_v51 = vsel %vm37_vm0, %v34_v49, %v32_v43  ;;  %v2490_v53 = vpop.permute.xlu2 %199 }
  0x89   :  { %v46_v54 = vmul.f32 %v3989_v47, %v39_v51  ;;  %v47_v55 = vmul.f32 %v3988_v48, %v38_v50  ;;  %514 = vperm.xlu2 %2195, %v2396_v22  }
  0x8b   :  { %v54_v57 = vperm.slane %v46_v54, 0  ;;  %v55_v58 = vperm.slane %v47_v55, 0  ;;  %v64_v59 = vperm.slane %v46_v54, 1  ;;  %v65_v60 = vperm.slane %v47_v55, 1  ;;  %504 = vperm.xlu1 %2194, %v2396_v22  }
  0x8c   :  { %v74_v61 = vperm.slane %v46_v54, 2  ;;  %v75_v62 = vperm.slane %v47_v55, 2  ;;  %v84_v10 = vperm.slane %v46_v54, 3  ;;  %v85_v11 = vperm.slane %v47_v55, 3 }
  0x8d   :  { %v56_v3 = vmul.f32 %v54_v57, %v52_v35  ;;  %v57_v7 = vmul.f32 %v55_v58, %v52_v35  ;;  %v66_v8 = vmul.f32 %v64_v59, %v62_v42  ;;  %v67_v9 = vmul.f32 %v65_v60, %v62_v42 }
  0x8e   :  { %v76_v18 = vmul.f32 %v74_v61, %v2426_v29  ;;  %v77_v19 = vmul.f32 %v75_v62, %v2426_v29  ;;  %v86_v26 = vmul.f32 %v84_v10, %v2429_v30  ;;  %v87_v27 = vmul.f32 %v85_v11, %v2429_v30 }
  0x8f   :  { %v96_v12 = vpop.permute.xlu0 %95  ;;  %v68_v13 = vadd.f32 %v66_v8, %v56_v3  ;;  %v69_v14 = vadd.f32 %v67_v9, %v57_v7  ;;  %v2510_v17 = vpop.permute.xlu1 %135 }
  0x90   :  { %v100_v15 = vsel %vm99_vm1, %v96_v12, %v98_v52  ;;  %v101_v16 = vsel %vm99_vm1, %v98_v52, %v96_v12  ;;  %v2522_v23 = vpop.permute.xlu2 %223 }
  0x91   :  { %v2516_v20 = vmul.f32 %v3987_v63, %v101_v16  ;;  %v2520_v21 = vmul.f32 %v3986_v2, %v100_v15  ;;  %538 = vrot.lane.b32.xlu2 %v2441_v33, %s2301_s17  ;;  %v78_v24 = vadd.f32 %v76_v18, %v68_v13  ;;  %v79_v25 = vadd.f32 %v77_v19, %v69_v14  ;;  %v2595_v14 = vld [vmem:[%s3982_s0 + $0x4] sm:$0x3]  ;;  %v2601_v15 = vld [vmem:[%s3982_s0 + $0x6] sm:$0x3] }
  0x92   :  { %2198 = vset.pattern.permute.xlu2 %v3994_v6  ;;  %4057 = vst [vmem:[#allocation8_spill] sm:$0xff] %v2595_v14  ;;  %v331_v16 = vperm.slane %v2351_v4, 3 }
  0x93   :  { %2196 = vset.pattern.permute.xlu1 %v3996_v5  ;;  %v118_v29 = vperm.slane %v2516_v20, 0  ;;  %v119_v31 = vperm.slane %v2520_v21, 0  ;;  %v88_v35 = vadd.f32 %v86_v26, %v78_v24  ;;  %v89_v41 = vadd.f32 %v87_v27, %v79_v25  ;;  %4058 = vst [vmem:[#allocation9_spill] sm:$0xff] %v2601_v15 }
  0x94   :  { %524 = vperm.xlu1 %2196, %v2396_v22   ;;  %v3998_v24 = vperm.slane %v2595_v14, 0  ;;  %v3999_v25 = vperm.slane %v2595_v14, 1  ;;  %v138_v2 = vperm.slane %v2516_v20, 2  ;;  %v139_v63 = vperm.slane %v2520_v21, 2 }
  0x95   :  { %v120_v33 = vmul.f32 %v118_v29, %v2439_v32  ;;  %v121_v42 = vmul.f32 %v119_v31, %v2439_v32  ;;  %v597_v32 = vld [vmem:[%s3983_s2] sm:$0xf]  ;;  %v128_v48 = vperm.slane %v2516_v20, 1  ;;  %v129_v47 = vperm.slane %v2520_v21, 1 }
  0x96   :  { %v140_v39 = vmul.f32 %v138_v2, %v2510_v17 }
  0x97   :  { %v2535_v43 = vpop.permute.xlu0 %225  ;;  %v160_v49 = vpop.permute.xlu1 %159  ;;  %v2537_v50 = vadd.f32 %v120_v33, %v88_v35  ;;  %v2539_v22 = vadd.f32 %v121_v42, %v89_v41  ;;  %v2620_v41 = vperm.slane %v331_v16, 3  ;;  %v289_v33 = vperm.slane %v2351_v4, 0 }
  0x98   :  { %v2541_v51 = vpop.permute.xlu2 %253  ;;  %v165_v26 = vsel %vm163_vm2, %v2468_v44, %v160_v49  ;;  %v164_v35 = vsel %vm163_vm2, %v160_v49, %v2468_v44  ;;  %v290_v42 = vperm.slane %v2351_v4, 4  ;;  %v148_v44 = vperm.slane %v2516_v20, 3 }
  0x99   :  { %568 = vperm.xlu2 %2198, %v2424_v28   ;;  %v149_v49 = vperm.slane %v2520_v21, 3  ;;  %v173_v16 = vmul.f32 %v3998_v24, %v165_v26  ;;  %v2649_v21 = vperm.slane %v289_v33, 0  ;;  %v317_v26 = vperm.slane %v2351_v4, 2 }
  0x9a   :  { %v2651_v29 = vperm.slane %v290_v42, 0  ;;  %v318_v24 = vperm.slane %v2351_v4, 6  ;;  %v150_v40 = vmul.f32 %v148_v44, %v2460_v38 }
  0x9b   :  { %v182_v42 = vperm.slane %v173_v16, 0 }
  0x9c   :  { %2197 = vset.pattern.permute.xlu1 %v3992_v1 }
  0x9d   :  { %558 = vperm.xlu1 %2197, %v2424_v28  }
  0x9f   :  { %v2546_v30 = vpop.permute.xlu0 %328  ;;  %v2548_v52 = vpop.permute.xlu1 %189 }
  0xa1   :  { %v2553_v54 = vpop.permute.xlu2 %286  ;;  %2201 = vset.pattern.permute.xlu2 %v3992_v1  ;;  %v174_v1 = vmul.f32 %v3999_v25, %v164_v35  ;;  %v141_v35 = vmul.f32 %v139_v63, %v2510_v17  ;;  %v151_v17 = vmul.f32 %v149_v49, %v2460_v38  ;;  %v2681_v38 = vperm.slane %v318_v24, 2 }
  0xa2   :  { %600 = vperm.xlu2 %2201, %v597_v32   ;;  %v2627_v32 = vld [vmem:[%s3981_s3] sm:$0xf]  ;;  %v212_v24 = vperm.slane %v173_v16, 3 }
  0xa3   :  { %v183_v2 = vperm.slane %v174_v1, 0  ;;  %v193_v14 = vperm.slane %v174_v1, 1 }
  0xa5   :  { %2200 = vset.pattern.permute.xlu1 %v3996_v5 }
  0xa6   :  { %588 = vperm.xlu1 %2200, %v2424_v28  }
  0xa8   :  { %v2558_v55 = vpop.permute.xlu0 %179 }
  0xa9   :  { %v2560_v57 = vpop.permute.xlu1 %209 }
  0xaa   :  { %v2562_v58 = vpop.permute.xlu2 %314  ;;  %2203 = vset.pattern.permute.xlu2 %v3990_v0  ;;  %v228_v0 = vsel %vm227_vm3, %v2522_v23, %v2535_v43 }
  0xab   :  { %638 = vperm.xlu2 %2203, %v2627_v32  }
  0xae   :  { %2202 = vset.pattern.permute.xlu1 %v3994_v6  ;;  %v229_v6 = vsel %vm227_vm3, %v2535_v43, %v2522_v23 }
  0xaf   :  { %628 = vperm.xlu1 %2202, %v2627_v32  }
  0xb0   :  { %v2566_v59 = vpop.permute.xlu0 %494 }
  0xb2   :  { %v2568_v60 = vpop.permute.xlu1 %243  ;;  %v2570_v61 = vpop.permute.xlu2 %348 }
  0xb9   :  { %v2572_v62 = vpop.permute.xlu0 %263 }
  0xba   :  { %v2576_v28 = vpop.permute.xlu2 %376 }
  0xbb   :  { %v2574_v3 = vpop.permute.xlu1 %273 }
  0xc1   :  { %v2578_v7 = vpop.permute.xlu0 %386 }
  0xc2   :  { %v2580_v8 = vpop.permute.xlu2 %410 }
  0xc4   :  { %v2582_v9 = vpop.permute.xlu1 %300 }
  0xc9   :  { %v2584_v10 = vpop.permute.xlu0 %540 }
  0xca   :  { %v2586_v11 = vpop.permute.xlu2 %430 }
  0xcc   :  { %v2588_v12 = vpop.permute.xlu1 %346 }
  0xd1   :  { %v2590_v13 = vpop.permute.xlu0 %578 }
  0xd3   :  { %v2604_v18 = vpop.permute.xlu2 %460 }
  0xd4   :  { %v2606_v19 = vpop.permute.xlu1 %366 }
  0xda   :  { %v126_v31 = vpop.permute.xlu0 %125 }
  0xdb   :  { %v130_v20 = vmul.f32 %v128_v48, %v126_v31  ;;  %v131_v5 = vmul.f32 %v129_v47, %v126_v31  ;;  %v2655_v27 = vpop.permute.xlu2 %476  ;;  %v4059_v47 = vperm.slane %v2601_v15, 0  ;;  %v4060_v31 = vperm.slane %v2601_v15, 1 }
  0xdd   :  { %v132_v25 = vadd.f32 %v130_v20, %v2537_v50  ;;  %v133_v23 = vadd.f32 %v131_v5, %v2539_v22  ;;  %v2661_v48 = vpop.permute.xlu1 %396  ;;  %v2665_v43 = vmul.f32 %v4059_v47, %v229_v6  ;;  %v2669_v33 = vmul.f32 %v4060_v31, %v228_v0 }
  0xde   :  { %v202_v50 = vperm.slane %v173_v16, 2  ;;  %v203_v5 = vperm.slane %v174_v1, 2  ;;  %v192_v22 = vperm.slane %v173_v16, 1  ;;  %v184_v20 = vmul.f32 %v182_v42, %v2558_v55 }
  0xdf   :  { %v142_v34 = vadd.f32 %v140_v39, %v132_v25  ;;  %v143_v63 = vadd.f32 %v141_v35, %v133_v23  ;;  %v185_v6 = vmul.f32 %v183_v2, %v2558_v55  ;;  %v4061_v0 = vmov 3  }
  0xe0   :  { %2204 = vset.pattern.permute.xlu1 %v4061_v0  ;;  %v4062_v31 = vmov 1   ;;  %v256_v44 = vperm.slane %v2665_v43, 1  ;;  %v257_v39 = vperm.slane %v2669_v33, 1  ;;  %v2679_v25 = vperm.slane %v317_v26, 2 }
  0xe1   :  { %v152_v47 = vadd.f32 %v150_v40, %v142_v34  ;;  %v153_v15 = vadd.f32 %v151_v17, %v143_v63  ;;  %2206 = vset.pattern.permute.xlu2 %v4062_v31  ;;  %648 = vperm.xlu1 %2204, %v2627_v32   ;;  %v194_v49 = vmul.f32 %v192_v22, %v2548_v52  ;;  %v246_v42 = vperm.slane %v2665_v43, 0 }
  0xe2   :  { %v195_v55 = vmul.f32 %v193_v14, %v2548_v52  ;;  %v204_v35 = vmul.f32 %v202_v50, %v2490_v53  ;;  %v205_v23 = vmul.f32 %v203_v5, %v2490_v53  ;;  %v247_v2 = vperm.slane %v2669_v33, 0 }
  0xe3   :  { %v186_v34 = vadd.f32 %v184_v20, %v152_v47  ;;  %v187_v40 = vadd.f32 %v185_v6, %v153_v15  ;;  %v2690_v26 = vpop.permute.xlu2 %514  ;;  %v213_v63 = vperm.slane %v174_v1, 3  ;;  %v258_v52 = vmul.f32 %v256_v44, %v2541_v51  ;;  %v2703_v1 = vld [vmem:[%s3982_s0 + $0x10] sm:$0x3] }
  0xe4   :  { %v259_v14 = vmul.f32 %v257_v39, %v2541_v51  ;;  %v303_v15 = vperm.slane %v2351_v4, 1  ;;  %v304_v53 = vperm.slane %v2351_v4, 5  ;;  %v214_v50 = vmul.f32 %v212_v24, %v2560_v57  ;;  %4063 = vst [vmem:[#allocation10_spill] sm:$0xff] %v2703_v1 }
  0xe5   :  { %v196_v17 = vadd.f32 %v194_v49, %v186_v34  ;;  %v197_v56 = vadd.f32 %v195_v55, %v187_v40  ;;  %v2692_v46 = vpop.permute.xlu1 %412  ;;  %v215_v5 = vmul.f32 %v213_v63, %v2560_v57  ;;  %v266_v16 = vperm.slane %v2665_v43, 2 }
  0xe6   :  { %v267_v6 = vperm.slane %v2669_v33, 2  ;;  %v276_v51 = vperm.slane %v2665_v43, 3  ;;  %v277_v47 = vperm.slane %v2669_v33, 3  ;;  %v248_v44 = vmul.f32 %v246_v42, %v2568_v60 }
  0xe7   :  { %v206_v22 = vadd.f32 %v204_v35, %v196_v17  ;;  %v207_v20 = vadd.f32 %v205_v23, %v197_v56  ;;  %v249_v39 = vmul.f32 %v247_v2, %v2568_v60  ;;  %v2714_v56 = vld [vmem:[%s3982_s0 + $0xa] sm:$0x3]  ;;  %v307_v55 = vperm.slane %v303_v15, 1  ;;  %v2723_v60 = vld [vmem:[%s3981_s3 + $0x4] sm:$0xf] }
  0xe8   :  { %v4010_v34 = vperm.slane %v2703_v1, 0  ;;  %v4009_v43 = vperm.slane %v2703_v1, 1  ;;  %v4064_v40 = vmov 0   ;;  %v308_v33 = vperm.slane %v304_v53, 1  ;;  %679 = vperm.xlu2 %2206, %v2723_v60  }
  0xe9   :  { %v216_v57 = vadd.f32 %v214_v50, %v206_v22  ;;  %v217_v49 = vadd.f32 %v215_v5, %v207_v20  ;;  %2205 = vset.pattern.permute.xlu1 %v4064_v40  ;;  %v268_v42 = vmul.f32 %v266_v16, %v2572_v62  ;;  %v269_v2 = vmul.f32 %v267_v6, %v2572_v62 }
  0xea   :  { %v4014_v24 = vperm.slane %v2714_v56, 0  ;;  %v4013_v63 = vperm.slane %v2714_v56, 1  ;;  %669 = vperm.xlu1 %2205, %v2723_v60   ;;  %v278_v62 = vmul.f32 %v276_v51, %v2574_v3  ;;  %v279_v20 = vmul.f32 %v277_v47, %v2574_v3 }
  0xeb   :  { %v250_v35 = vadd.f32 %v248_v44, %v216_v57  ;;  %v251_v23 = vadd.f32 %v249_v39, %v217_v49  ;;  %v539_v17 = vpop.permute.xlu2 %538  ;;  %v4065_v51 = vperm.slane %v2351_v4, 7  ;;  %v295_v44 = vmul.f32 %v2649_v21, %v2553_v54  ;;  %v2772_v4 = vld [vmem:[%s3982_s0 + $0xc] sm:$0x3] }
  0xec   :  { %v543_v53 = vsel %vm542_vm4, %v539_v17, %v2584_v10  ;;  %v544_v5 = vsel %vm542_vm4, %v2584_v10, %v539_v17  ;;  %v352_v10 = vsel %vm350_vm5, %v2570_v61, %v2588_v12  ;;  %v296_v39 = vmul.f32 %v2651_v29, %v2553_v54 }
  0xed   :  { %v260_v15 = vadd.f32 %v258_v52, %v250_v35  ;;  %v261_v50 = vadd.f32 %v259_v14, %v251_v23  ;;  %v2738_v22 = vpop.permute.xlu1 %450  ;;  %v2744_v16 = vmul.f32 %v4010_v34, %v543_v53  ;;  %v2748_v52 = vmul.f32 %v4009_v43, %v544_v5 }
  0xee   :  { %v351_v14 = vsel %vm350_vm5, %v2588_v12, %v2570_v61  ;;  %v336_v47 = vperm.slane %v4065_v51, 3  ;;  %v323_v57 = vmul.f32 %v2679_v25, %v2562_v58  ;;  %v324_v49 = vmul.f32 %v2681_v38, %v2562_v58 }
  0xef   :  { %v270_v6 = vadd.f32 %v268_v42, %v260_v15  ;;  %v271_v3 = vadd.f32 %v269_v2, %v261_v50  ;;  %v2776_v61 = vmul.f32 %v4014_v24, %v351_v14  ;;  %v2780_v54 = vmul.f32 %v4013_v63, %v352_v10 }
  0xf0   :  { %v581_v12 = vperm.slane %v2744_v16, 2  ;;  %v582_v58 = vperm.slane %v2748_v52, 2  ;;  %v309_v29 = vmul.f32 %v307_v55, %v2582_v9  ;;  %v310_v21 = vmul.f32 %v308_v33, %v2582_v9  ;;  %2208 = vset.pattern.permute.xlu2 %v4064_v40 }
  0xf1   :  { %v280_v35 = vadd.f32 %v278_v62, %v270_v6  ;;  %v281_v23 = vadd.f32 %v279_v20, %v271_v3  ;;  %v4016_v42 = vperm.slane %v2772_v4, 0  ;;  %v4015_v2 = vperm.slane %v2772_v4, 1  ;;  %720 = vperm.xlu2 %2208, %v2454_v36  }
  0xf2   :  { %2207 = vset.pattern.permute.xlu1 %v4061_v0  ;;  %v2792_v17 = vmul.f32 %v581_v12, %v2590_v13  ;;  %v2795_v15 = vmul.f32 %v582_v58, %v2590_v13  ;;  %v415_v33 = vsel %vm414_vm6, %v2580_v8, %v2692_v46  ;;  %v416_v50 = vsel %vm414_vm6, %v2692_v46, %v2580_v8 }
  0xf3   :  { %v297_v25 = vadd.f32 %v295_v44, %v280_v35  ;;  %v298_v38 = vadd.f32 %v296_v39, %v281_v23  ;;  %699 = vperm.xlu1 %2207, %v2723_v60   ;;  %v337_v5 = vmul.f32 %v2620_v41, %v2546_v30  ;;  %v338_v13 = vmul.f32 %v336_v47, %v2546_v30  ;;  %v2827_v23 = vld [vmem:[%s3982_s0 + $0xe] sm:$0x3] }
  0xf4   :  { %v379_v62 = vperm.slane %v2776_v61, 1  ;;  %v380_v20 = vperm.slane %v2780_v54, 1  ;;  %v369_v14 = vperm.slane %v2776_v61, 0  ;;  %v370_v10 = vperm.slane %v2780_v54, 0  ;;  %4066 = vst [vmem:[#allocation11_spill] sm:$0xff] %v2827_v23 }
  0xf5   :  { %v311_v55 = vadd.f32 %v309_v29, %v297_v25  ;;  %v312_v9 = vadd.f32 %v310_v21, %v298_v38  ;;  %v475_v53 = vpop.permute.xlu1 %474  ;;  %v389_v46 = vperm.slane %v2776_v61, 2  ;;  %v390_v8 = vperm.slane %v2780_v54, 2 }
  0xf6   :  { %v424_v51 = vmul.f32 %v4016_v42, %v415_v33  ;;  %v425_v30 = vmul.f32 %v4015_v2, %v416_v50  ;;  %v371_v41 = vmul.f32 %v369_v14, %v2606_v19  ;;  %v372_v47 = vmul.f32 %v370_v10, %v2606_v19 }
  0xf7   :  { %v325_v6 = vadd.f32 %v323_v57, %v311_v55  ;;  %v326_v3 = vadd.f32 %v324_v49, %v312_v9  ;;  %v381_v35 = vmul.f32 %v379_v62, %v2576_v28  ;;  %v399_v57 = vperm.slane %v2776_v61, 3 }
  0xf8   :  { %v400_v49 = vperm.slane %v2780_v54, 3  ;;  %v382_v29 = vmul.f32 %v380_v20, %v2576_v28  ;;  %v391_v19 = vmul.f32 %v389_v46, %v2578_v7  ;;  %v392_v21 = vmul.f32 %v390_v8, %v2578_v7 }
  0xf9   :  { %v339_v44 = vadd.f32 %v337_v5, %v325_v6  ;;  %v340_v39 = vadd.f32 %v338_v13, %v326_v3  ;;  %v433_v25 = vperm.slane %v424_v51, 0  ;;  %v434_v38 = vperm.slane %v425_v30, 0  ;;  %2210 = vset.pattern.permute.xlu2 %v4061_v0 }
  0xfa   :  { %v4012_v55 = vperm.slane %v2827_v23, 0  ;;  %v4011_v9 = vperm.slane %v2827_v23, 1  ;;  %v4067_v50 = vmov 2   ;;  %750 = vperm.xlu2 %2210, %v2454_v36   ;;  %v443_v28 = vperm.slane %v424_v51, 1 }
  0xfb   :  { %v373_v12 = vadd.f32 %v371_v41, %v339_v44  ;;  %v374_v58 = vadd.f32 %v372_v47, %v340_v39  ;;  %2209 = vset.pattern.permute.xlu1 %v4067_v50  ;;  %v444_v5 = vperm.slane %v425_v30, 1  ;;  %v479_v7 = vsel %vm478_vm7, %v475_v53, %v2655_v27  ;;  %v441_v41 = vpop.permute.xlu0 %440 }
  0xfc   :  { %v480_v13 = vsel %vm478_vm7, %v2655_v27, %v475_v53  ;;  %740 = vperm.xlu1 %2209, %v2454_v36   ;;  %v401_v14 = vmul.f32 %v399_v57, %v2661_v48  ;;  %v402_v10 = vmul.f32 %v400_v49, %v2661_v48  ;;  %v435_v6 = vmul.f32 %v433_v25, %v2586_v11 }
  0xfd   :  { %v383_v61 = vadd.f32 %v381_v35, %v373_v12  ;;  %v384_v54 = vadd.f32 %v382_v29, %v374_v58  ;;  %v505_v33 = vpop.permute.xlu1 %504  ;;  %v436_v3 = vmul.f32 %v434_v38, %v2586_v11  ;;  %v488_v47 = vmul.f32 %v4012_v55, %v479_v7 }
  0xfe   :  { %v489_v27 = vmul.f32 %v4011_v9, %v480_v13  ;;  %v445_v36 = vmul.f32 %v443_v28, %v441_v41  ;;  %v446_v53 = vmul.f32 %v444_v5, %v441_v41  ;;  %v453_v44 = vperm.slane %v424_v51, 2 }
  0xff   :  { %v393_v62 = vadd.f32 %v391_v19, %v383_v61  ;;  %v394_v20 = vadd.f32 %v392_v21, %v384_v54  ;;  %v454_v39 = vperm.slane %v425_v30, 2  ;;  %v463_v48 = vperm.slane %v424_v51, 3 }
 0x100   :  { %v464_v49 = vperm.slane %v425_v30, 3  ;;  %v455_v12 = vmul.f32 %v453_v44, %v2738_v22  ;;  %v497_v19 = vperm.slane %v488_v47, 0  ;;  %v498_v21 = vperm.slane %v489_v27, 0 }
 0x101   :  { %v403_v46 = vadd.f32 %v401_v14, %v393_v62  ;;  %v404_v8 = vadd.f32 %v402_v10, %v394_v20  ;;  %v456_v11 = vmul.f32 %v454_v39, %v2738_v22  ;;  %v465_v54 = vmul.f32 %v463_v48, %v2604_v18 }
 0x102   :  { %2212 = vset.pattern.permute.xlu2 %v4067_v50  ;;  %v466_v51 = vmul.f32 %v464_v49, %v2604_v18  ;;  %v507_v30 = vperm.slane %v488_v47, 1  ;;  %v508_v28 = vperm.slane %v489_v27, 1  ;;  %v517_v5 = vperm.slane %v488_v47, 2 }
 0x103   :  { %v437_v35 = vadd.f32 %v435_v6, %v403_v46  ;;  %v438_v57 = vadd.f32 %v436_v3, %v404_v8  ;;  %v518_v7 = vperm.slane %v489_v27, 2  ;;  %v499_v62 = vmul.f32 %v497_v19, %v2566_v59 }
 0x104   :  { %2211 = vset.pattern.permute.xlu1 %v4062_v31  ;;  %v500_v20 = vmul.f32 %v498_v21, %v2566_v59  ;;  %v509_v6 = vmul.f32 %v507_v30, %v505_v33  ;;  %v510_v3 = vmul.f32 %v508_v28, %v505_v33  ;;  %v519_v46 = vmul.f32 %v517_v5, %v2690_v26 }
 0x105   :  { %v447_v58 = vadd.f32 %v445_v36, %v437_v35  ;;  %v448_v29 = vadd.f32 %v446_v53, %v438_v57  ;;  %v520_v8 = vmul.f32 %v518_v7, %v2690_v26  ;;  %v527_v36 = vperm.slane %v488_v47, 3 }
 0x106   :  { %v525_v25 = vpop.permute.xlu1 %524  ;;  %v528_v53 = vperm.slane %v489_v27, 3  ;;  %v561_v44 = vperm.slane %v2744_v16, 0  ;;  %v562_v39 = vperm.slane %v2748_v52, 0  ;;  %v571_v33 = vperm.slane %v2744_v16, 1 }
 0x107   :  { %v457_v38 = vadd.f32 %v455_v12, %v447_v58  ;;  %v458_v61 = vadd.f32 %v456_v11, %v448_v29  ;;  %v529_v48 = vmul.f32 %v527_v36, %v525_v25  ;;  %v569_v12 = vpop.permute.xlu2 %568  ;;  %v572_v11 = vperm.slane %v2748_v52, 1 }
 0x108   :  { %v530_v59 = vmul.f32 %v528_v53, %v525_v25  ;;  %v573_v47 = vmul.f32 %v571_v33, %v569_v12  ;;  %v592_v25 = vperm.slane %v2748_v52, 3  ;;  %v2128_v53 = vld [vmem:[%s3981_s3 + $0x14] sm:$0xf] }
 0x109   :  { %v467_v22 = vadd.f32 %v465_v54, %v457_v38  ;;  %v468_v13 = vadd.f32 %v466_v51, %v458_v61  ;;  %v574_v27 = vmul.f32 %v572_v11, %v569_v12  ;;  %v591_v51 = vperm.slane %v2744_v16, 3 }
 0x10b   :  { %v501_v14 = vadd.f32 %v499_v62, %v467_v22  ;;  %v502_v10 = vadd.f32 %v500_v20, %v468_v13  ;;  %v1085_v62 = vld.sshfl [vmem:[#allocation1] sm:$0xff pattern:$0x75316420]  ;;  %v2871_v20 = vld.sshfl [vmem:[#allocation1 + $0x8] sm:$0xff pattern:$0x75316420] }
 0x10c   :  { %1145 = vst [vmem:[#allocation1] ss:$2 sm:$0xff] %v2457_v37 }
 0x10d   :  { %v511_v41 = vadd.f32 %v509_v6, %v501_v14  ;;  %v512_v18 = vadd.f32 %v510_v3, %v502_v10 }
 0x10f   :  { %v521_v35 = vadd.f32 %v519_v46, %v511_v41  ;;  %v522_v57 = vadd.f32 %v520_v8, %v512_v18  ;;  %v559_v49 = vpop.permute.xlu1 %558  ;;  %v601_v13 = vpop.permute.xlu2 %600  ;;  %v2127_v46 = vld [vmem:[%s3981_s3 + $0x10] sm:$0xf]  ;;  %v2905_v8 = vld [vmem:[%s3981_s3 + $0x1c] sm:$0xf]  ;;  %v2126_v41 = vld [vmem:[%s3981_s3 + $0xc] sm:$0xf] }
 0x110   :  { %v563_v29 = vmul.f32 %v561_v44, %v559_v49  ;;  %v564_v19 = vmul.f32 %v562_v39, %v559_v49  ;;  %v2918_v18 = vld [vmem:[%s3979_s1] sm:$0xf] }
 0x111   :  { %v531_v58 = vadd.f32 %v529_v48, %v521_v35  ;;  %v532_v26 = vadd.f32 %v530_v59, %v522_v57  ;;  %v2131_v39 = vld [vmem:[%s3981_s3 + $0x20] sm:$0xf]  ;;  %v2129_v57 = vld [vmem:[%s3981_s3 + $0x18] sm:$0xf]  ;;  %v2959_v59 = vld [vmem:[%s3979_s1 + $0x4] sm:$0xf] }
 0x113   :  { %v565_v21 = vadd.f32 %v563_v29, %v531_v58  ;;  %v566_v38 = vadd.f32 %v564_v19, %v532_v26  ;;  %v2978_v58 = vld [vmem:[%s3979_s1 + $0x18] sm:$0xf] }
 0x114   :  { %4068 = vst [vmem:[#allocation12_spill] sm:$0xff] %v2978_v58 }
 0x115   :  { %v575_v61 = vadd.f32 %v573_v47, %v565_v21  ;;  %v576_v54 = vadd.f32 %v574_v27, %v566_v38  ;;  %v2991_v47 = vpop.permute.xlu0 %730 }
 0x117   :  { %v585_v30 = vadd.f32 %v2792_v17, %v575_v61  ;;  %v586_v28 = vadd.f32 %v2795_v15, %v576_v54  ;;  %v2884_v17 = vld.sshfl [vmem:[#allocation1] sm:$0xff pattern:$0x75316420]  ;;  %v2886_v15 = vld.sshfl [vmem:[#allocation1 + $0x8] sm:$0xff pattern:$0x75316420]  ;;  %v2926_v36 = vpop.permute.xlu2 %638 }
 0x118   :  { %v589_v5 = vpop.permute.xlu1 %588  ;;  %1206 = vst [vmem:[#allocation1] ss:$2 sm:$0xff] %v2457_v37 }
 0x119   :  { %v593_v7 = vmul.f32 %v591_v51, %v589_v5  ;;  %v594_v22 = vmul.f32 %v592_v25, %v589_v5 }
 0x11b   :  { %v595_v14 = vadd.f32 %v593_v7, %v585_v30  ;;  %v596_v10 = vadd.f32 %v594_v22, %v586_v28  ;;  %v1057_v30 = vld [vmem:[%s3984_s4] sm:$0xf] }
 0x11d   :  { %v603_v6 = vadd.f32 %v601_v13, %v595_v14  ;;  %v604_v3 = vadd.f32 %v601_v13, %v596_v10 }
 0x11f   :  { %v2874_v16 = vmax.f32 %v603_v6, 0.0  ;;  %v2876_v52 = vmax.f32 %v604_v3, 0.0  ;;  %v1208_v33 = vld.sshfl [vmem:[#allocation1 + $0x8] sm:$0xff pattern:$0x75316420] }
 0x121   :  { %659 = vrot.lane.b32.xlu0 %v2876_v52, %s2298_s28  ;;  %609 = vrot.lane.b32.xlu2 %v2876_v52, %s2297_s25  ;;  %v2939_v44 = vpop.permute.xlu1 %628 }
 0x122   :  { %607 = vrot.lane.b32.xlu1 %v2874_v16, %s2297_s25 }
 0x129   :  { %824 = vperm.xlu0 %2199, %v2127_v46   ;;  %657 = vrot.lane.b32.xlu2 %v2874_v16, %s2298_s28 }
 0x12a   :  { %710 = vrot.lane.b32.xlu1 %v2876_v52, %s2300_s30 }
 0x131   :  { %906 = vrot.lane.b32.xlu0 %v2876_v52, %s2303_s21  ;;  %708 = vrot.lane.b32.xlu2 %v2874_v16, %s2300_s30 }
 0x132   :  { %759 = vrot.lane.b32.xlu1 %v2874_v16, %s2299_s29 }
 0x139   :  { %977 = vperm.xlu0 %2199, %v2905_v8   ;;  %761 = vrot.lane.b32.xlu2 %v2876_v52, %s2299_s29 }
 0x13a   :  { %781 = vperm.xlu1 %2211, %v2126_v41  }
 0x141   :  { %1089 = vrot.lane.b32.xlu0 %v1085_v62, %s2297_s25  ;;  %791 = vperm.xlu2 %2212, %v2126_v41   ;;  %v2136_v62 = vld [vmem:[%s3979_s1 + $0x8] sm:$0xf] }
 0x142   :  { %2213 = vset.pattern.permute.xlu1 %v4061_v0 }
 0x143   :  { %801 = vperm.xlu1 %2213, %v2126_v41  }
 0x149   :  { %1116 = vperm.xlu0 %2199, %v2918_v18   ;;  %2214 = vset.pattern.permute.xlu2 %v4064_v40 }
 0x14a   :  { %814 = vperm.xlu2 %2214, %v2127_v46  }
 0x14b   :  { %2215 = vset.pattern.permute.xlu1 %v4067_v50 }
 0x14c   :  { %834 = vperm.xlu1 %2215, %v2127_v46  }
 0x151   :  { %2230 = vset.pattern.permute.xlu0 %v4064_v40 }
 0x152   :  { %618 = vperm.xlu0 %2230, %v2627_v32   ;;  %2216 = vset.pattern.permute.xlu2 %v4061_v0  ;;  %v2937_v32 = vpop.permute.xlu2 %679 }
 0x153   :  { %844 = vperm.xlu2 %2216, %v2127_v46   ;;  %v2952_v48 = vpop.permute.xlu1 %648  ;;  %v3056_v46 = vld [vmem:[%s3979_s1 + $0x10] sm:$0xf] }
 0x154   :  { %853 = vrot.lane.b32.xlu1 %v2874_v16, %s2302_s18 }
 0x155   :  { %2217 = vset.pattern.permute.xlu1 %v4062_v31 }
 0x15a   :  { %771 = vperm.xlu0 %2230, %v2126_v41   ;;  %v2945_v35 = vpop.permute.xlu2 %720 }
 0x15b   :  { %855 = vrot.lane.b32.xlu2 %v2876_v52, %s2302_s18 }
 0x15c   :  { %875 = vperm.xlu1 %2217, %v2128_v53   ;;  %2218 = vset.pattern.permute.xlu2 %v4067_v50  ;;  %v2965_v12 = vpop.permute.xlu1 %669 }
 0x162   :  { %865 = vperm.xlu0 %2230, %v2128_v53   ;;  %v2961_v49 = vpop.permute.xlu2 %750 }
 0x163   :  { %885 = vperm.xlu2 %2218, %v2128_v53  }
 0x164   :  { %2219 = vset.pattern.permute.xlu1 %v4061_v0 }
 0x165   :  { %895 = vperm.xlu1 %2219, %v2128_v53   ;;  %v2980_v26 = vpop.permute.xlu1 %699 }
 0x16a   :  { %1018 = vperm.xlu0 %2230, %v2131_v39  }
 0x16b   :  { %904 = vrot.lane.b32.xlu2 %v2874_v16, %s2303_s21 }
 0x16c   :  { %2221 = vset.pattern.permute.xlu2 %v4062_v31 }
 0x16d   :  { %2220 = vset.pattern.permute.xlu1 %v4064_v40 }
 0x16e   :  { %916 = vperm.xlu1 %2220, %v2129_v57   ;;  %v2989_v19 = vpop.permute.xlu1 %740 }
 0x172   :  { %1167 = vperm.xlu0 %2230, %v2959_v59  }
 0x173   :  { %926 = vperm.xlu2 %2221, %v2129_v57  }
 0x176   :  { %2222 = vset.pattern.permute.xlu1 %v4061_v0 }
 0x177   :  { %946 = vperm.xlu1 %2222, %v2129_v57  }
 0x17a   :  { %1213 = vrot.lane.b32.xlu0 %v1208_v33, %s2300_s30 }
 0x17b   :  { %v2968_v11 = vpop.permute.xlu2 %609  ;;  %955 = vrot.lane.b32.xlu2 %v2874_v16, %s2304_s5 }
 0x17c   :  { %2223 = vset.pattern.permute.xlu2 %v4064_v40 }
 0x17f   :  { %957 = vrot.lane.b32.xlu1 %v2876_v52, %s2304_s5 }
 0x180   :  { %2224 = vset.pattern.permute.xlu1 %v4067_v50 }
 0x182   :  { %1469 = vperm.xlu0 %2230, %v2978_v58  }
 0x183   :  { %967 = vperm.xlu2 %2223, %v2905_v8   ;;  %v2985_v29 = vpop.permute.xlu2 %657 }
 0x187   :  { %987 = vperm.xlu1 %2224, %v2905_v8  }
 0x18a   :  { %2248 = vset.pattern.permute.xlu0 %v4067_v50 }
 0x18b   :  { %689 = vperm.xlu0 %2248, %v2723_v60   ;;  %2225 = vset.pattern.permute.xlu2 %v4061_v0  ;;  %v2995_v27 = vpop.permute.xlu2 %708  ;;  %v3010_v60 = vld.sshfl [vmem:[#allocation1] sm:$0xff pattern:$0x75316420] }
 0x18c   :  { %997 = vperm.xlu2 %2225, %v2905_v8   ;;  %1267 = vst [vmem:[#allocation1] ss:$2 sm:$0xff] %v2457_v37 }
 0x18f   :  { %1006 = vrot.lane.b32.xlu1 %v2874_v16, %s2301_s17 }
 0x190   :  { %2226 = vset.pattern.permute.xlu1 %v4062_v31 }
 0x193   :  { %936 = vperm.xlu0 %2248, %v2129_v57   ;;  %v3001_v21 = vpop.permute.xlu0 %659  ;;  %v3003_v38 = vpop.permute.xlu2 %761  ;;  %v3023_v28 = vld.sshfl [vmem:[#allocation1] sm:$0xff pattern:$0x75316420]  ;;  %v3025_v5 = vld.sshfl [vmem:[#allocation1 + $0x8] sm:$0xff pattern:$0x75316420] }
 0x194   :  { %v3005_v61 = vpop.permute.xlu1 %607  ;;  %1008 = vrot.lane.b32.xlu2 %v2876_v52, %s2301_s17  ;;  %1386 = vst [vmem:[#allocation1] ss:$2 sm:$0xff] %v2457_v37 }
 0x195   :  { %2227 = vset.pattern.permute.xlu2 %v4067_v50  ;;  %v611_v1 = vsel %vm37_vm0, %v3005_v61, %v2968_v11 }
 0x197   :  { %1028 = vperm.xlu1 %2226, %v2131_v39  }
 0x19b   :  { %v3012_v54 = vpop.permute.xlu0 %824  ;;  %v3014_v51 = vpop.permute.xlu2 %791  ;;  %1248 = vperm.xlu0 %2248, %v2136_v62   ;;  %v3041_v14 = vld.sshfl [vmem:[#allocation1] sm:$0xff pattern:$0x75316420]  ;;  %v3043_v10 = vld.sshfl [vmem:[#allocation1 + $0x8] sm:$0xff pattern:$0x75316420] }
 0x19c   :  { %v3017_v25 = vpop.permute.xlu1 %710  ;;  %1038 = vperm.xlu2 %2227, %v2131_v39   ;;  %1447 = vst [vmem:[#allocation1] ss:$2 sm:$0xff] %v2457_v37 }
 0x19f   :  { %2228 = vset.pattern.permute.xlu1 %v4061_v0 }
 0x1a0   :  { %1048 = vperm.xlu1 %2228, %v2131_v39  }
 0x1a3   :  { %v3027_v7 = vpop.permute.xlu0 %906  ;;  %1359 = vperm.xlu0 %2248, %v3056_v46   ;;  %v3060_v8 = vld.sshfl [vmem:[#allocation1] sm:$0xff pattern:$0x75316420]  ;;  %v3062_v41 = vld.sshfl [vmem:[#allocation1 + $0x8] sm:$0xff pattern:$0x75316420] }
 0x1a4   :  { %v3030_v22 = vpop.permute.xlu1 %759  ;;  %2229 = vset.pattern.permute.xlu2 %v4064_v40  ;;  %v3033_v13 = vpop.permute.xlu2 %814  ;;  %4070 = vst [vmem:[#allocation14_spill] sm:$0xff] %v3060_v8 }
 0x1a5   :  { %1060 = vperm.xlu2 %2229, %v1057_v30   ;;  %4071 = vst [vmem:[#allocation15_spill] sm:$0xff] %v3062_v41 }
 0x1a6   :  { %1508 = vst [vmem:[#allocation1] ss:$2 sm:$0xff] %v2457_v37 }
 0x1a8   :  { %1091 = vrot.lane.b32.xlu1 %v2871_v20, %s2297_s25 }
 0x1a9   :  { %2231 = vset.pattern.permute.xlu1 %v4067_v50 }
 0x1ab   :  { %v3045_v6 = vpop.permute.xlu0 %977 }
 0x1ac   :  { %4069 = vst [vmem:[#allocation13_spill] sm:$0xff] %v3045_v6  ;;  %v3048_v3 = vpop.permute.xlu1 %781 }
 0x1ad   :  { %1106 = vperm.xlu2 %2229, %v2918_v18   ;;  %v3051_v20 = vpop.permute.xlu2 %844  ;;  %v1510_v33 = vld.sshfl [vmem:[#allocation1 + $0x8] sm:$0xff pattern:$0x75316420] }
 0x1ae   :  { %1515 = vrot.lane.b32.xlu0 %v1510_v33, %s2304_s5 }
 0x1b0   :  { %1126 = vperm.xlu1 %2231, %v2918_v18  }
 0x1b3   :  { %v3064_v53 = vpop.permute.xlu0 %1089 }
 0x1b4   :  { %4072 = vst [vmem:[#allocation16_spill] sm:$0xff] %v3064_v53 }
 0x1b5   :  { %v3067_v39 = vpop.permute.xlu1 %801  ;;  %2232 = vset.pattern.permute.xlu2 %v4061_v0  ;;  %v3070_v57 = vpop.permute.xlu2 %855 }
 0x1b6   :  { %1136 = vperm.xlu2 %2232, %v2918_v18  }
 0x1b8   :  { %1150 = vrot.lane.b32.xlu1 %v2884_v17, %s2298_s28  ;;  %v3090_v17 = vld [vmem:[%s3979_s1 + $0x1c] sm:$0xf] }
 0x1b9   :  { %2233 = vset.pattern.permute.xlu1 %v4062_v31  ;;  %4075 = vst [vmem:[#allocation19_spill] sm:$0xff] %v3090_v17  ;;  %1550 = vperm.xlu0 %2248, %v3090_v17  }
 0x1bb   :  { %v3076_v30 = vpop.permute.xlu0 %1116 }
 0x1bc   :  { %4073 = vst [vmem:[#allocation17_spill] sm:$0xff] %v3076_v30 }
 0x1bd   :  { %v3079_v43 = vpop.permute.xlu2 %885 }
 0x1be   :  { %4074 = vst [vmem:[#allocation18_spill] sm:$0xff] %v3079_v43  ;;  %v3081_v34 = vpop.permute.xlu1 %834  ;;  %1152 = vrot.lane.b32.xlu2 %v2886_v15, %s2298_s28  ;;  %v2138_v15 = vld [vmem:[%s3979_s1 + $0xc] sm:$0xf] }
 0x1bf   :  { %2234 = vset.pattern.permute.xlu2 %v4067_v50 }
 0x1c0   :  { %1177 = vperm.xlu1 %2233, %v2959_v59  }
 0x1c1   :  { %2254 = vset.pattern.permute.xlu0 %v4062_v31 }
 0x1c2   :  { %1299 = vperm.xlu0 %2254, %v2138_v15  }
 0x1c4   :  { %v619_v18 = vpop.permute.xlu0 %618 }
 0x1c5   :  { %v3093_v33 = vpop.permute.xlu2 %904 }
 0x1c6   :  { %v3095_v9 = vpop.permute.xlu1 %853  ;;  %1187 = vperm.xlu2 %2234, %v2959_v59  }
 0x1c8   :  { %2235 = vset.pattern.permute.xlu1 %v4061_v0 }
 0x1c9   :  { %1197 = vperm.xlu1 %2235, %v2959_v59  }
 0x1cc   :  { %v3104_v55 = vpop.permute.xlu0 %771 }
 0x1cd   :  { %v3106_v63 = vpop.permute.xlu2 %926 }
 0x1ce   :  { %4076 = vst [vmem:[#allocation20_spill] sm:$0xff] %v3106_v63  ;;  %v3108_v24 = vpop.permute.xlu1 %875  ;;  %1211 = vrot.lane.b32.xlu2 %v3010_v60, %s2300_s30 }
 0x1cf   :  { %4077 = vst [vmem:[#allocation21_spill] sm:$0xff] %v3108_v24  ;;  %2237 = vset.pattern.permute.xlu2 %v4062_v31 }
 0x1d1   :  { %2236 = vset.pattern.permute.xlu1 %v4064_v40 }
 0x1d2   :  { %1228 = vperm.xlu1 %2236, %v2136_v62  }
 0x1d4   :  { %v3114_v59 = vpop.permute.xlu0 %865 }
 0x1d5   :  { %4078 = vst [vmem:[#allocation22_spill] sm:$0xff] %v3114_v59  ;;  %v3116_v2 = vpop.permute.xlu2 %955 }
 0x1d6   :  { %4079 = vst [vmem:[#allocation23_spill] sm:$0xff] %v3116_v2  ;;  %1238 = vperm.xlu2 %2237, %v2136_v62  }
 0x1d7   :  { %v3118_v42 = vpop.permute.xlu1 %895 }
 0x1d8   :  { %4080 = vst [vmem:[#allocation24_spill] sm:$0xff] %v3118_v42 }
 0x1da   :  { %2238 = vset.pattern.permute.xlu1 %v4061_v0 }
 0x1db   :  { %1258 = vperm.xlu1 %2238, %v2136_v62   ;;  %v612_v62 = vsel %vm37_vm0, %v2968_v11, %v3005_v61 }
 0x1dc   :  { %v3121_v17 = vpop.permute.xlu0 %1018 }
 0x1dd   :  { %4081 = vst [vmem:[#allocation25_spill] sm:$0xff] %v3121_v17  ;;  %v3123_v6 = vpop.permute.xlu2 %967  ;;  %v4084_v17 = vld [vmem:[#allocation6_spill] sm:$0xff] }
 0x1de   :  { %4082 = vst [vmem:[#allocation26_spill] sm:$0xff] %v3123_v6  ;;  %1272 = vrot.lane.b32.xlu2 %v3023_v28, %s2299_s29  ;;  %v4085_v6 = vperm.slane %v4084_v17, 0  ;;  %v4086_v30 = vperm.slane %v4084_v17, 1 }
 0x1df   :  { %2239 = vset.pattern.permute.xlu2 %v4064_v40 }
 0x1e0   :  { %v3128_v60 = vpop.permute.xlu1 %916  ;;  %v613_v28 = vmul.f32 %v612_v62, %v4085_v6  ;;  %v614_v58 = vmul.f32 %v611_v1, %v4086_v30  ;;  %v661_v1 = vsel %vm99_vm1, %v2985_v29, %v3001_v21  ;;  %v662_v6 = vsel %vm99_vm1, %v3001_v21, %v2985_v29 }
 0x1e1   :  { %4083 = vst [vmem:[#allocation27_spill] sm:$0xff] %v3128_v60 }
 0x1e2   :  { %v621_v60 = vperm.slane %v613_v28, 0  ;;  %v622_v42 = vperm.slane %v614_v58, 0  ;;  %v631_v23 = vperm.slane %v613_v28, 1  ;;  %v632_v11 = vperm.slane %v614_v58, 1 }
 0x1e3   :  { %1274 = vrot.lane.b32.xlu1 %v3025_v5, %s2299_s29  ;;  %v641_v62 = vperm.slane %v613_v28, 2 }
 0x1e4   :  { %v3144_v53 = vpop.permute.xlu0 %1167  ;;  %2240 = vset.pattern.permute.xlu1 %v4067_v50  ;;  %v623_v5 = vmul.f32 %v621_v60, %v619_v18  ;;  %v624_v59 = vmul.f32 %v622_v42, %v619_v18  ;;  %v633_v30 = vmul.f32 %v631_v23, %v2939_v44  ;;  %v634_v17 = vmul.f32 %v632_v11, %v2939_v44  ;;  %v3177_v23 = vld [vmem:[%s3979_s1 + $0x14] sm:$0xf] }
 0x1e5   :  { %4087 = vst [vmem:[#allocation6_spill] sm:$0xff] %v3144_v53  ;;  %v642_v53 = vperm.slane %v614_v58, 2  ;;  %v643_v44 = vmul.f32 %v641_v62, %v2926_v36  ;;  %v651_v11 = vperm.slane %v613_v28, 3  ;;  %1418 = vperm.xlu0 %2254, %v3177_v23  }
 0x1e6   :  { %1289 = vperm.xlu2 %2239, %v2138_v15   ;;  %v3147_v41 = vpop.permute.xlu2 %997  ;;  %v635_v42 = vadd.f32 %v633_v30, %v623_v5  ;;  %v636_v18 = vadd.f32 %v634_v17, %v624_v59  ;;  %v652_v5 = vperm.slane %v614_v58, 3  ;;  %v712_v58 = vsel %vm163_vm2, %v2995_v27, %v3017_v25 }
 0x1e7   :  { %4088 = vst [vmem:[#allocation28_spill] sm:$0xff] %v3147_v41  ;;  %v644_v59 = vmul.f32 %v642_v53, %v2926_v36  ;;  %v653_v30 = vmul.f32 %v651_v11, %v2952_v48  ;;  %v713_v53 = vsel %vm163_vm2, %v3017_v25, %v2995_v27 }
 0x1e8   :  { %v654_v17 = vmul.f32 %v652_v5, %v2952_v48  ;;  %v827_v48 = vperm.slane %v2874_v16, 1 }
 0x1e9   :  { %v3149_v61 = vpop.permute.xlu1 %946 }
 0x1ea   :  { %4089 = vst [vmem:[#allocation29_spill] sm:$0xff] %v3149_v61  ;;  %v4092_v61 = vld [vmem:[#allocation7_spill] sm:$0xff] }
 0x1eb   :  { %1309 = vperm.xlu1 %2240, %v2138_v15   ;;  %v4093_v8 = vperm.slane %v4092_v61, 0  ;;  %v4094_v29 = vperm.slane %v4092_v61, 1  ;;  %v646_v61 = vadd.f32 %v644_v59, %v636_v18  ;;  %v828_v18 = vperm.slane %v2876_v52, 1  ;;  %v4098_v59 = vld [vmem:[#allocation8_spill] sm:$0xff] }
 0x1ec   :  { %v3161_v41 = vpop.permute.xlu0 %1213  ;;  %v4099_v11 = vperm.slane %v4098_v59, 0 }
 0x1ed   :  { %4090 = vst [vmem:[#allocation30_spill] sm:$0xff] %v3161_v41  ;;  %v3168_v43 = vmul.f32 %v662_v6, %v4093_v8  ;;  %v3172_v21 = vmul.f32 %v661_v1, %v4094_v29  ;;  %v645_v6 = vadd.f32 %v643_v44, %v635_v42  ;;  %v656_v62 = vadd.f32 %v654_v17, %v646_v61 }
 0x1ee   :  { %2241 = vset.pattern.permute.xlu2 %v4061_v0  ;;  %v3164_v60 = vpop.permute.xlu2 %1008  ;;  %v714_v5 = vmul.f32 %v713_v53, %v4099_v11  ;;  %v818_v61 = vperm.slane %v2876_v52, 0 }
 0x1ef   :  { %4091 = vst [vmem:[#allocation31_spill] sm:$0xff] %v3164_v60  ;;  %1319 = vperm.xlu2 %2241, %v2138_v15   ;;  %v672_v15 = vperm.slane %v3168_v43, 0  ;;  %v673_v1 = vperm.slane %v3172_v21, 0  ;;  %v655_v28 = vadd.f32 %v653_v30, %v645_v6  ;;  %v682_v29 = vperm.slane %v3168_v43, 1 }
 0x1f0   :  { %v683_v44 = vperm.slane %v3172_v21, 1  ;;  %v817_v30 = vperm.slane %v2874_v16, 0  ;;  %v693_v11 = vperm.slane %v3172_v21, 2  ;;  %v733_v60 = vperm.slane %v714_v5, 1 }
 0x1f1   :  { %v3182_v8 = vpop.permute.xlu1 %957  ;;  %v674_v25 = vmul.f32 %v672_v15, %v2965_v12  ;;  %v675_v6 = vmul.f32 %v673_v1, %v2965_v12  ;;  %v684_v15 = vmul.f32 %v682_v29, %v2937_v32  ;;  %v692_v1 = vperm.slane %v3168_v43, 2 }
 0x1f2   :  { %4095 = vst [vmem:[#allocation7_spill] sm:$0xff] %v3182_v8  ;;  %v685_v12 = vmul.f32 %v683_v44, %v2937_v32  ;;  %v702_v41 = vperm.slane %v3168_v43, 3  ;;  %v703_v53 = vperm.slane %v3172_v21, 3  ;;  %v764_v32 = vsel %vm227_vm3, %v3003_v38, %v3030_v22 }
 0x1f3   :  { %2242 = vset.pattern.permute.xlu1 %v4064_v40  ;;  %v723_v29 = vperm.slane %v714_v5, 0  ;;  %v743_v21 = vperm.slane %v714_v5, 2 }
 0x1f4   :  { %1331 = vperm.xlu1 %2242, %v3056_v46   ;;  %v3190_v36 = vpop.permute.xlu0 %1469  ;;  %v704_v37 = vmul.f32 %v702_v41, %v2980_v26 }
 0x1f5   :  { %4096 = vst [vmem:[#allocation32_spill] sm:$0xff] %v3190_v36  ;;  %v4100_v36 = vperm.slane %v4098_v59, 1  ;;  %v677_v59 = vadd.f32 %v675_v6, %v656_v62 }
 0x1f6   :  { %v3200_v42 = vpop.permute.xlu2 %1038 }
 0x1f7   :  { %4097 = vst [vmem:[#allocation33_spill] sm:$0xff] %v3200_v42  ;;  %2243 = vset.pattern.permute.xlu2 %v4062_v31  ;;  %v715_v27 = vmul.f32 %v712_v58, %v4100_v36  ;;  %v676_v58 = vadd.f32 %v674_v25, %v655_v28  ;;  %v763_v28 = vsel %vm227_vm3, %v3030_v22, %v3003_v38  ;;  %v753_v31 = vperm.slane %v714_v5, 3 }
 0x1f8   :  { %1345 = vperm.xlu2 %2243, %v3056_v46   ;;  %v687_v6 = vadd.f32 %v685_v12, %v677_v59  ;;  %v705_v38 = vmul.f32 %v703_v53, %v2980_v26  ;;  %v3245_v22 = vmul.f32 %v827_v48, %v3012_v54  ;;  %v735_v53 = vmul.f32 %v733_v60, %v2991_v47 }
 0x1f9   :  { %v3218_v42 = vpop.permute.xlu1 %987  ;;  %v734_v17 = vperm.slane %v715_v27, 1  ;;  %v724_v44 = vperm.slane %v715_v27, 0  ;;  %v686_v25 = vadd.f32 %v684_v15, %v676_v58  ;;  %v754_v24 = vperm.slane %v715_v27, 3  ;;  %v4102_v58 = vld [vmem:[#allocation9_spill] sm:$0xff] }
 0x1fa   :  { %4101 = vst [vmem:[#allocation8_spill] sm:$0xff] %v3218_v42  ;;  %v744_v42 = vperm.slane %v715_v27, 2  ;;  %v4103_v5 = vperm.slane %v4102_v58, 0  ;;  %v4104_v59 = vperm.slane %v4102_v58, 1 }
 0x1fb   :  { %v726_v48 = vmul.f32 %v724_v44, %v2945_v35 }
 0x1fc   :  { %2244 = vset.pattern.permute.xlu1 %v4061_v0  ;;  %v765_v27 = vmul.f32 %v764_v32, %v4103_v5  ;;  %v766_v15 = vmul.f32 %v763_v28, %v4104_v59  ;;  %v746_v12 = vmul.f32 %v744_v42, %v2989_v19 }
 0x1fd   :  { %1373 = vperm.xlu1 %2244, %v3056_v46   ;;  %v690_v62 = vpop.permute.xlu0 %689  ;;  %v3248_v46 = vmul.f32 %v828_v18, %v3012_v54  ;;  %v736_v54 = vmul.f32 %v734_v17, %v2991_v47  ;;  %v745_v18 = vmul.f32 %v743_v21, %v2989_v19 }
 0x1fe   :  { %v694_v43 = vmul.f32 %v692_v1, %v690_v62  ;;  %v695_v36 = vmul.f32 %v693_v11, %v690_v62  ;;  %v755_v1 = vmul.f32 %v753_v31, %v2961_v49  ;;  %v756_v11 = vmul.f32 %v754_v24, %v2961_v49 }
 0x1ff   :  { %v3238_v2 = vpop.permute.xlu2 %1060  ;;  %v784_v47 = vperm.slane %v765_v27, 1  ;;  %v785_v60 = vperm.slane %v766_v15, 1  ;;  %v804_v31 = vperm.slane %v765_v27, 3  ;;  %v805_v24 = vperm.slane %v766_v15, 3 }
 0x200   :  { %v696_v8 = vadd.f32 %v694_v43, %v686_v25  ;;  %v697_v63 = vadd.f32 %v695_v36, %v687_v6  ;;  %1391 = vrot.lane.b32.xlu2 %v3041_v14, %s2302_s18  ;;  %v725_v14 = vmul.f32 %v723_v29, %v2945_v35  ;;  %v3269_v35 = vmul.f32 %v818_v61, %v3033_v13 }
 0x201   :  { %v3254_v36 = vpop.permute.xlu1 %1006  ;;  %2245 = vset.pattern.permute.xlu2 %v4064_v40  ;;  %v908_v49 = vsel %vm414_vm6, %v3093_v33, %v3027_v7  ;;  %v775_v61 = vperm.slane %v766_v15, 0  ;;  %v857_v6 = vsel %vm350_vm5, %v3095_v9, %v3070_v57  ;;  %v787_v5 = vmul.f32 %v785_v60, %v3048_v3 }
 0x202   :  { %v706_v26 = vadd.f32 %v704_v37, %v696_v8  ;;  %v707_v41 = vadd.f32 %v705_v38, %v697_v63  ;;  %v794_v37 = vperm.slane %v765_v27, 2  ;;  %v795_v63 = vperm.slane %v766_v15, 2 }
 0x203   :  { %v3266_v8 = vmul.f32 %v817_v30, %v3033_v13  ;;  %v774_v30 = vperm.slane %v765_v27, 0  ;;  %v3283_v13 = vld [vmem:[%s3979_s1 + $0x20] sm:$0xf]  ;;  %v777_v21 = vmul.f32 %v775_v61, %v3104_v55  ;;  %v4105_v27 = vperm.slane %v2772_v4, 0 }
 0x204   :  { %v727_v28 = vadd.f32 %v725_v14, %v706_v26  ;;  %v728_v32 = vadd.f32 %v726_v48, %v707_v41  ;;  %1601 = vperm.xlu0 %2254, %v3283_v13   ;;  %v796_v44 = vmul.f32 %v794_v37, %v3014_v51  ;;  %v797_v25 = vmul.f32 %v795_v63, %v3014_v51 }
 0x205   :  { %1393 = vrot.lane.b32.xlu1 %v3043_v10, %s2302_s18  ;;  %v909_v10 = vsel %vm414_vm6, %v3027_v7, %v3093_v33  ;;  %v858_v7 = vsel %vm350_vm5, %v3070_v57, %v3095_v9  ;;  %v776_v43 = vmul.f32 %v774_v30, %v3104_v55  ;;  %v786_v51 = vmul.f32 %v784_v47, %v3048_v3 }
 0x206   :  { %v737_v19 = vadd.f32 %v735_v53, %v727_v28  ;;  %v738_v42 = vadd.f32 %v736_v54, %v728_v32  ;;  %2246 = vset.pattern.permute.xlu1 %v4067_v50  ;;  %v3309_v59 = vmul.f32 %v908_v49, %v4105_v27  ;;  %v4106_v15 = vperm.slane %v2772_v4, 1 }
 0x207   :  { %v3278_v17 = vpop.permute.xlu2 %1106  ;;  %v4107_v9 = vperm.slane %v2714_v56, 0  ;;  %v4108_v55 = vperm.slane %v2714_v56, 1  ;;  %v4109_v3 = vperm.slane %v2874_v16, 3  ;;  %v4110_v4 = vperm.slane %v2876_v52, 3 }
 0x208   :  { %v747_v62 = vadd.f32 %v745_v18, %v737_v19  ;;  %v748_v29 = vadd.f32 %v746_v12, %v738_v42  ;;  %1408 = vperm.xlu2 %2245, %v3177_v23   ;;  %v3313_v26 = vmul.f32 %v909_v10, %v4106_v15  ;;  %v806_v18 = vmul.f32 %v804_v31, %v3067_v39  ;;  %v4113_v10 = vld [vmem:[#allocation3_spill] sm:$0xff] }
 0x209   :  { %v3301_v33 = vpop.permute.xlu1 %1028  ;;  %v3317_v57 = vmul.f32 %v857_v6, %v4107_v9  ;;  %v3321_v41 = vmul.f32 %v858_v7, %v4108_v55  ;;  %v3326_v53 = vmul.f32 %v4109_v3, %v3051_v20  ;;  %v3331_v54 = vmul.f32 %v4110_v4, %v3051_v20  ;;  %v4114_v6 = vld [vmem:[#allocation20_spill] sm:$0xff]  ;;  %v4117_v9 = vld [vmem:[#allocation21_spill] sm:$0xff]  ;;  %v4119_v3 = vld [vmem:[#allocation14_spill] sm:$0xff] }
 0x20a   :  { %v757_v38 = vadd.f32 %v755_v1, %v747_v62  ;;  %v758_v58 = vadd.f32 %v756_v11, %v748_v29  ;;  %v807_v12 = vmul.f32 %v805_v24, %v3067_v39  ;;  %v4111_v56 = vperm.slane %v2874_v16, 2  ;;  %v3390_v4 = vld [vmem:[%s3982_s0] sm:$0x3] }
 0x20b   :  { %v4112_v11 = vperm.slane %v2876_v52, 2  ;;  %v929_v63 = vperm.slane %v3309_v59, 1  ;;  %v930_v20 = vperm.slane %v3313_v26, 1  ;;  %v919_v47 = vperm.slane %v3309_v59, 0 }
 0x20c   :  { %v778_v14 = vadd.f32 %v776_v43, %v757_v38  ;;  %v779_v48 = vadd.f32 %v777_v21, %v758_v58  ;;  %v839_v1 = vmul.f32 %v4111_v56, %v3081_v34  ;;  %v920_v39 = vperm.slane %v3313_v26, 0  ;;  %v4115_v38 = vld [vmem:[#allocation7_spill] sm:$0xff] }
 0x20d   :  { %1428 = vperm.xlu1 %2246, %v3177_v23   ;;  %v840_v28 = vmul.f32 %v4112_v11, %v3081_v34  ;;  %v888_v60 = vperm.slane %v3317_v57, 2  ;;  %v889_v19 = vperm.slane %v3321_v41, 2  ;;  %v3351_v34 = vld.sshfl [vmem:[#allocation1] sm:$0xff pattern:$0x75316420]  ;;  %v878_v31 = vperm.slane %v3317_v57, 1 }
 0x20e   :  { %v788_v32 = vadd.f32 %v786_v51, %v778_v14  ;;  %v789_v37 = vadd.f32 %v787_v5, %v779_v48  ;;  %v879_v24 = vperm.slane %v3321_v41, 1  ;;  %v868_v49 = vperm.slane %v3317_v57, 0  ;;  %1569 = vst [vmem:[#allocation1] ss:$2 sm:$0xff] %v4113_v10  ;;  %v4116_v58 = vld [vmem:[#allocation23_spill] sm:$0xff]  ;;  %v4121_v11 = vld [vmem:[#allocation22_spill] sm:$0xff] }
 0x20f   :  { %v869_v30 = vperm.slane %v3321_v41, 0  ;;  %v898_v61 = vperm.slane %v3317_v57, 3  ;;  %v899_v62 = vperm.slane %v3321_v41, 3  ;;  %v3364_v7 = vmul.f32 %v929_v63, %v4114_v6  ;;  %v4118_v41 = vld [vmem:[#allocation18_spill] sm:$0xff]  ;;  %v4122_v63 = vld [vmem:[#allocation11_spill] sm:$0xff] }
 0x210   :  { %v798_v16 = vadd.f32 %v796_v44, %v788_v32  ;;  %v799_v42 = vadd.f32 %v797_v25, %v789_v37  ;;  %2247 = vset.pattern.permute.xlu2 %v4061_v0  ;;  %v3349_v52 = vpop.permute.xlu2 %1136  ;;  %v3367_v43 = vmul.f32 %v930_v20, %v4114_v6  ;;  %v949_v21 = vperm.slane %v3309_v59, 3 }
 0x211   :  { %1438 = vperm.xlu2 %2247, %v3177_v23   ;;  %v950_v23 = vperm.slane %v3313_v26, 3  ;;  %v959_v51 = vsel %vm478_vm7, %v4116_v58, %v4115_v38  ;;  %v960_v5 = vsel %vm478_vm7, %v4115_v38, %v4116_v58  ;;  %v880_v57 = vmul.f32 %v878_v31, %v4117_v9  ;;  %v4127_v58 = vld [vmem:[#allocation15_spill] sm:$0xff] }
 0x212   :  { %v808_v29 = vadd.f32 %v806_v18, %v798_v16  ;;  %v809_v44 = vadd.f32 %v807_v12, %v799_v42  ;;  %v3361_v25 = vpop.permute.xlu1 %1048  ;;  %v881_v55 = vmul.f32 %v879_v24, %v4117_v9  ;;  %v890_v14 = vmul.f32 %v888_v60, %v4118_v41 }
 0x213   :  { %v891_v48 = vmul.f32 %v889_v19, %v4118_v41  ;;  %v939_v18 = vperm.slane %v3309_v59, 2  ;;  %v940_v12 = vperm.slane %v3313_v26, 2  ;;  %v4120_v56 = vmov 1  }
 0x214   :  { %v821_v27 = vadd.f32 %v3266_v8, %v808_v29  ;;  %v822_v15 = vadd.f32 %v3269_v35, %v809_v44  ;;  %v870_v32 = vmul.f32 %v868_v49, %v4121_v11  ;;  %v871_v37 = vmul.f32 %v869_v30, %v4121_v11  ;;  %v4125_v29 = vld [vmem:[#allocation24_spill] sm:$0xff]  ;;  %v4126_v44 = vld [vmem:[#allocation27_spill] sm:$0xff] }
 0x215   :  { %1452 = vrot.lane.b32.xlu1 %v4119_v3, %s2303_s21  ;;  %v4123_v20 = vperm.slane %v4122_v63, 0  ;;  %v4124_v19 = vperm.slane %v4122_v63, 1  ;;  %v4050_v42 = vperm.slane %v3390_v4, 0  ;;  %v4049_v31 = vperm.slane %v3390_v4, 1  ;;  %v4130_v11 = vld [vmem:[#allocation12_spill] sm:$0xff] }
 0x216   :  { %v831_v8 = vadd.f32 %v3245_v22, %v821_v27  ;;  %v832_v35 = vadd.f32 %v3248_v46, %v822_v15  ;;  %2249 = vset.pattern.permute.xlu1 %v4120_v56  ;;  %v900_v49 = vmul.f32 %v898_v61, %v4125_v29  ;;  %v901_v30 = vmul.f32 %v899_v62, %v4125_v29  ;;  %v4129_v62 = vld [vmem:[#allocation16_spill] sm:$0xff] }
 0x217   :  { %v3401_v60 = vmul.f32 %v959_v51, %v4123_v20  ;;  %v3405_v16 = vmul.f32 %v960_v5, %v4124_v19  ;;  %v921_v6 = vmul.f32 %v919_v47, %v4126_v44  ;;  %v922_v38 = vmul.f32 %v920_v39, %v4126_v44  ;;  %v4128_v51 = vld [vmem:[#allocation29_spill] sm:$0xff]  ;;  %v4131_v19 = vld [vmem:[#allocation31_spill] sm:$0xff] }
 0x218   :  { %v841_v22 = vadd.f32 %v839_v1, %v831_v8  ;;  %v842_v46 = vadd.f32 %v840_v28, %v832_v35  ;;  %v3409_v24 = vpop.permute.xlu2 %1152  ;;  %v3418_v1 = vmul.f32 %v949_v21, %v4128_v51  ;;  %v3421_v28 = vmul.f32 %v950_v23, %v4128_v51 }
 0x219   :  { %1454 = vrot.lane.b32.xlu2 %v4127_v58, %s2303_s21  ;;  %v970_v47 = vperm.slane %v3401_v60, 0  ;;  %v971_v39 = vperm.slane %v3405_v16, 0  ;;  %v980_v41 = vperm.slane %v3401_v60, 1  ;;  %v981_v3 = vperm.slane %v3405_v16, 1 }
 0x21a   :  { %v851_v5 = vadd.f32 %v3326_v53, %v841_v22  ;;  %v852_v27 = vadd.f32 %v3331_v54, %v842_v46  ;;  %v1092_v61 = vpop.permute.xlu1 %1091  ;;  %2250 = vset.pattern.permute.xlu2 %v4067_v50  ;;  %v1000_v8 = vperm.slane %v3401_v60, 3  ;;  %v1001_v35 = vperm.slane %v3405_v16, 3 }
 0x21b   :  { %v1093_v15 = vsel %vm37_vm0, %v4129_v62, %v1092_v61  ;;  %v1094_v21 = vsel %vm37_vm0, %v1092_v61, %v4129_v62  ;;  %v1010_v22 = vsel %vm542_vm4, %v3254_v36, %v4131_v19  ;;  %v1011_v46 = vsel %vm542_vm4, %v4131_v19, %v3254_v36 }
 0x21c   :  { %v872_v23 = vadd.f32 %v870_v32, %v851_v5  ;;  %v873_v9 = vadd.f32 %v871_v37, %v852_v27  ;;  %v1101_v53 = vmul.f32 %v4050_v42, %v1094_v21  ;;  %v1102_v54 = vmul.f32 %v4049_v31, %v1093_v15  ;;  %v4132_v27 = vld [vmem:[#allocation17_spill] sm:$0xff] }
 0x21d   :  { %1479 = vperm.xlu1 %2249, %v4130_v11  }
 0x21e   :  { %v882_v63 = vadd.f32 %v880_v57, %v872_v23  ;;  %v883_v20 = vadd.f32 %v881_v55, %v873_v9  ;;  %v1109_v32 = vperm.slane %v1101_v53, 0  ;;  %v1110_v37 = vperm.slane %v1102_v54, 0  ;;  %v937_v23 = vpop.permute.xlu0 %936 }
 0x21f   :  { %v1119_v29 = vperm.slane %v1101_v53, 1  ;;  %v1120_v44 = vperm.slane %v1102_v54, 1  ;;  %v1139_v15 = vperm.slane %v1101_v53, 3  ;;  %v1140_v21 = vperm.slane %v1102_v54, 3 }
 0x220   :  { %v892_v58 = vadd.f32 %v890_v14, %v882_v63  ;;  %v893_v51 = vadd.f32 %v891_v48, %v883_v20  ;;  %v1111_v5 = vmul.f32 %v1109_v32, %v3278_v17  ;;  %v1112_v57 = vmul.f32 %v1110_v37, %v3278_v17  ;;  %v3453_v55 = vpop.permute.xlu2 %1187 }
 0x221   :  { %1489 = vperm.xlu2 %2250, %v4130_v11   ;;  %v1121_v61 = vmul.f32 %v1119_v29, %v4132_v27  ;;  %v1122_v62 = vmul.f32 %v1120_v44, %v4132_v27  ;;  %v1129_v19 = vperm.slane %v1101_v53, 2  ;;  %v1130_v14 = vperm.slane %v1102_v54, 2  ;;  %v3463_v44 = vld [vmem:[%s3982_s0 + $0x2] sm:$0x3] }
 0x222   :  { %v902_v36 = vadd.f32 %v900_v49, %v892_v58  ;;  %v903_v9 = vadd.f32 %v901_v30, %v893_v51  ;;  %v1127_v48 = vpop.permute.xlu1 %1126  ;;  %v1141_v17 = vmul.f32 %v1139_v15, %v3349_v52  ;;  %v1142_v32 = vmul.f32 %v1140_v21, %v3349_v52  ;;  %v4133_v51 = vld [vmem:[#allocation10_spill] sm:$0xff] }
 0x223   :  { %v1123_v63 = vadd.f32 %v1121_v61, %v1111_v5  ;;  %v1124_v20 = vadd.f32 %v1122_v62, %v1112_v57  ;;  %v1131_v42 = vmul.f32 %v1129_v19, %v1127_v48  ;;  %v1132_v29 = vmul.f32 %v1130_v14, %v1127_v48  ;;  %v4140_v48 = vld [vmem:[#allocation8_spill] sm:$0xff] }
 0x224   :  { %v923_v37 = vadd.f32 %v921_v6, %v902_v36  ;;  %v924_v31 = vadd.f32 %v922_v38, %v903_v9  ;;  %v990_v49 = vperm.slane %v3401_v60, 2  ;;  %v991_v30 = vperm.slane %v3405_v16, 2  ;;  %v4138_v36 = vld [vmem:[#allocation28_spill] sm:$0xff]  ;;  %v3502_v16 = vld.sshfl [vmem:[#allocation1 + $0x8] sm:$0xff pattern:$0x75316420] }
 0x225   :  { %v941_v53 = vmul.f32 %v939_v18, %v937_v23  ;;  %v942_v54 = vmul.f32 %v940_v12, %v937_v23  ;;  %2251 = vset.pattern.permute.xlu1 %v4061_v0  ;;  %v1133_v38 = vadd.f32 %v1131_v42, %v1123_v63  ;;  %v1134_v58 = vadd.f32 %v1132_v29, %v1124_v20  ;;  %v4136_v42 = vld [vmem:[#allocation26_spill] sm:$0xff] }
 0x226   :  { %v933_v52 = vadd.f32 %v3364_v7, %v923_v37  ;;  %v934_v6 = vadd.f32 %v3367_v43, %v924_v31  ;;  %1499 = vperm.xlu1 %2251, %v4130_v11   ;;  %v4134_v5 = vperm.slane %v4133_v51, 0  ;;  %v4135_v59 = vperm.slane %v4133_v51, 1 }
 0x227   :  { %v1158_v26 = vperm.slane %v3463_v44, 0  ;;  %v1159_v12 = vperm.slane %v3463_v44, 1  ;;  %v1143_v61 = vadd.f32 %v1141_v17, %v1133_v38  ;;  %v1144_v43 = vadd.f32 %v1142_v32, %v1134_v58  ;;  %v4142_v38 = vld [vmem:[#allocation19_spill] sm:$0xff] }
 0x228   :  { %v3477_v57 = vmul.f32 %v1010_v22, %v4134_v5  ;;  %v3481_v18 = vmul.f32 %v1011_v46, %v4135_v59  ;;  %v943_v27 = vadd.f32 %v941_v53, %v933_v52  ;;  %v944_v7 = vadd.f32 %v942_v54, %v934_v6  ;;  %v4137_v22 = vld [vmem:[#allocation13_spill] sm:$0xff]  ;;  %v3495_v15 = vpop.permute.xlu2 %1211  ;;  %v4143_v5 = vld [vmem:[#allocation6_spill] sm:$0xff] }
 0x229   :  { %v972_v31 = vmul.f32 %v970_v47, %v4136_v42  ;;  %v973_v11 = vmul.f32 %v971_v39, %v4136_v42  ;;  %v982_v62 = vmul.f32 %v980_v41, %v4137_v22  ;;  %v983_v46 = vmul.f32 %v981_v3, %v4137_v22  ;;  %1513 = vrot.lane.b32.xlu2 %v3351_v34, %s2304_s5  ;;  %v3504_v39 = vld.sshfl [vmem:[#allocation1] sm:$0xff pattern:$0x75316420]  ;;  %v4139_v3 = vld [vmem:[#allocation2_spill] sm:$0xff] }
 0x22a   :  { %v953_v21 = vadd.f32 %v3418_v1, %v943_v27  ;;  %v954_v23 = vadd.f32 %v3421_v28, %v944_v7  ;;  %v1002_v60 = vmul.f32 %v1000_v8, %v4138_v36  ;;  %v1003_v47 = vmul.f32 %v1001_v35, %v4138_v36  ;;  %v1151_v9 = vpop.permute.xlu1 %1150  ;;  %2253 = vset.pattern.permute.xlu2 %v4120_v56  ;;  %v4141_v54 = vld [vmem:[#allocation25_spill] sm:$0xff] }
 0x22b   :  { %v1021_v41 = vperm.slane %v3477_v57, 0  ;;  %v1022_v34 = vperm.slane %v3481_v18, 0  ;;  %v1154_v1 = vsel %vm99_vm1, %v1151_v9, %v3409_v24  ;;  %v1155_v28 = vsel %vm99_vm1, %v3409_v24, %v1151_v9  ;;  %2091 = vst [vmem:[#allocation1] ss:$2 sm:$0xff] %v4139_v3 }
 0x22c   :  { %v974_v8 = vadd.f32 %v972_v31, %v953_v21  ;;  %v975_v35 = vadd.f32 %v973_v11, %v954_v23  ;;  %v3517_v19 = vmul.f32 %v1158_v26, %v1155_v28  ;;  %v3521_v14 = vmul.f32 %v1159_v12, %v1154_v1 }
 0x22d   :  { %v992_v63 = vmul.f32 %v990_v49, %v4140_v48  ;;  %v993_v20 = vmul.f32 %v991_v30, %v4140_v48  ;;  %v1031_v17 = vperm.slane %v3477_v57, 1  ;;  %v1032_v24 = vperm.slane %v3481_v18, 1 }
 0x22e   :  { %v984_v32 = vadd.f32 %v982_v62, %v974_v8  ;;  %v985_v37 = vadd.f32 %v983_v46, %v975_v35  ;;  %2252 = vset.pattern.permute.xlu1 %v4064_v40  ;;  %v1170_v29 = vperm.slane %v3517_v19, 0  ;;  %v1171_v53 = vperm.slane %v3521_v14, 0 }
 0x22f   :  { %v1023_v52 = vmul.f32 %v1021_v41, %v4141_v54  ;;  %v1024_v6 = vmul.f32 %v1022_v34, %v4141_v54  ;;  %v1041_v49 = vperm.slane %v3477_v57, 2  ;;  %v1042_v30 = vperm.slane %v3481_v18, 2  ;;  %1530 = vperm.xlu1 %2252, %v4142_v38  }
 0x230   :  { %v995_v58 = vadd.f32 %v993_v20, %v985_v37  ;;  %v994_v51 = vadd.f32 %v992_v63, %v984_v32  ;;  %v1172_v59 = vmul.f32 %v1170_v29, %v4143_v5  ;;  %v1173_v27 = vmul.f32 %v1171_v53, %v4143_v5  ;;  %v1239_v41 = vpop.permute.xlu2 %1238  ;;  %v4144_v20 = vld [vmem:[#allocation33_spill] sm:$0xff] }
 0x231   :  { %1540 = vperm.xlu2 %2253, %v4142_v38   ;;  %v1180_v7 = vperm.slane %v3517_v19, 1  ;;  %v1181_v42 = vperm.slane %v3521_v14, 1  ;;  %v1190_v31 = vperm.slane %v3517_v19, 2  ;;  %v1191_v11 = vperm.slane %v3521_v14, 2 }
 0x232   :  { %v1005_v22 = vadd.f32 %v1003_v47, %v995_v58  ;;  %v1004_v62 = vadd.f32 %v1002_v60, %v994_v51  ;;  %v1174_v46 = vadd.f32 %v1172_v59, %v1143_v61  ;;  %v1175_v21 = vadd.f32 %v1173_v27, %v1144_v43  ;;  %v1178_v23 = vpop.permute.xlu1 %1177 }
 0x233   :  { %v1182_v36 = vmul.f32 %v1180_v7, %v1178_v23  ;;  %v1183_v9 = vmul.f32 %v1181_v42, %v1178_v23  ;;  %v1192_v34 = vmul.f32 %v1190_v31, %v3453_v55  ;;  %v1193_v1 = vmul.f32 %v1191_v11, %v3453_v55  ;;  %v3553_v55 = vld [vmem:[%s3982_s0 + $0x4] sm:$0x3] }
 0x234   :  { %v1026_v28 = vadd.f32 %v1024_v6, %v1005_v22  ;;  %v1025_v3 = vadd.f32 %v1023_v52, %v1004_v62  ;;  %v1033_v8 = vmul.f32 %v1031_v17, %v3301_v33  ;;  %v1034_v35 = vmul.f32 %v1032_v24, %v3301_v33  ;;  %v4145_v52 = vld [vmem:[#allocation30_spill] sm:$0xff]  ;;  %v4147_v22 = vld [vmem:[#allocation4_spill] sm:$0xff] }
 0x235   :  { %v1051_v48 = vperm.slane %v3477_v57, 3  ;;  %v1052_v60 = vperm.slane %v3481_v18, 3  ;;  %v1184_v61 = vadd.f32 %v1182_v36, %v1174_v46  ;;  %v1185_v43 = vadd.f32 %v1183_v9, %v1175_v21 }
 0x236   :  { %v1035_v47 = vadd.f32 %v1033_v8, %v1025_v3  ;;  %v1036_v63 = vadd.f32 %v1034_v35, %v1026_v28  ;;  %v1043_v32 = vmul.f32 %v1041_v49, %v4144_v20  ;;  %v1044_v37 = vmul.f32 %v1042_v30, %v4144_v20 }
 0x237   :  { %2255 = vset.pattern.permute.xlu1 %v4061_v0  ;;  %v1194_v33 = vadd.f32 %v1192_v34, %v1184_v61  ;;  %v1195_v17 = vadd.f32 %v1193_v1, %v1185_v43  ;;  %v1053_v18 = vmul.f32 %v1051_v48, %v3361_v25  ;;  %v1054_v29 = vmul.f32 %v1052_v60, %v3361_v25  ;;  %v1249_v48 = vpop.permute.xlu0 %1248 }
 0x238   :  { %v1046_v57 = vadd.f32 %v1044_v37, %v1036_v63  ;;  %v1045_v24 = vadd.f32 %v1043_v32, %v1035_v47  ;;  %1560 = vperm.xlu1 %2255, %v4142_v38   ;;  %v1219_v53 = vperm.slane %v3553_v55, 0  ;;  %v1220_v54 = vperm.slane %v3553_v55, 1  ;;  %v3580_v42 = vpop.permute.xlu2 %1272 }
 0x239   :  { %v1215_v6 = vsel %vm163_vm2, %v3495_v15, %v4145_v52  ;;  %v1216_v49 = vsel %vm163_vm2, %v4145_v52, %v3495_v15  ;;  %1574 = vrot.lane.b32.xlu2 %v3504_v39, %s2301_s17  ;;  %v1200_v38 = vperm.slane %v3517_v19, 3  ;;  %v1201_v58 = vperm.slane %v3521_v14, 3  ;;  %v4146_v19 = vld [vmem:[#allocation5_spill] sm:$0xff] }
 0x23a   :  { %v1055_v25 = vadd.f32 %v1053_v18, %v1045_v24  ;;  %v1056_v30 = vadd.f32 %v1054_v29, %v1046_v57  ;;  %2256 = vset.pattern.permute.xlu2 %v4064_v40  ;;  %v1223_v15 = vmul.f32 %v1219_v53, %v1216_v49  ;;  %v1224_v39 = vmul.f32 %v1220_v54, %v1215_v6  ;;  %v1630_v29 = vld [vmem:[%s3983_s2] sm:$0xf] }
 0x23b   :  { %v1198_v51 = vpop.permute.xlu1 %1197 }
 0x23c   :  { %v1063_v5 = vadd.f32 %v3238_v2, %v1055_v25  ;;  %v1064_v59 = vadd.f32 %v3238_v2, %v1056_v30  ;;  %v1202_v27 = vmul.f32 %v1200_v38, %v1198_v51  ;;  %v1203_v7 = vmul.f32 %v1201_v58, %v1198_v51  ;;  %v3603_v25 = vld [vmem:[%s3981_s3] sm:$0xf] }
 0x23d   :  { %v1241_v2 = vperm.slane %v1223_v15, 1  ;;  %v1242_v21 = vperm.slane %v1224_v39, 1  ;;  %v1231_v23 = vperm.slane %v1223_v15, 0  ;;  %v1232_v36 = vperm.slane %v1224_v39, 0 }
 0x23e   :  { %v1072_v31 = vadd.f32 %v4146_v19, %v1064_v59  ;;  %v1204_v14 = vadd.f32 %v1202_v27, %v1194_v33  ;;  %v1205_v11 = vadd.f32 %v1203_v7, %v1195_v17  ;;  %v1071_v62 = vadd.f32 %v4147_v22, %v1063_v5  ;;  %v3617_v27 = vld [vmem:[%s3982_s0 + $0x6] sm:$0x3] }
 0x23f   :  { %v1251_v34 = vperm.slane %v1223_v15, 2  ;;  %v1252_v1 = vperm.slane %v1224_v39, 2  ;;  %v1243_v3 = vmul.f32 %v1241_v2, %v1239_v41  ;;  %v1244_v8 = vmul.f32 %v1242_v21, %v1239_v41  ;;  %v3606_v30 = vpop.permute.xlu0 %1359 }
 0x240   :  { %v1075_v46 = vrot.slane %v1072_v31, 4  ;;  %1576 = vrot.lane.b32.xlu1 %v3502_v16, %s2301_s17  ;;  %v1290_v43 = vpop.permute.xlu2 %1289  ;;  %v1261_v17 = vperm.slane %v1223_v15, 3  ;;  %v1262_v41 = vperm.slane %v1224_v39, 3  ;;  %v1280_v7 = vperm.slane %v3617_v27, 0 }
 0x241   :  { %2257 = vset.pattern.permute.xlu1 %v4067_v50  ;;  %1591 = vperm.xlu2 %2256, %v3283_v13   ;;  %v1253_v60 = vmul.f32 %v1251_v34, %v1249_v48  ;;  %v1254_v61 = vmul.f32 %v1252_v1, %v1249_v48  ;;  %v1281_v15 = vperm.slane %v3617_v27, 1 }
 0x242   :  { %v1077_v9 = vsel %vm1076_vm8, %v1071_v62, %v1075_v46 }
 0x243   :  { %1079 = vst [vmem:[%s3985_s6] sm:$0xff] %v1077_v9 }
 0x244   :  { %v1229_v28 = vpop.permute.xlu1 %1228 }
 0x245   :  { %v1233_v16 = vmul.f32 %v1231_v23, %v1229_v28  ;;  %v1234_v35 = vmul.f32 %v1232_v36, %v1229_v28 }
 0x247   :  { %v1235_v47 = vadd.f32 %v1233_v16, %v1204_v14  ;;  %v1236_v63 = vadd.f32 %v1234_v35, %v1205_v11  ;;  %v3612_v51 = vpop.permute.xlu0 %1515  ;;  %v1335_v16 = vperm.slane %v4113_v10, 4 }
 0x248   :  { %1611 = vperm.xlu1 %2257, %v3283_v13  }
 0x249   :  { %v1245_v20 = vadd.f32 %v1243_v3, %v1235_v47  ;;  %v1246_v32 = vadd.f32 %v1244_v8, %v1236_v63  ;;  %2258 = vset.pattern.permute.xlu2 %v4061_v0  ;;  %v1320_v49 = vpop.permute.xlu2 %1319  ;;  %v1334_v8 = vperm.slane %v4113_v10, 0 }
 0x24a   :  { %1621 = vperm.xlu2 %2258, %v3283_v13  }
 0x24b   :  { %v1255_v37 = vadd.f32 %v1253_v60, %v1245_v20  ;;  %v1256_v33 = vadd.f32 %v1254_v61, %v1246_v32  ;;  %v1348_v32 = vperm.slane %v4113_v10, 1 }
 0x24d   :  { %v1259_v57 = vpop.permute.xlu1 %1258 }
 0x24e   :  { %v1263_v24 = vmul.f32 %v1261_v17, %v1259_v57  ;;  %v1264_v18 = vmul.f32 %v1262_v41, %v1259_v57  ;;  %v1338_v57 = vperm.slane %v1334_v8, 0  ;;  %v1377_v8 = vperm.slane %v4113_v10, 7 }
 0x24f   :  { %v3628_v31 = vpop.permute.xlu0 %1550 }
 0x250   :  { %v1265_v52 = vadd.f32 %v1263_v24, %v1255_v37  ;;  %v1266_v6 = vadd.f32 %v1264_v18, %v1256_v33  ;;  %2259 = vset.pattern.permute.xlu1 %v4064_v40  ;;  %v1349_v37 = vperm.slane %v4113_v10, 5  ;;  %v1339_v24 = vperm.slane %v1335_v16, 0  ;;  %v3649_v18 = vld [vmem:[%s3982_s0 + $0xa] sm:$0x3] }
 0x251   :  { %1633 = vperm.xlu1 %2259, %v1630_v29  }
 0x252   :  { %2260 = vset.pattern.permute.xlu2 %v4120_v56  ;;  %v3608_v38 = vpop.permute.xlu2 %1345 }
 0x255   :  { %v1275_v13 = vpop.permute.xlu1 %1274 }
 0x256   :  { %v1276_v39 = vsel %vm227_vm3, %v3580_v42, %v1275_v13  ;;  %v1277_v19 = vsel %vm227_vm3, %v1275_v13, %v3580_v42  ;;  %v1353_v13 = vperm.slane %v1349_v37, 1 }
 0x257   :  { %v1284_v14 = vmul.f32 %v1280_v7, %v1277_v19  ;;  %v1285_v11 = vmul.f32 %v1281_v15, %v1276_v39  ;;  %v1300_v42 = vpop.permute.xlu0 %1299  ;;  %v1399_v39 = vperm.slane %v3649_v18, 0  ;;  %v1400_v19 = vperm.slane %v3649_v18, 1 }
 0x259   :  { %1651 = vperm.xlu1 %2259, %v3603_v25   ;;  %v1292_v46 = vperm.slane %v1284_v14, 0  ;;  %v1293_v2 = vperm.slane %v1285_v11, 0  ;;  %v1302_v9 = vperm.slane %v1284_v14, 1  ;;  %v1303_v34 = vperm.slane %v1285_v11, 1 }
 0x25a   :  { %v1392_v5 = vpop.permute.xlu2 %1391  ;;  %v1312_v60 = vperm.slane %v1284_v14, 2  ;;  %v1313_v61 = vperm.slane %v1285_v11, 2  ;;  %v1322_v17 = vperm.slane %v1284_v14, 3  ;;  %v1323_v41 = vperm.slane %v1285_v11, 3 }
 0x25b   :  { %v1294_v21 = vmul.f32 %v1292_v46, %v1290_v43  ;;  %v1295_v23 = vmul.f32 %v1293_v2, %v1290_v43  ;;  %v1304_v35 = vmul.f32 %v1302_v9, %v1300_v42  ;;  %v1305_v48 = vmul.f32 %v1303_v34, %v1300_v42 }
 0x25c   :  { %v1324_v46 = vmul.f32 %v1322_v17, %v1320_v49  ;;  %v1325_v2 = vmul.f32 %v1323_v41, %v1320_v49 }
 0x25d   :  { %v1310_v58 = vpop.permute.xlu1 %1309  ;;  %v1296_v28 = vadd.f32 %v1294_v21, %v1265_v52  ;;  %v1297_v3 = vadd.f32 %v1295_v23, %v1266_v6  ;;  %v1352_v6 = vperm.slane %v1348_v32, 1  ;;  %v1362_v21 = vperm.slane %v4113_v10, 2 }
 0x25e   :  { %v1314_v20 = vmul.f32 %v1312_v60, %v1310_v58  ;;  %v1315_v43 = vmul.f32 %v1313_v61, %v1310_v58  ;;  %v1363_v23 = vperm.slane %v4113_v10, 6 }
 0x25f   :  { %v1306_v47 = vadd.f32 %v1304_v35, %v1296_v28  ;;  %v1307_v63 = vadd.f32 %v1305_v48, %v1297_v3  ;;  %v1376_v3 = vperm.slane %v4113_v10, 3  ;;  %v1354_v49 = vmul.f32 %v1352_v6, %v3608_v38 }
 0x261   :  { %2261 = vset.pattern.permute.xlu1 %v4061_v0  ;;  %v1316_v29 = vadd.f32 %v1314_v20, %v1306_v47  ;;  %v1317_v52 = vadd.f32 %v1315_v43, %v1307_v63  ;;  %v1380_v47 = vperm.slane %v1376_v3, 3  ;;  %v1381_v63 = vperm.slane %v1377_v8, 3 }
 0x262   :  { %1681 = vperm.xlu1 %2261, %v3603_v25   ;;  %v3634_v22 = vpop.permute.xlu2 %1408 }
 0x263   :  { %v1326_v42 = vadd.f32 %v1324_v46, %v1316_v29  ;;  %v1327_v28 = vadd.f32 %v1325_v2, %v1317_v52 }
 0x266   :  { %v1332_v59 = vpop.permute.xlu1 %1331 }
 0x267   :  { %v1340_v14 = vmul.f32 %v1338_v57, %v1332_v59  ;;  %v1341_v11 = vmul.f32 %v1339_v24, %v1332_v59  ;;  %v1355_v59 = vmul.f32 %v1353_v13, %v3608_v38  ;;  %v3676_v24 = vld [vmem:[%s3982_s0 + $0xc] sm:$0x3] }
 0x268   :  { %v1460_v2 = vperm.slane %v3676_v24, 0 }
 0x269   :  { %v1342_v35 = vadd.f32 %v1340_v14, %v1326_v42  ;;  %v1343_v48 = vadd.f32 %v1341_v11, %v1327_v28 }
 0x26a   :  { %2263 = vset.pattern.permute.xlu1 %v4067_v50 }
 0x26b   :  { %v3638_v1 = vpop.permute.xlu2 %1438  ;;  %v1356_v20 = vadd.f32 %v1354_v49, %v1342_v35  ;;  %v1357_v43 = vadd.f32 %v1355_v59, %v1343_v48 }
 0x26f   :  { %v3636_v62 = vpop.permute.xlu1 %1373 }
 0x270   :  { %v1382_v41 = vmul.f32 %v1380_v47, %v3636_v62  ;;  %v1383_v57 = vmul.f32 %v1381_v63, %v3636_v62 }
 0x273   :  { %v1455_v58 = vpop.permute.xlu2 %1454 }
 0x277   :  { %v1394_v36 = vpop.permute.xlu1 %1393 }
 0x278   :  { %v1395_v9 = vsel %vm350_vm5, %v1392_v5, %v1394_v36  ;;  %v1396_v34 = vsel %vm350_vm5, %v1394_v36, %v1392_v5  ;;  %v1366_v5 = vperm.slane %v1362_v21, 2  ;;  %v1367_v36 = vperm.slane %v1363_v23, 2  ;;  %v1419_v23 = vpop.permute.xlu0 %1418 }
 0x279   :  { %v1403_v60 = vmul.f32 %v1399_v39, %v1395_v9  ;;  %v1404_v61 = vmul.f32 %v1400_v19, %v1396_v34 }
 0x27a   :  { %v1368_v38 = vmul.f32 %v1366_v5, %v3606_v30  ;;  %v1369_v17 = vmul.f32 %v1367_v36, %v3606_v30  ;;  %v1461_v30 = vperm.slane %v3676_v24, 1 }
 0x27b   :  { %v1411_v10 = vperm.slane %v1403_v60, 0  ;;  %v1412_v32 = vperm.slane %v1404_v61, 0  ;;  %v3667_v37 = vpop.permute.xlu2 %1489  ;;  %v1421_v21 = vperm.slane %v1403_v60, 1  ;;  %v1422_v62 = vperm.slane %v1404_v61, 1 }
 0x27c   :  { %v1370_v52 = vadd.f32 %v1368_v38, %v1356_v20  ;;  %v1371_v6 = vadd.f32 %v1369_v17, %v1357_v43  ;;  %v1431_v3 = vperm.slane %v1403_v60, 2  ;;  %v1432_v8 = vperm.slane %v1404_v61, 2  ;;  %v3695_v17 = vld [vmem:[%s3982_s0 + $0xe] sm:$0x3] }
 0x27d   :  { %v1413_v13 = vmul.f32 %v1411_v10, %v3634_v22  ;;  %v1414_v46 = vmul.f32 %v1412_v32, %v3634_v22  ;;  %v1423_v22 = vmul.f32 %v1421_v21, %v1419_v23  ;;  %v1424_v49 = vmul.f32 %v1422_v62, %v1419_v23 }
 0x27e   :  { %v1384_v14 = vadd.f32 %v1382_v41, %v1370_v52  ;;  %v1385_v11 = vadd.f32 %v1383_v57, %v1371_v6  ;;  %v1442_v20 = vperm.slane %v1404_v61, 3  ;;  %v4148_v52 = vld [vmem:[#allocation32_spill] sm:$0xff]  ;;  %v1522_v61 = vperm.slane %v3695_v17, 1 }
 0x27f   :  { %v3644_v33 = vpop.permute.xlu1 %1428 }
 0x280   :  { %v1415_v42 = vadd.f32 %v1413_v13, %v1384_v14  ;;  %v1416_v28 = vadd.f32 %v1414_v46, %v1385_v11  ;;  %v1433_v47 = vmul.f32 %v1431_v3, %v3644_v33  ;;  %v1434_v63 = vmul.f32 %v1432_v8, %v3644_v33 }
 0x281   :  { %v1444_v57 = vmul.f32 %v1442_v20, %v3638_v1 }
 0x282   :  { %v1425_v5 = vadd.f32 %v1423_v22, %v1415_v42  ;;  %v1426_v36 = vadd.f32 %v1424_v49, %v1416_v28 }
 0x283   :  { %v1514_v48 = vpop.permute.xlu2 %1513 }
 0x284   :  { %v1435_v32 = vadd.f32 %v1433_v47, %v1425_v5  ;;  %v1436_v38 = vadd.f32 %v1434_v63, %v1426_v36  ;;  %v1517_v13 = vsel %vm478_vm7, %v1514_v48, %v3612_v51  ;;  %v1518_v46 = vsel %vm478_vm7, %v3612_v51, %v1514_v48 }
 0x285   :  { %v1526_v8 = vmul.f32 %v1522_v61, %v1518_v46 }
 0x286   :  { %v1446_v11 = vadd.f32 %v1444_v57, %v1436_v38 }
 0x287   :  { %v1453_v16 = vpop.permute.xlu1 %1452  ;;  %v1534_v63 = vperm.slane %v1526_v8, 0 }
 0x288   :  { %v1456_v9 = vsel %vm414_vm6, %v1453_v16, %v1455_v58  ;;  %v1457_v34 = vsel %vm414_vm6, %v1455_v58, %v1453_v16  ;;  %v1441_v16 = vperm.slane %v1403_v60, 3  ;;  %v1521_v60 = vperm.slane %v3695_v17, 0 }
 0x289   :  { %v1464_v59 = vmul.f32 %v1460_v2, %v1456_v9  ;;  %v1465_v35 = vmul.f32 %v1461_v30, %v1457_v34 }
 0x28a   :  { %v1443_v41 = vmul.f32 %v1441_v16, %v3638_v1  ;;  %v1525_v3 = vmul.f32 %v1521_v60, %v1517_v13  ;;  %v1544_v13 = vperm.slane %v1526_v8, 1 }
 0x28b   :  { %v1472_v43 = vperm.slane %v1464_v59, 0  ;;  %v1473_v10 = vperm.slane %v1465_v35, 0  ;;  %v1482_v21 = vperm.slane %v1464_v59, 1  ;;  %v1483_v1 = vperm.slane %v1465_v35, 1  ;;  %v1541_v62 = vpop.permute.xlu2 %1540 }
 0x28c   :  { %v1445_v14 = vadd.f32 %v1443_v41, %v1435_v32  ;;  %v1492_v22 = vperm.slane %v1464_v59, 2  ;;  %v1493_v49 = vperm.slane %v1465_v35, 2  ;;  %v1502_v48 = vperm.slane %v1464_v59, 3  ;;  %v3718_v59 = vld [vmem:[%s3982_s0 + $0x10] sm:$0x3] }
 0x28d   :  { %v1474_v6 = vmul.f32 %v1472_v43, %v4148_v52  ;;  %v1475_v33 = vmul.f32 %v1473_v10, %v4148_v52  ;;  %v1503_v36 = vperm.slane %v1465_v35, 3  ;;  %v1533_v47 = vperm.slane %v1525_v3, 0 }
 0x28e   :  { %v1494_v16 = vmul.f32 %v1492_v22, %v3667_v37  ;;  %v1495_v20 = vmul.f32 %v1493_v49, %v3667_v37  ;;  %v1543_v35 = vperm.slane %v1525_v3, 1  ;;  %v1553_v37 = vperm.slane %v1525_v3, 2 }
 0x28f   :  { %v1480_v29 = vpop.permute.xlu1 %1479  ;;  %v1476_v9 = vadd.f32 %v1474_v6, %v1445_v14  ;;  %v1477_v34 = vadd.f32 %v1475_v33, %v1446_v11  ;;  %v1554_v11 = vperm.slane %v1526_v8, 2 }
 0x290   :  { %v1484_v42 = vmul.f32 %v1482_v21, %v1480_v29  ;;  %v1485_v28 = vmul.f32 %v1483_v1, %v1480_v29  ;;  %v1546_v21 = vmul.f32 %v1544_v13, %v1541_v62  ;;  %v1582_v1 = vperm.slane %v3718_v59, 0 }
 0x291   :  { %v1555_v49 = vmul.f32 %v1553_v37, %v3628_v31 }
 0x292   :  { %v1486_v5 = vadd.f32 %v1484_v42, %v1476_v9  ;;  %v1487_v51 = vadd.f32 %v1485_v28, %v1477_v34  ;;  %v1563_v42 = vperm.slane %v1525_v3, 3  ;;  %v1564_v28 = vperm.slane %v1526_v8, 3 }
 0x293   :  { %v1575_v10 = vpop.permute.xlu2 %1574 }
 0x294   :  { %v1496_v32 = vadd.f32 %v1494_v16, %v1486_v5  ;;  %v1497_v38 = vadd.f32 %v1495_v20, %v1487_v51  ;;  %v1556_v5 = vmul.f32 %v1554_v11, %v3628_v31 }
 0x298   :  { %v1500_v58 = vpop.permute.xlu1 %1499 }
 0x299   :  { %v1504_v43 = vmul.f32 %v1502_v48, %v1500_v58  ;;  %v1505_v29 = vmul.f32 %v1503_v36, %v1500_v58  ;;  %v1545_v58 = vmul.f32 %v1543_v35, %v1541_v62 }
 0x29b   :  { %v1506_v6 = vadd.f32 %v1504_v43, %v1496_v32  ;;  %v1507_v33 = vadd.f32 %v1505_v29, %v1497_v38  ;;  %v1592_v51 = vpop.permute.xlu2 %1591 }
 0x2a1   :  { %v1531_v23 = vpop.permute.xlu1 %1530 }
 0x2a2   :  { %v1535_v41 = vmul.f32 %v1533_v47, %v1531_v23  ;;  %v1536_v57 = vmul.f32 %v1534_v63, %v1531_v23  ;;  %v1583_v23 = vperm.slane %v3718_v59, 1 }
 0x2a4   :  { %v1537_v46 = vadd.f32 %v1535_v41, %v1506_v6  ;;  %v1538_v14 = vadd.f32 %v1536_v57, %v1507_v33  ;;  %v1602_v6 = vpop.permute.xlu0 %1601 }
 0x2a6   :  { %v1547_v9 = vadd.f32 %v1545_v58, %v1537_v46  ;;  %v1548_v34 = vadd.f32 %v1546_v21, %v1538_v14 }
 0x2a8   :  { %v1557_v8 = vadd.f32 %v1555_v49, %v1547_v9  ;;  %v1558_v16 = vadd.f32 %v1556_v5, %v1548_v34 }
 0x2aa   :  { %v1561_v52 = vpop.permute.xlu1 %1560 }
 0x2ab   :  { %v1565_v36 = vmul.f32 %v1563_v42, %v1561_v52  ;;  %v1566_v47 = vmul.f32 %v1564_v28, %v1561_v52  ;;  %v1622_v42 = vpop.permute.xlu2 %1621 }
 0x2ad   :  { %v1567_v32 = vadd.f32 %v1565_v36, %v1557_v8  ;;  %v1568_v38 = vadd.f32 %v1566_v47, %v1558_v16 }
 0x2b2   :  { %v1577_v22 = vpop.permute.xlu1 %1576 }
 0x2b3   :  { %v1578_v48 = vsel %vm542_vm4, %v1575_v10, %v1577_v22  ;;  %v1579_v62 = vsel %vm542_vm4, %v1577_v22, %v1575_v10 }
 0x2b4   :  { %v1586_v63 = vmul.f32 %v1582_v1, %v1578_v48  ;;  %v1587_v3 = vmul.f32 %v1583_v23, %v1579_v62 }
 0x2b6   :  { %v1594_v20 = vperm.slane %v1586_v63, 0  ;;  %v1595_v43 = vperm.slane %v1587_v3, 0  ;;  %v1604_v31 = vperm.slane %v1586_v63, 1  ;;  %v1605_v29 = vperm.slane %v1587_v3, 1 }
 0x2b7   :  { %v1614_v10 = vperm.slane %v1586_v63, 2  ;;  %v1615_v33 = vperm.slane %v1587_v3, 2  ;;  %v1624_v58 = vperm.slane %v1586_v63, 3  ;;  %v1625_v21 = vperm.slane %v1587_v3, 3  ;;  %v2148_v63 = vld [vmem:[%s3981_s3 + $0x4] sm:$0xf] }
 0x2b8   :  { %v1596_v41 = vmul.f32 %v1594_v20, %v1592_v51  ;;  %v1597_v57 = vmul.f32 %v1595_v43, %v1592_v51  ;;  %v1606_v13 = vmul.f32 %v1604_v31, %v1602_v6  ;;  %v1607_v46 = vmul.f32 %v1605_v29, %v1602_v6  ;;  %v2149_v3 = vld [vmem:[%s3981_s3 + $0x8] sm:$0xf]  ;;  %v2151_v20 = vld [vmem:[%s3981_s3 + $0x10] sm:$0xf]  ;;  %v2150_v43 = vld [vmem:[%s3981_s3 + $0xc] sm:$0xf] }
 0x2b9   :  { %v1626_v49 = vmul.f32 %v1624_v58, %v1622_v42  ;;  %v1627_v5 = vmul.f32 %v1625_v21, %v1622_v42  ;;  %v2152_v31 = vld [vmem:[%s3981_s3 + $0x14] sm:$0xf]  ;;  %v3795_v29 = vld [vmem:[%s3981_s3 + $0x1c] sm:$0xf]  ;;  %v4150_v58 = vperm.slane %v3390_v4, 1 }
 0x2ba   :  { %v1598_v52 = vadd.f32 %v1596_v41, %v1567_v32  ;;  %v1599_v35 = vadd.f32 %v1597_v57, %v1568_v38  ;;  %v1612_v14 = vpop.permute.xlu1 %1611 }
 0x2bb   :  { %v1616_v37 = vmul.f32 %v1614_v10, %v1612_v14  ;;  %v1617_v11 = vmul.f32 %v1615_v33, %v1612_v14 }
 0x2bc   :  { %v1608_v9 = vadd.f32 %v1606_v13, %v1598_v52  ;;  %v1609_v34 = vadd.f32 %v1607_v46, %v1599_v35 }
 0x2be   :  { %v1618_v28 = vadd.f32 %v1616_v37, %v1608_v9  ;;  %v1619_v22 = vadd.f32 %v1617_v11, %v1609_v34  ;;  %v4149_v37 = vperm.slane %v3390_v4, 0  ;;  %v2082_v4 = vld [vmem:[%s3984_s4] sm:$0xf] }
 0x2c0   :  { %v1628_v51 = vadd.f32 %v1626_v49, %v1618_v28  ;;  %v1629_v48 = vadd.f32 %v1627_v5, %v1619_v22 }
 0x2c3   :  { %v1634_v62 = vpop.permute.xlu1 %1633 }
 0x2c4   :  { %v1636_v36 = vadd.f32 %v1634_v62, %v1628_v51  ;;  %v1637_v47 = vadd.f32 %v1634_v62, %v1629_v48 }
 0x2c6   :  { %v3732_v8 = vmax.f32 %v1636_v36, 0.0  ;;  %v3734_v16 = vmax.f32 %v1637_v47, 0.0 }
 0x2c8   :  { %1692 = vrot.lane.b32.xlu1 %v3734_v16, %s2298_s28  ;;  %1642 = vrot.lane.b32.xlu0 %v3734_v16, %s2297_s25 }
 0x2c9   :  { %1640 = vrot.lane.b32.xlu2 %v3732_v8, %s2297_s25 }
 0x2cb   :  { %v1652_v38 = vpop.permute.xlu1 %1651 }
 0x2d0   :  { %1721 = vperm.xlu1 %2263, %v2148_v63   ;;  %1711 = vperm.xlu0 %2254, %v2148_v63  }
 0x2d1   :  { %1661 = vperm.xlu2 %2260, %v3603_v25  }
 0x2d4   :  { %v1682_v57 = vpop.permute.xlu1 %1681 }
 0x2d8   :  { %2265 = vset.pattern.permute.xlu0 %v4064_v40  ;;  %1740 = vrot.lane.b32.xlu1 %v3732_v8, %s2300_s30 }
 0x2d9   :  { %1690 = vrot.lane.b32.xlu2 %v3732_v8, %s2298_s28  ;;  %1751 = vperm.xlu0 %2265, %v2149_v3  }
 0x2da   :  { %2266 = vset.pattern.permute.xlu1 %v4120_v56  ;;  %2262 = vset.pattern.permute.xlu2 %v4064_v40 }
 0x2e0   :  { %1761 = vperm.xlu1 %2266, %v2149_v3  }
 0x2e1   :  { %1701 = vperm.xlu2 %2262, %v2148_v63   ;;  %1792 = vrot.lane.b32.xlu0 %v3734_v16, %s2299_s29 }
 0x2e2   :  { %2275 = vset.pattern.permute.xlu0 %v4061_v0 }
 0x2e8   :  { %2268 = vset.pattern.permute.xlu1 %v4061_v0 }
 0x2e9   :  { %2264 = vset.pattern.permute.xlu2 %v4061_v0  ;;  %1873 = vperm.xlu0 %2275, %v2151_v20  }
 0x2ea   :  { %1781 = vperm.xlu1 %2268, %v2149_v3   ;;  %1731 = vperm.xlu2 %2264, %v2148_v63  }
 0x2f1   :  { %2276 = vset.pattern.permute.xlu0 %v4067_v50 }
 0x2f2   :  { %2269 = vset.pattern.permute.xlu1 %v4064_v40  ;;  %1742 = vrot.lane.b32.xlu2 %v3734_v16, %s2300_s30 }
 0x2f3   :  { %1671 = vperm.xlu0 %2276, %v3603_v25   ;;  %1801 = vperm.xlu1 %2269, %v2150_v43   ;;  %v3784_v25 = vld [vmem:[%s3981_s3 + $0x18] sm:$0xf] }
 0x2f4   :  { %2267 = vset.pattern.permute.xlu2 %v4067_v50 }
 0x2fa   :  { %1771 = vperm.xlu2 %2267, %v2149_v3  }
 0x2fb   :  { %1821 = vperm.xlu0 %2276, %v2150_v43   ;;  %2271 = vset.pattern.permute.xlu1 %v4061_v0 }
 0x2fc   :  { %1831 = vperm.xlu1 %2271, %v2150_v43  }
 0x302   :  { %1790 = vrot.lane.b32.xlu2 %v3732_v8, %s2299_s29 }
 0x303   :  { %2270 = vset.pattern.permute.xlu2 %v4120_v56  ;;  %1913 = vperm.xlu0 %2276, %v2152_v31  }
 0x304   :  { %2273 = vset.pattern.permute.xlu1 %v4120_v56 }
 0x305   :  { %1853 = vperm.xlu1 %2273, %v2151_v20  }
 0x30a   :  { %1811 = vperm.xlu2 %2270, %v2150_v43  }
 0x30b   :  { %2281 = vset.pattern.permute.xlu0 %v4120_v56 }
 0x30c   :  { %1953 = vperm.xlu0 %2281, %v3784_v25  }
 0x30d   :  { %1882 = vrot.lane.b32.xlu1 %v3732_v8, %s2302_s18 }
 0x30e   :  { %2277 = vset.pattern.permute.xlu1 %v4064_v40 }
 0x312   :  { %2272 = vset.pattern.permute.xlu2 %v4064_v40 }
 0x313   :  { %1843 = vperm.xlu2 %2272, %v2151_v20  }
 0x314   :  { %2284 = vset.pattern.permute.xlu0 %v4064_v40 }
 0x315   :  { %1893 = vperm.xlu1 %2277, %v2152_v31   ;;  %1993 = vperm.xlu0 %2284, %v3795_v29  }
 0x31b   :  { %2274 = vset.pattern.permute.xlu2 %v4067_v50 }
 0x31c   :  { %1863 = vperm.xlu2 %2274, %v2151_v20  }
 0x31d   :  { %2279 = vset.pattern.permute.xlu1 %v4061_v0  ;;  %2287 = vset.pattern.permute.xlu0 %v4061_v0 }
 0x31e   :  { %1923 = vperm.xlu1 %2279, %v2152_v31   ;;  %2023 = vperm.xlu0 %2287, %v3795_v29  }
 0x323   :  { %v1641_v32 = vpop.permute.xlu2 %1640 }
 0x324   :  { %1884 = vrot.lane.b32.xlu2 %v3734_v16, %s2302_s18 }
 0x325   :  { %2278 = vset.pattern.permute.xlu2 %v4120_v56 }
 0x326   :  { %1934 = vrot.lane.b32.xlu1 %v3734_v16, %s2303_s21  ;;  %2292 = vset.pattern.permute.xlu0 %v4064_v40 }
 0x327   :  { %2282 = vset.pattern.permute.xlu1 %v4067_v50  ;;  %2085 = vperm.xlu0 %2292, %v2082_v4  }
 0x32b   :  { %v1662_v41 = vpop.permute.xlu2 %1661 }
 0x32c   :  { %1903 = vperm.xlu2 %2278, %v2152_v31  }
 0x32e   :  { %1963 = vperm.xlu1 %2282, %v3784_v25  }
 0x333   :  { %v1691_v6 = vpop.permute.xlu2 %1690 }
 0x334   :  { %1932 = vrot.lane.b32.xlu2 %v3732_v8, %s2303_s21 }
 0x335   :  { %2280 = vset.pattern.permute.xlu2 %v4064_v40 }
 0x336   :  { %1982 = vrot.lane.b32.xlu1 %v3732_v8, %s2304_s5 }
 0x337   :  { %2285 = vset.pattern.permute.xlu1 %v4120_v56 }
 0x33a   :  { %v1643_v10 = vpop.permute.xlu0 %1642  ;;  %v1693_v33 = vpop.permute.xlu1 %1692 }
 0x33b   :  { %v1644_v52 = vsel %vm37_vm0, %v1641_v32, %v1643_v10  ;;  %v1645_v35 = vsel %vm37_vm0, %v1643_v10, %v1641_v32  ;;  %v1694_v13 = vsel %vm99_vm1, %v1691_v6, %v1693_v33  ;;  %v1695_v46 = vsel %vm99_vm1, %v1693_v33, %v1691_v6  ;;  %v1702_v14 = vpop.permute.xlu2 %1701 }
 0x33c   :  { %v3827_v11 = vmul.f32 %v1645_v35, %v4149_v37  ;;  %v3831_v21 = vmul.f32 %v1644_v52, %v4150_v58  ;;  %v3835_v9 = vmul.f32 %v1695_v46, %v1158_v26  ;;  %v3839_v34 = vmul.f32 %v1694_v13, %v1159_v12  ;;  %1943 = vperm.xlu2 %2280, %v3784_v25  }
 0x33e   :  { %v1704_v42 = vperm.slane %v3835_v9, 0  ;;  %v1705_v28 = vperm.slane %v3839_v34, 0  ;;  %2003 = vperm.xlu1 %2285, %v3795_v29   ;;  %v1654_v44 = vperm.slane %v3827_v11, 0  ;;  %v1655_v12 = vperm.slane %v3831_v21, 0 }
 0x33f   :  { %v1724_v49 = vperm.slane %v3835_v9, 2  ;;  %v1725_v5 = vperm.slane %v3839_v34, 2  ;;  %v1664_v51 = vperm.slane %v3827_v11, 1  ;;  %v1665_v48 = vperm.slane %v3831_v21, 1 }
 0x340   :  { %v3848_v22 = vmul.f32 %v1704_v42, %v1702_v14  ;;  %v3850_v26 = vmul.f32 %v1705_v28, %v1702_v14  ;;  %v1656_v47 = vmul.f32 %v1654_v44, %v1652_v38  ;;  %v1657_v63 = vmul.f32 %v1655_v12, %v1652_v38 }
 0x341   :  { %v1684_v3 = vperm.slane %v3827_v11, 3  ;;  %v1685_v20 = vperm.slane %v3831_v21, 3  ;;  %v1734_v32 = vperm.slane %v3835_v9, 3  ;;  %v1735_v6 = vperm.slane %v3839_v34, 3 }
 0x342   :  { %v3858_v62 = vpop.permute.xlu0 %1711  ;;  %v1722_v36 = vpop.permute.xlu1 %1721  ;;  %v1666_v33 = vmul.f32 %v1664_v51, %v1662_v41  ;;  %v1667_v52 = vmul.f32 %v1665_v48, %v1662_v41  ;;  %v2155_v41 = vld [vmem:[%s3981_s3 + $0x20] sm:$0xf] }
 0x343   :  { %v3862_v43 = vmul.f32 %v1724_v49, %v1722_v36  ;;  %v3864_v31 = vmul.f32 %v1725_v5, %v1722_v36  ;;  %v1686_v35 = vmul.f32 %v1684_v3, %v1682_v57  ;;  %v1687_v13 = vmul.f32 %v1685_v20, %v1682_v57 }
 0x344   :  { %2283 = vset.pattern.permute.xlu2 %v4061_v0  ;;  %v1732_v10 = vpop.permute.xlu2 %1731  ;;  %v1668_v14 = vadd.f32 %v1666_v33, %v1656_v47  ;;  %v1669_v37 = vadd.f32 %v1667_v52, %v1657_v63  ;;  %v1674_v63 = vperm.slane %v3827_v11, 2  ;;  %v1675_v3 = vperm.slane %v3831_v21, 2 }
 0x345   :  { %v3869_v38 = vmul.f32 %v1734_v32, %v1732_v10  ;;  %v3871_v46 = vmul.f32 %v1735_v6, %v1732_v10  ;;  %1973 = vperm.xlu2 %2283, %v3784_v25  }
 0x346   :  { %2034 = vrot.lane.b32.xlu1 %v3734_v16, %s2301_s17 }
 0x347   :  { %2288 = vset.pattern.permute.xlu1 %v4064_v40 }
 0x34a   :  { %v1741_v58 = vpop.permute.xlu1 %1740 }
 0x34b   :  { %v1752_v42 = vpop.permute.xlu0 %1751 }
 0x34c   :  { %v1743_v57 = vpop.permute.xlu2 %1742 }
 0x34d   :  { %v1745_v28 = vsel %vm163_vm2, %v1743_v57, %v1741_v58  ;;  %1984 = vrot.lane.b32.xlu2 %v3734_v16, %s2304_s5 }
 0x34e   :  { %v3886_v25 = vmul.f32 %v1745_v28, %v1219_v53  ;;  %2043 = vperm.xlu1 %2288, %v2155_v41   ;;  %2286 = vset.pattern.permute.xlu2 %v4067_v50  ;;  %v1715_v28 = vperm.slane %v3839_v34, 1 }
 0x350   :  { %v1764_v40 = vperm.slane %v3886_v25, 1  ;;  %v1774_v49 = vperm.slane %v3886_v25, 2 }
 0x352   :  { %v1762_v4 = vpop.permute.xlu1 %1761 }
 0x353   :  { %v1766_v44 = vmul.f32 %v1764_v40, %v1762_v4  ;;  %v1793_v12 = vpop.permute.xlu0 %1792 }
 0x354   :  { %v1772_v5 = vpop.permute.xlu2 %1771 }
 0x355   :  { %v1776_v51 = vmul.f32 %v1774_v49, %v1772_v5  ;;  %2032 = vrot.lane.b32.xlu2 %v3732_v8, %s2301_s17  ;;  %v1717_v49 = vmul.f32 %v1715_v28, %v3858_v62 }
 0x356   :  { %2290 = vset.pattern.permute.xlu1 %v4067_v50  ;;  %v1744_v50 = vsel %vm163_vm2, %v1741_v58, %v1743_v57 }
 0x357   :  { %2063 = vperm.xlu1 %2290, %v2155_v41   ;;  %v1747_v11 = vmul.f32 %v1744_v50, %v1220_v54 }
 0x35b   :  { %v3894_v53 = vpop.permute.xlu0 %1873 }
 0x35c   :  { %v1791_v48 = vpop.permute.xlu2 %1790  ;;  %v1782_v36 = vpop.permute.xlu1 %1781 }
 0x35d   :  { %2013 = vperm.xlu2 %2286, %v3795_v29   ;;  %v1714_v29 = vperm.slane %v3835_v9, 1  ;;  %v1755_v9 = vperm.slane %v1747_v11, 0 }
 0x364   :  { %v3897_v47 = vpop.permute.xlu2 %1811 }
 0x365   :  { %v1672_v20 = vpop.permute.xlu0 %1671  ;;  %2289 = vset.pattern.permute.xlu2 %v4120_v56  ;;  %v1802_v32 = vpop.permute.xlu1 %1801  ;;  %v1716_v56 = vmul.f32 %v1714_v29, %v3858_v62  ;;  %v1765_v62 = vperm.slane %v1747_v11, 1 }
 0x366   :  { %v1676_v6 = vmul.f32 %v1674_v63, %v1672_v20  ;;  %v1677_v10 = vmul.f32 %v1675_v3, %v1672_v20  ;;  %2053 = vperm.xlu2 %2289, %v2155_v41   ;;  %v1775_v20 = vperm.slane %v1747_v11, 2 }
 0x368   :  { %v1678_v33 = vadd.f32 %v1676_v6, %v1668_v14  ;;  %v1679_v52 = vadd.f32 %v1677_v10, %v1669_v37  ;;  %v1754_v14 = vperm.slane %v3886_v25, 0  ;;  %v1794_v6 = vsel %vm227_vm3, %v1791_v48, %v1793_v12 }
 0x369   :  { %v1767_v10 = vmul.f32 %v1765_v62, %v1762_v4 }
 0x36a   :  { %v1688_v21 = vadd.f32 %v1686_v35, %v1678_v33  ;;  %v1689_v40 = vadd.f32 %v1687_v13, %v1679_v52  ;;  %v1756_v13 = vmul.f32 %v1754_v14, %v1752_v42  ;;  %v1785_v33 = vperm.slane %v1747_v11, 3 }
 0x36c   :  { %v1708_v63 = vadd.f32 %v3848_v22, %v1688_v21  ;;  %v1709_v3 = vadd.f32 %v3850_v26, %v1689_v40  ;;  %v1757_v22 = vmul.f32 %v1755_v9, %v1752_v42  ;;  %v1787_v40 = vmul.f32 %v1785_v33, %v1782_v36 }
 0x36d   :  { %v3912_v58 = vpop.permute.xlu2 %1843 }
 0x36e   :  { %v1718_v37 = vadd.f32 %v1716_v56, %v1708_v63  ;;  %v1719_v34 = vadd.f32 %v1717_v49, %v1709_v3  ;;  %2291 = vset.pattern.permute.xlu2 %v4061_v0  ;;  %v1832_v55 = vpop.permute.xlu1 %1831  ;;  %v1795_v0 = vsel %vm227_vm3, %v1793_v12, %v1791_v48 }
 0x36f   :  { %2073 = vperm.xlu2 %2291, %v2155_v41   ;;  %v1796_v42 = vmul.f32 %v1795_v0, %v1280_v7 }
 0x370   :  { %v1728_v54 = vadd.f32 %v3862_v43, %v1718_v37  ;;  %v1729_v35 = vadd.f32 %v3864_v31, %v1719_v34  ;;  %v1777_v43 = vmul.f32 %v1775_v20, %v1772_v5  ;;  %v1784_v31 = vperm.slane %v3886_v25, 3  ;;  %v1822_v37 = vpop.permute.xlu0 %1821 }
 0x371   :  { %v1804_v5 = vperm.slane %v1796_v42, 0  ;;  %v1814_v63 = vperm.slane %v1796_v42, 1  ;;  %v1824_v34 = vperm.slane %v1796_v42, 2 }
 0x372   :  { %v1738_v26 = vadd.f32 %v3869_v38, %v1728_v54  ;;  %v1739_v57 = vadd.f32 %v3871_v46, %v1729_v35  ;;  %v1797_v38 = vmul.f32 %v1794_v6, %v1281_v15  ;;  %v1786_v21 = vmul.f32 %v1784_v31, %v1782_v36 }
 0x373   :  { %v1806_v25 = vmul.f32 %v1804_v5, %v1802_v32  ;;  %v1826_v35 = vmul.f32 %v1824_v34, %v1822_v37 }
 0x374   :  { %v1758_v41 = vadd.f32 %v1756_v13, %v1738_v26  ;;  %v1759_v50 = vadd.f32 %v1757_v22, %v1739_v57  ;;  %v1805_v49 = vperm.slane %v1797_v38, 0  ;;  %v1815_v3 = vperm.slane %v1797_v38, 1 }
 0x375   :  { %v1825_v54 = vperm.slane %v1797_v38, 2  ;;  %v1835_v26 = vperm.slane %v1797_v38, 3 }
 0x376   :  { %v1768_v46 = vadd.f32 %v1766_v44, %v1758_v41  ;;  %v1769_v52 = vadd.f32 %v1767_v10, %v1759_v50  ;;  %v1864_v29 = vpop.permute.xlu2 %1863  ;;  %v1807_v11 = vmul.f32 %v1805_v49, %v1802_v32  ;;  %v1816_v44 = vmul.f32 %v1814_v63, %v3897_v47 }
 0x377   :  { %v1854_v28 = vpop.permute.xlu1 %1853  ;;  %v1817_v9 = vmul.f32 %v1815_v3, %v3897_v47  ;;  %v1827_v62 = vmul.f32 %v1825_v54, %v1822_v37  ;;  %v1834_v32 = vperm.slane %v1796_v42, 3  ;;  %v1837_v0 = vmul.f32 %v1835_v26, %v1832_v55 }
 0x378   :  { %v1778_v12 = vadd.f32 %v1776_v51, %v1768_v46  ;;  %v1779_v4 = vadd.f32 %v1777_v43, %v1769_v52  ;;  %v1847_v10 = vperm.slane %v3734_v16, 0  ;;  %v1846_v41 = vperm.slane %v3732_v8, 0 }
 0x379   :  { %v1836_v6 = vmul.f32 %v1834_v32, %v1832_v55  ;;  %v1856_v52 = vperm.slane %v3732_v8, 1  ;;  %v1857_v42 = vperm.slane %v3734_v16, 1  ;;  %v1877_v63 = vperm.slane %v3734_v16, 3 }
 0x37a   :  { %v1788_v48 = vadd.f32 %v1786_v21, %v1778_v12  ;;  %v1789_v56 = vadd.f32 %v1787_v40, %v1779_v4  ;;  %v1848_v43 = vmul.f32 %v1846_v41, %v3912_v58  ;;  %v1849_v31 = vmul.f32 %v1847_v10, %v3912_v58 }
 0x37b   :  { %v1858_v21 = vmul.f32 %v1856_v52, %v1854_v28  ;;  %v1859_v40 = vmul.f32 %v1857_v42, %v1854_v28  ;;  %v1867_v12 = vperm.slane %v3734_v16, 2  ;;  %v1866_v4 = vperm.slane %v3732_v8, 2 }
 0x37c   :  { %v1808_v7 = vadd.f32 %v1806_v25, %v1788_v48  ;;  %v1809_v14 = vadd.f32 %v1807_v11, %v1789_v56  ;;  %v1876_v11 = vperm.slane %v3732_v8, 3  ;;  %v1879_v37 = vmul.f32 %v1877_v63, %v3894_v53 }
 0x37d   :  { %v1868_v49 = vmul.f32 %v1866_v4, %v1864_v29  ;;  %v1869_v25 = vmul.f32 %v1867_v12, %v1864_v29 }
 0x37e   :  { %v1885_v27 = vpop.permute.xlu2 %1884  ;;  %v1818_v36 = vadd.f32 %v1816_v44, %v1808_v7  ;;  %v1819_v51 = vadd.f32 %v1817_v9, %v1809_v14  ;;  %v1878_v9 = vmul.f32 %v1876_v11, %v3894_v53 }
 0x37f   :  { %v1883_v15 = vpop.permute.xlu1 %1882 }
 0x380   :  { %v1828_v13 = vadd.f32 %v1826_v35, %v1818_v36  ;;  %v1829_v22 = vadd.f32 %v1827_v62, %v1819_v51  ;;  %v1886_v5 = vsel %vm350_vm5, %v1883_v15, %v1885_v27  ;;  %v1887_v58 = vsel %vm350_vm5, %v1885_v27, %v1883_v15 }
 0x381   :  { %v1888_v7 = vmul.f32 %v1886_v5, %v1399_v39  ;;  %v1889_v14 = vmul.f32 %v1887_v58, %v1400_v19 }
 0x382   :  { %v1838_v47 = vadd.f32 %v1836_v6, %v1828_v13  ;;  %v1839_v50 = vadd.f32 %v1837_v0, %v1829_v22  ;;  %v1914_v22 = vpop.permute.xlu0 %1913 }
 0x383   :  { %v1896_v36 = vperm.slane %v1888_v7, 0  ;;  %v1897_v8 = vperm.slane %v1889_v14, 0  ;;  %v1906_v18 = vperm.slane %v1888_v7, 1  ;;  %v1907_v19 = vperm.slane %v1889_v14, 1 }
 0x384   :  { %v1850_v33 = vadd.f32 %v1848_v43, %v1838_v47  ;;  %v1851_v46 = vadd.f32 %v1849_v31, %v1839_v50  ;;  %v1916_v62 = vperm.slane %v1888_v7, 2  ;;  %v1917_v13 = vperm.slane %v1889_v14, 2 }
 0x385   :  { %v1926_v43 = vperm.slane %v1888_v7, 3  ;;  %v1927_v31 = vperm.slane %v1889_v14, 3 }
 0x386   :  { %v1904_v57 = vpop.permute.xlu2 %1903  ;;  %v1860_v48 = vadd.f32 %v1858_v21, %v1850_v33  ;;  %v1861_v56 = vadd.f32 %v1859_v40, %v1851_v46  ;;  %v1918_v47 = vmul.f32 %v1916_v62, %v1914_v22  ;;  %v1919_v50 = vmul.f32 %v1917_v13, %v1914_v22 }
 0x387   :  { %v1894_v20 = vpop.permute.xlu1 %1893  ;;  %v1908_v32 = vmul.f32 %v1906_v18, %v1904_v57  ;;  %v1909_v26 = vmul.f32 %v1907_v19, %v1904_v57 }
 0x388   :  { %v1870_v28 = vadd.f32 %v1868_v49, %v1860_v48  ;;  %v1871_v3 = vadd.f32 %v1869_v25, %v1861_v56  ;;  %v1898_v51 = vmul.f32 %v1896_v36, %v1894_v20  ;;  %v1899_v16 = vmul.f32 %v1897_v8, %v1894_v20 }
 0x38a   :  { %v1880_v15 = vadd.f32 %v1878_v9, %v1870_v28  ;;  %v1881_v29 = vadd.f32 %v1879_v37, %v1871_v3  ;;  %v1954_v56 = vpop.permute.xlu0 %1953 }
 0x38c   :  { %v1900_v54 = vadd.f32 %v1898_v51, %v1880_v15  ;;  %v1901_v35 = vadd.f32 %v1899_v16, %v1881_v29 }
 0x38e   :  { %v1933_v38 = vpop.permute.xlu2 %1932  ;;  %v1910_v10 = vadd.f32 %v1908_v32, %v1900_v54  ;;  %v1911_v41 = vadd.f32 %v1909_v26, %v1901_v35 }
 0x390   :  { %v1924_v55 = vpop.permute.xlu1 %1923  ;;  %v1920_v52 = vadd.f32 %v1918_v47, %v1910_v10  ;;  %v1921_v42 = vadd.f32 %v1919_v50, %v1911_v41 }
 0x391   :  { %v1929_v21 = vmul.f32 %v1927_v31, %v1924_v55 }
 0x393   :  { %v1931_v24 = vadd.f32 %v1929_v21, %v1921_v42 }
 0x396   :  { %v1944_v44 = vpop.permute.xlu2 %1943 }
 0x398   :  { %v1935_v27 = vpop.permute.xlu1 %1934 }
 0x399   :  { %v1936_v34 = vsel %vm414_vm6, %v1933_v38, %v1935_v27  ;;  %v1937_v39 = vsel %vm414_vm6, %v1935_v27, %v1933_v38  ;;  %v1928_v38 = vmul.f32 %v1926_v43, %v1924_v55 }
 0x39a   :  { %v1938_v6 = vmul.f32 %v1936_v34, %v1460_v2  ;;  %v1939_v20 = vmul.f32 %v1937_v39, %v1461_v30  ;;  %v1994_v39 = vpop.permute.xlu0 %1993 }
 0x39b   :  { %v1930_v4 = vadd.f32 %v1928_v38, %v1920_v52 }
 0x39c   :  { %v1946_v33 = vperm.slane %v1938_v6, 0  ;;  %v1947_v46 = vperm.slane %v1939_v20, 0  ;;  %v1956_v30 = vperm.slane %v1938_v6, 1  ;;  %v1957_v48 = vperm.slane %v1939_v20, 1 }
 0x39d   :  { %v1966_v11 = vperm.slane %v1938_v6, 2  ;;  %v1967_v63 = vperm.slane %v1939_v20, 2  ;;  %v1976_v8 = vperm.slane %v1938_v6, 3  ;;  %v1977_v51 = vperm.slane %v1939_v20, 3 }
 0x39e   :  { %v1948_v40 = vmul.f32 %v1946_v33, %v1944_v44  ;;  %v1949_v12 = vmul.f32 %v1947_v46, %v1944_v44  ;;  %v1958_v55 = vmul.f32 %v1956_v30, %v1954_v56  ;;  %v1959_v28 = vmul.f32 %v1957_v48, %v1954_v56 }
 0x39f   :  { %v1974_v53 = vpop.permute.xlu2 %1973 }
 0x3a0   :  { %v1964_v0 = vpop.permute.xlu1 %1963  ;;  %v1950_v49 = vadd.f32 %v1948_v40, %v1930_v4  ;;  %v1951_v25 = vadd.f32 %v1949_v12, %v1931_v24  ;;  %v1978_v18 = vmul.f32 %v1976_v8, %v1974_v53  ;;  %v1979_v19 = vmul.f32 %v1977_v51, %v1974_v53 }
 0x3a1   :  { %v1968_v37 = vmul.f32 %v1966_v11, %v1964_v0  ;;  %v1969_v27 = vmul.f32 %v1967_v63, %v1964_v0 }
 0x3a2   :  { %v1960_v44 = vadd.f32 %v1958_v55, %v1950_v49  ;;  %v1961_v9 = vadd.f32 %v1959_v28, %v1951_v25  ;;  %v2024_v38 = vpop.permute.xlu0 %2023 }
 0x3a4   :  { %v1970_v16 = vadd.f32 %v1968_v37, %v1960_v44  ;;  %v1971_v34 = vadd.f32 %v1969_v27, %v1961_v9 }
 0x3a6   :  { %v1980_v17 = vadd.f32 %v1978_v18, %v1970_v16 }
 0x3a7   :  { %v1985_v57 = vpop.permute.xlu2 %1984 }
 0x3a8   :  { %v1983_v2 = vpop.permute.xlu1 %1982 }
 0x3a9   :  { %v1986_v5 = vsel %vm478_vm7, %v1983_v2, %v1985_v57  ;;  %v1987_v58 = vsel %vm478_vm7, %v1985_v57, %v1983_v2 }
 0x3aa   :  { %v1988_v3 = vmul.f32 %v1986_v5, %v1521_v60  ;;  %v1989_v7 = vmul.f32 %v1987_v58, %v1522_v61  ;;  %v1981_v61 = vadd.f32 %v1979_v19, %v1971_v34  ;;  %v2086_v8 = vpop.permute.xlu0 %2085  ;;  %v2093_v34 = vld.sshfl [vmem:[#allocation1 + $0x8] sm:$0xff pattern:$0x75316420]  ;;  %v2092_v19 = vld.sshfl [vmem:[#allocation1] sm:$0xff pattern:$0x75316420] }
 0x3ac   :  { %v1996_v29 = vperm.slane %v1988_v3, 0  ;;  %v1997_v36 = vperm.slane %v1989_v7, 0  ;;  %v2006_v62 = vperm.slane %v1988_v3, 1  ;;  %v2007_v13 = vperm.slane %v1989_v7, 1 }
 0x3ad   :  { %v2016_v32 = vperm.slane %v1988_v3, 2  ;;  %v2017_v26 = vperm.slane %v1989_v7, 2  ;;  %v2026_v33 = vperm.slane %v1988_v3, 3  ;;  %v2027_v46 = vperm.slane %v1989_v7, 3 }
 0x3ae   :  { %v1998_v54 = vmul.f32 %v1996_v29, %v1994_v39  ;;  %v1999_v60 = vmul.f32 %v1997_v36, %v1994_v39 }
 0x3af   :  { %v2033_v14 = vpop.permute.xlu2 %2032  ;;  %v2028_v4 = vmul.f32 %v2026_v33, %v2024_v38  ;;  %v2029_v24 = vmul.f32 %v2027_v46, %v2024_v38 }
 0x3b0   :  { %v2004_v15 = vpop.permute.xlu1 %2003  ;;  %v2000_v20 = vadd.f32 %v1998_v54, %v1980_v17  ;;  %v2001_v10 = vadd.f32 %v1999_v60, %v1981_v61 }
 0x3b1   :  { %v2008_v41 = vmul.f32 %v2006_v62, %v2004_v15  ;;  %v2009_v53 = vmul.f32 %v2007_v13, %v2004_v15 }
 0x3b3   :  { %v2010_v52 = vadd.f32 %v2008_v41, %v2000_v20  ;;  %v2011_v42 = vadd.f32 %v2009_v53, %v2001_v10 }
 0x3b7   :  { %v2014_v35 = vpop.permute.xlu2 %2013 }
 0x3b8   :  { %v2035_v22 = vpop.permute.xlu1 %2034  ;;  %v2018_v47 = vmul.f32 %v2016_v32, %v2014_v35  ;;  %v2019_v50 = vmul.f32 %v2017_v26, %v2014_v35 }
 0x3b9   :  { %v2036_v0 = vsel %vm542_vm4, %v2033_v14, %v2035_v22  ;;  %v2037_v6 = vsel %vm542_vm4, %v2035_v22, %v2033_v14 }
 0x3ba   :  { %v2038_v43 = vmul.f32 %v2036_v0, %v1582_v1  ;;  %v2039_v31 = vmul.f32 %v2037_v6, %v1583_v23  ;;  %v2020_v21 = vadd.f32 %v2018_v47, %v2010_v52  ;;  %v2021_v45 = vadd.f32 %v2019_v50, %v2011_v42 }
 0x3bc   :  { %v2046_v40 = vperm.slane %v2038_v43, 0  ;;  %v2047_v12 = vperm.slane %v2039_v31, 0  ;;  %v2030_v56 = vadd.f32 %v2028_v4, %v2020_v21  ;;  %v2031_v1 = vadd.f32 %v2029_v24, %v2021_v45 }
 0x3bd   :  { %v2056_v5 = vperm.slane %v2038_v43, 1  ;;  %v2057_v59 = vperm.slane %v2039_v31, 1  ;;  %v2066_v11 = vperm.slane %v2038_v43, 2  ;;  %v2067_v63 = vperm.slane %v2039_v31, 2 }
 0x3be   :  { %v2076_v28 = vperm.slane %v2038_v43, 3  ;;  %v2077_v3 = vperm.slane %v2039_v31, 3 }
 0x3c0   :  { %v2054_v57 = vpop.permute.xlu2 %2053  ;;  %v2044_v2 = vpop.permute.xlu1 %2043 }
 0x3c1   :  { %v2048_v30 = vmul.f32 %v2046_v40, %v2044_v2  ;;  %v2049_v48 = vmul.f32 %v2047_v12, %v2044_v2  ;;  %v2058_v49 = vmul.f32 %v2056_v5, %v2054_v57  ;;  %v2059_v25 = vmul.f32 %v2057_v59, %v2054_v57 }
 0x3c3   :  { %v2050_v23 = vadd.f32 %v2048_v30, %v2030_v56  ;;  %v2051_v58 = vadd.f32 %v2049_v48, %v2031_v1 }
 0x3c5   :  { %v2060_v14 = vadd.f32 %v2058_v49, %v2050_v23  ;;  %v2061_v44 = vadd.f32 %v2059_v25, %v2051_v58 }
 0x3c9   :  { %v2074_v55 = vpop.permute.xlu2 %2073  ;;  %v2064_v7 = vpop.permute.xlu1 %2063 }
 0x3ca   :  { %v2068_v9 = vmul.f32 %v2066_v11, %v2064_v7  ;;  %v2069_v37 = vmul.f32 %v2067_v63, %v2064_v7  ;;  %v2078_v27 = vmul.f32 %v2076_v28, %v2074_v55  ;;  %v2079_v15 = vmul.f32 %v2077_v3, %v2074_v55 }
 0x3cc   :  { %v2070_v29 = vadd.f32 %v2068_v9, %v2060_v14  ;;  %v2071_v36 = vadd.f32 %v2069_v37, %v2061_v44 }
 0x3ce   :  { %v2080_v51 = vadd.f32 %v2078_v27, %v2070_v29  ;;  %v2081_v16 = vadd.f32 %v2079_v15, %v2071_v36 }
 0x3d0   :  { %v2088_v39 = vadd.f32 %v2086_v8, %v2080_v51  ;;  %v2089_v18 = vadd.f32 %v2086_v8, %v2081_v16 }
 0x3d2   :  { %v2097_v54 = vadd.f32 %v2093_v34, %v2089_v18  ;;  %v2096_v60 = vadd.f32 %v2092_v19, %v2088_v39 }
 0x3d4   :  { %v2100_v35 = vrot.slane %v2097_v54, 4 }
 0x3d6   :  { %v2101_v17 = vsel %vm1076_vm8, %v2096_v60, %v2100_v35 }
 0x3d7   :  { %2156 = vst [vmem:[%s3985_s6 + $0x8] sm:$0xff] %v2101_v17 }

</bundles_post_ra>
